<compile_context>
chip_gen: v6e
topology: v6e:2x2x1
jax: 0.10.0
libtpu: 0.0.40
codegen_flags: <defaults>
</compile_context>

<pallas_src>
import jax
import jax.numpy as jnp
from jax.experimental import pallas as pl
from jax.experimental.pallas import tpu as pltpu


# ---------------------------------------------------------------------------
# Fused kernel: GCN (all T slices) + node mean + GRU, one batch element / step.
# ---------------------------------------------------------------------------
def _astgcn_cell_kernel(x_ref, ak_ref, mc_ref, wt_ref, bc_ref,
                        wih_ref, whh_ref, bih_ref, bhh_ref, o_ref):
    # x_ref  : (1, C, N*T)   one batch element, native layout (no permute)
    # ak_ref : (N*T, N*T)    kron(A^T, I_T)  -- per-slice A in one matmul
    # mc_ref : (N*T, T)      kron(1_N / N, I_T)  -- node-mean operator
    # wt_ref : (H, C)        GraphConv weight, feature-major
    # bc_ref : (H, 1)        GraphConv bias (column)
    # wih_ref, whh_ref : (3, H, H)  PyTorch-native [r, z, n] gate blocks
    # bih_ref, bhh_ref : (3, H, 1)  gate biases (columns)
    # o_ref  : (1, H, 1)     last hidden state for this batch element
    T = mc_ref.shape[1]
    H = wt_ref.shape[0]

    # ---------------- GCN over all T time steps (feature-major) -------------
    x2 = x_ref[0]                                                     # (C, N*T)
    xw = jnp.dot(wt_ref[...], x2, preferred_element_type=jnp.float32)  # (H, N*T)
    ax = jnp.dot(xw, ak_ref[...], preferred_element_type=jnp.float32)  # (H, N*T)
    ax = jnp.maximum(ax + bc_ref[...], 0.0)                  # relu(A @ X @ W + b)
    g = jnp.dot(ax, mc_ref[...], preferred_element_type=jnp.float32)   # (H, T)

    # ---------------- GRU (batch_first, h0 = 0), gate order [r, z, n] -------
    wih_r, wih_z, wih_n = wih_ref[0], wih_ref[1], wih_ref[2]
    whh_r, whh_z, whh_n = whh_ref[0], whh_ref[1], whh_ref[2]
    bih_r, bih_z, bih_n = bih_ref[0], bih_ref[1], bih_ref[2]
    bhh_r, bhh_z, bhh_n = bhh_ref[0], bhh_ref[1], bhh_ref[2]

    # Input projection hoisted out of the recurrence: all T steps at once.
    gx_r = jnp.dot(wih_r, g, preferred_element_type=jnp.float32) + bih_r   # (H, T)
    gx_z = jnp.dot(wih_z, g, preferred_element_type=jnp.float32) + bih_z
    gx_n = jnp.dot(wih_n, g, preferred_element_type=jnp.float32) + bih_n

    h = jnp.zeros((H, 1), jnp.float32)
    for t in range(T):        # static unroll; only h @ W_hh stays serialized
        gh_r = jnp.dot(whh_r, h, preferred_element_type=jnp.float32) + bhh_r
        gh_z = jnp.dot(whh_z, h, preferred_element_type=jnp.float32) + bhh_z
        gh_n = jnp.dot(whh_n, h, preferred_element_type=jnp.float32) + bhh_n
        r = jax.nn.sigmoid(gx_r[:, t:t + 1] + gh_r)
        z = jax.nn.sigmoid(gx_z[:, t:t + 1] + gh_z)
        n = jnp.tanh(gx_n[:, t:t + 1] + r * gh_n)
        h = (1.0 - z) * n + z * h

    o_ref[0] = h


# ---------------------------------------------------------------------------
# Wrapper
# ---------------------------------------------------------------------------
def astgcn_cell_forward(x, A, gcn_w, gcn_b, w_ih, w_hh, b_ih, b_hh):
    B, C, N, T = x.shape
    H = gcn_w.shape[1]
    NT = N * T

    # --- one-time constant / weight prep (no HBM pass over activations) -----
    x2 = x.reshape(B, C, NT)                       # metadata-only reshape
    eye_t = jnp.eye(T, dtype=jnp.float32)
    ak = jnp.kron(A.T, eye_t)                      # (NT, NT)
    mc = jnp.kron(jnp.full((N, 1), 1.0 / N, jnp.float32), eye_t)   # (NT, T)
    wt = gcn_w.T                                   # (H, C)
    bc = gcn_b.reshape(H, 1)
    wih3 = w_ih.reshape(3, H, H)                   # PyTorch [r, z, n] blocks
    whh3 = w_hh.reshape(3, H, H)
    bih3 = b_ih.reshape(3, H, 1)
    bhh3 = b_hh.reshape(3, H, 1)

    cost = pl.CostEstimate(
        flops=B * (2 * H * C * NT + 2 * H * NT * NT + 2 * H * NT * T
                   + 12 * H * H * T),
        transcendentals=B * T * 3 * H,
        bytes_accessed=4 * (B * C * NT + NT * NT + NT * T + H * C + H
                            + 6 * H * H + 6 * H + B * H),
    )

    out = pl.pallas_call(
        _astgcn_cell_kernel,
        out_shape=jax.ShapeDtypeStruct((B, H, 1), jnp.float32),
        grid=(B,),
        in_specs=[
            pl.BlockSpec((1, C, NT), lambda b: (b, 0, 0)),
            pl.BlockSpec((NT, NT), lambda b: (0, 0)),
            pl.BlockSpec((NT, T), lambda b: (0, 0)),
            pl.BlockSpec((H, C), lambda b: (0, 0)),
            pl.BlockSpec((H, 1), lambda b: (0, 0)),
            pl.BlockSpec((3, H, H), lambda b: (0, 0, 0)),
            pl.BlockSpec((3, H, H), lambda b: (0, 0, 0)),
            pl.BlockSpec((3, H, 1), lambda b: (0, 0, 0)),
            pl.BlockSpec((3, H, 1), lambda b: (0, 0, 0)),
        ],
        out_specs=pl.BlockSpec((1, H, 1), lambda b: (b, 0, 0)),
        compiler_params=pltpu.CompilerParams(
            dimension_semantics=("parallel",),
        ),
        cost_estimate=cost,
    )(x2, ak, mc, wt, bc, wih3, whh3, bih3, bhh3)

    return out.reshape(B, H)                       # == out[:, -1, :]


# ---------------------------------------------------------------------------
# Pure-JAX reference (mirrors the PyTorch forward) for a sanity check.
# ---------------------------------------------------------------------------
def _reference(x, A, gcn_w, gcn_b, w_ih, w_hh, b_ih, b_hh):
    B, C, N, T = x.shape
    H = gcn_w.shape[1]
    xp = jnp.transpose(x, (0, 3, 2, 1))                                # (B, T, N, C)
    g = jnp.einsum("nm,btmc->btnc", A, xp) @ gcn_w + gcn_b
    g = jnp.maximum(g, 0.0)
    g = g.mean(axis=2)                                                 # (B, T, H)
    h = jnp.zeros((B, H), jnp.float32)
    for t in range(T):
        x_t = g[:, t, :]
        gx = x_t @ w_ih.T + b_ih
        gh = h @ w_hh.T + b_hh
        r = jax.nn.sigmoid(gx[:, :H] + gh[:, :H])
        z = jax.nn.sigmoid(gx[:, H:2 * H] + gh[:, H:2 * H])
        n = jnp.tanh(gx[:, 2 * H:] + r * gh[:, 2 * H:])
        h = (1.0 - z) * n + z * h
    return h


if __name__ == "__main__":
    # Shapes implied by the forward: x is (B, C_in, N_nodes, T_seq).
    B, C_in, N_nodes, T_seq, H = 2, 4, 16, 8, 32

    key = jax.random.PRNGKey(0)
    kx, ka, kw, kb, kih, khh, kbi, kbh = jax.random.split(key, 8)

    x = jax.random.normal(kx, (B, C_in, N_nodes, T_seq), jnp.float32)

    # Deterministic row-normalized adjacency with self loops.
    adj = (jax.random.uniform(ka, (N_nodes, N_nodes)) < 0.3).astype(jnp.float32)
    adj = jnp.maximum(adj, adj.T) + jnp.eye(N_nodes, dtype=jnp.float32)
    A = adj / jnp.sum(adj, axis=1, keepdims=True)

    # GraphConv params: Linear(in_c -> hid_c).
    gcn_w = 0.1 * jax.random.normal(kw, (C_in, H), jnp.float32)
    gcn_b = 0.1 * jax.random.normal(kb, (H,), jnp.float32)

    # GRU params (PyTorch layout: (3H, H) stacked [r, z, n]).
    scale = 1.0 / jnp.sqrt(H)
    w_ih = scale * jax.random.normal(kih, (3 * H, H), jnp.float32)
    w_hh = scale * jax.random.normal(khh, (3 * H, H), jnp.float32)
    b_ih = scale * jax.random.normal(kbi, (3 * H,), jnp.float32)
    b_hh = scale * jax.random.normal(kbh, (3 * H,), jnp.float32)

    out = astgcn_cell_forward(x, A, gcn_w, gcn_b, w_ih, w_hh, b_ih, b_hh)
    out = jax.block_until_ready(out)

    ref = _reference(x, A, gcn_w, gcn_b, w_ih, w_hh, b_ih, b_hh)
    assert out.shape == (B, H)
    assert jnp.allclose(out, ref, atol=1e-2, rtol=1e-2)

    print("KERNEL_OK")
</pallas_src>

<mosaic_0001>
module attributes {stable_mosaic.version = 11 : i64} {
  func.func @_astgcn_cell_kernel(%arg0: i32, %arg1: memref<1x4x128xf32, #tpu.memory_space<vmem>>, %arg2: memref<128x128xf32, #tpu.memory_space<vmem>>, %arg3: memref<128x8xf32, #tpu.memory_space<vmem>>, %arg4: memref<32x4xf32, #tpu.memory_space<vmem>>, %arg5: memref<32x1xf32, #tpu.memory_space<vmem>>, %arg6: memref<3x32x32xf32, #tpu.memory_space<vmem>>, %arg7: memref<3x32x32xf32, #tpu.memory_space<vmem>>, %arg8: memref<3x32x1xf32, #tpu.memory_space<vmem>>, %arg9: memref<3x32x1xf32, #tpu.memory_space<vmem>>, %arg10: memref<1x32x1xf32, #tpu.memory_space<vmem>>) attributes {dimension_semantics = [#tpu.dimension_semantics<parallel>], iteration_bounds = array<i64: 2>, scalar_prefetch = 0 : i64, scratch_operands = 0 : i64, tpu.core_type = #tpu.core_type<tc>, window_params = [{transform_indices = @transform_0, window_bounds = array<i64: 1, 4, 128>}, {pipeline_mode = #tpu.pipeline_mode<synchronous>, transform_indices = @transform_1, window_bounds = array<i64: 128, 128>}, {pipeline_mode = #tpu.pipeline_mode<synchronous>, transform_indices = @transform_2, window_bounds = array<i64: 128, 8>}, {pipeline_mode = #tpu.pipeline_mode<synchronous>, transform_indices = @transform_3, window_bounds = array<i64: 32, 4>}, {pipeline_mode = #tpu.pipeline_mode<synchronous>, transform_indices = @transform_4, window_bounds = array<i64: 32, 1>}, {pipeline_mode = #tpu.pipeline_mode<synchronous>, transform_indices = @transform_5, window_bounds = array<i64: 3, 32, 32>}, {pipeline_mode = #tpu.pipeline_mode<synchronous>, transform_indices = @transform_6, window_bounds = array<i64: 3, 32, 32>}, {pipeline_mode = #tpu.pipeline_mode<synchronous>, transform_indices = @transform_7, window_bounds = array<i64: 3, 32, 1>}, {pipeline_mode = #tpu.pipeline_mode<synchronous>, transform_indices = @transform_8, window_bounds = array<i64: 3, 32, 1>}, {transform_indices = @transform_9, window_bounds = array<i64: 1, 32, 1>}]} {
    %c0 = arith.constant 0 : index
    %c0_0 = arith.constant 0 : index
    %c0_1 = arith.constant 0 : index
    %0 = vector.load %arg1[%c0, %c0_0, %c0_1] : memref<1x4x128xf32, #tpu.memory_space<vmem>>, vector<1x4x128xf32>
    %1 = vector.shape_cast %0 : vector<1x4x128xf32> to vector<4x128xf32>
    %c0_2 = arith.constant 0 : index
    %c0_3 = arith.constant 0 : index
    %2 = vector.load %arg4[%c0_2, %c0_3] : memref<32x4xf32, #tpu.memory_space<vmem>>, vector<32x4xf32>
    %cst = arith.constant dense<0.000000e+00> : vector<32x128xf32>
    %3 = tpu.matmul %2, %1, %cst {dimension_numbers = #tpu.dot_dimension_numbers<[1], [0], [0], [1], [0, 0, 1, 1], [], []>} : vector<32x4xf32>, vector<4x128xf32>, vector<32x128xf32> -> vector<32x128xf32>
    %c0_4 = arith.constant 0 : index
    %c0_5 = arith.constant 0 : index
    %4 = vector.load %arg2[%c0_4, %c0_5] : memref<128x128xf32, #tpu.memory_space<vmem>>, vector<128x128xf32>
    %cst_6 = arith.constant dense<0.000000e+00> : vector<32x128xf32>
    %5 = tpu.matmul %3, %4, %cst_6 {dimension_numbers = #tpu.dot_dimension_numbers<[1], [0], [0], [1], [0, 0, 1, 1], [], []>} : vector<32x128xf32>, vector<128x128xf32>, vector<32x128xf32> -> vector<32x128xf32>
    %c0_7 = arith.constant 0 : index
    %c0_8 = arith.constant 0 : index
    %6 = vector.load %arg5[%c0_7, %c0_8] : memref<32x1xf32, #tpu.memory_space<vmem>>, vector<32x1xf32>
    %7 = vector.broadcast %6 : vector<32x1xf32> to vector<32x128xf32>
    %8 = arith.addf %5, %7 : vector<32x128xf32>
    %cst_9 = arith.constant 0.000000e+00 : f32
    %9 = vector.broadcast %cst_9 : f32 to vector<32x128xf32>
    %10 = arith.maximumf %8, %9 : vector<32x128xf32>
    %c0_10 = arith.constant 0 : index
    %c0_11 = arith.constant 0 : index
    %11 = vector.load %arg3[%c0_10, %c0_11] : memref<128x8xf32, #tpu.memory_space<vmem>>, vector<128x8xf32>
    %cst_12 = arith.constant dense<0.000000e+00> : vector<32x8xf32>
    %12 = tpu.matmul %10, %11, %cst_12 {dimension_numbers = #tpu.dot_dimension_numbers<[1], [0], [0], [1], [0, 0, 1, 1], [], []>} : vector<32x128xf32>, vector<128x8xf32>, vector<32x8xf32> -> vector<32x8xf32>
    %c0_13 = arith.constant 0 : index
    %c0_14 = arith.constant 0 : index
    %c0_15 = arith.constant 0 : index
    %13 = vector.load %arg6[%c0_13, %c0_14, %c0_15] : memref<3x32x32xf32, #tpu.memory_space<vmem>>, vector<1x32x32xf32>
    %14 = vector.shape_cast %13 : vector<1x32x32xf32> to vector<32x32xf32>
    %c1 = arith.constant 1 : index
    %c0_16 = arith.constant 0 : index
    %c0_17 = arith.constant 0 : index
    %15 = vector.load %arg6[%c1, %c0_16, %c0_17] : memref<3x32x32xf32, #tpu.memory_space<vmem>>, vector<1x32x32xf32>
    %16 = vector.shape_cast %15 : vector<1x32x32xf32> to vector<32x32xf32>
    %c2 = arith.constant 2 : index
    %c0_18 = arith.constant 0 : index
    %c0_19 = arith.constant 0 : index
    %17 = vector.load %arg6[%c2, %c0_18, %c0_19] : memref<3x32x32xf32, #tpu.memory_space<vmem>>, vector<1x32x32xf32>
    %18 = vector.shape_cast %17 : vector<1x32x32xf32> to vector<32x32xf32>
    %c0_20 = arith.constant 0 : index
    %c0_21 = arith.constant 0 : index
    %c0_22 = arith.constant 0 : index
    %19 = vector.load %arg7[%c0_20, %c0_21, %c0_22] : memref<3x32x32xf32, #tpu.memory_space<vmem>>, vector<1x32x32xf32>
    %20 = vector.shape_cast %19 : vector<1x32x32xf32> to vector<32x32xf32>
    %c1_23 = arith.constant 1 : index
    %c0_24 = arith.constant 0 : index
    %c0_25 = arith.constant 0 : index
    %21 = vector.load %arg7[%c1_23, %c0_24, %c0_25] : memref<3x32x32xf32, #tpu.memory_space<vmem>>, vector<1x32x32xf32>
    %22 = vector.shape_cast %21 : vector<1x32x32xf32> to vector<32x32xf32>
    %c2_26 = arith.constant 2 : index
    %c0_27 = arith.constant 0 : index
    %c0_28 = arith.constant 0 : index
    %23 = vector.load %arg7[%c2_26, %c0_27, %c0_28] : memref<3x32x32xf32, #tpu.memory_space<vmem>>, vector<1x32x32xf32>
    %24 = vector.shape_cast %23 : vector<1x32x32xf32> to vector<32x32xf32>
    %c0_29 = arith.constant 0 : index
    %c0_30 = arith.constant 0 : index
    %c0_31 = arith.constant 0 : index
    %25 = vector.load %arg8[%c0_29, %c0_30, %c0_31] : memref<3x32x1xf32, #tpu.memory_space<vmem>>, vector<1x32x1xf32>
    %26 = vector.shape_cast %25 : vector<1x32x1xf32> to vector<32x1xf32>
    %c1_32 = arith.constant 1 : index
    %c0_33 = arith.constant 0 : index
    %c0_34 = arith.constant 0 : index
    %27 = vector.load %arg8[%c1_32, %c0_33, %c0_34] : memref<3x32x1xf32, #tpu.memory_space<vmem>>, vector<1x32x1xf32>
    %28 = vector.shape_cast %27 : vector<1x32x1xf32> to vector<32x1xf32>
    %c2_35 = arith.constant 2 : index
    %c0_36 = arith.constant 0 : index
    %c0_37 = arith.constant 0 : index
    %29 = vector.load %arg8[%c2_35, %c0_36, %c0_37] : memref<3x32x1xf32, #tpu.memory_space<vmem>>, vector<1x32x1xf32>
    %30 = vector.shape_cast %29 : vector<1x32x1xf32> to vector<32x1xf32>
    %c0_38 = arith.constant 0 : index
    %c0_39 = arith.constant 0 : index
    %c0_40 = arith.constant 0 : index
    %31 = vector.load %arg9[%c0_38, %c0_39, %c0_40] : memref<3x32x1xf32, #tpu.memory_space<vmem>>, vector<1x32x1xf32>
    %32 = vector.shape_cast %31 : vector<1x32x1xf32> to vector<32x1xf32>
    %c1_41 = arith.constant 1 : index
    %c0_42 = arith.constant 0 : index
    %c0_43 = arith.constant 0 : index
    %33 = vector.load %arg9[%c1_41, %c0_42, %c0_43] : memref<3x32x1xf32, #tpu.memory_space<vmem>>, vector<1x32x1xf32>
    %34 = vector.shape_cast %33 : vector<1x32x1xf32> to vector<32x1xf32>
    %c2_44 = arith.constant 2 : index
    %c0_45 = arith.constant 0 : index
    %c0_46 = arith.constant 0 : index
    %35 = vector.load %arg9[%c2_44, %c0_45, %c0_46] : memref<3x32x1xf32, #tpu.memory_space<vmem>>, vector<1x32x1xf32>
    %36 = vector.shape_cast %35 : vector<1x32x1xf32> to vector<32x1xf32>
    %cst_47 = arith.constant dense<0.000000e+00> : vector<32x8xf32>
    %37 = tpu.matmul %14, %12, %cst_47 {dimension_numbers = #tpu.dot_dimension_numbers<[1], [0], [0], [1], [0, 0, 1, 1], [], []>} : vector<32x32xf32>, vector<32x8xf32>, vector<32x8xf32> -> vector<32x8xf32>
    %38 = vector.broadcast %26 : vector<32x1xf32> to vector<32x8xf32>
    %39 = arith.addf %37, %38 : vector<32x8xf32>
    %cst_48 = arith.constant dense<0.000000e+00> : vector<32x8xf32>
    %40 = tpu.matmul %16, %12, %cst_48 {dimension_numbers = #tpu.dot_dimension_numbers<[1], [0], [0], [1], [0, 0, 1, 1], [], []>} : vector<32x32xf32>, vector<32x8xf32>, vector<32x8xf32> -> vector<32x8xf32>
    %41 = vector.broadcast %28 : vector<32x1xf32> to vector<32x8xf32>
    %42 = arith.addf %40, %41 : vector<32x8xf32>
    %cst_49 = arith.constant dense<0.000000e+00> : vector<32x8xf32>
    %43 = tpu.matmul %18, %12, %cst_49 {dimension_numbers = #tpu.dot_dimension_numbers<[1], [0], [0], [1], [0, 0, 1, 1], [], []>} : vector<32x32xf32>, vector<32x8xf32>, vector<32x8xf32> -> vector<32x8xf32>
    %44 = vector.broadcast %30 : vector<32x1xf32> to vector<32x8xf32>
    %45 = arith.addf %43, %44 : vector<32x8xf32>
    %cst_50 = arith.constant 0.000000e+00 : f32
    %46 = vector.broadcast %cst_50 : f32 to vector<32x1xf32>
    %cst_51 = arith.constant dense<0.000000e+00> : vector<32x1xf32>
    %47 = tpu.matmul %20, %46, %cst_51 {dimension_numbers = #tpu.dot_dimension_numbers<[1], [0], [0], [1], [0, 0, 1, 1], [], []>} : vector<32x32xf32>, vector<32x1xf32>, vector<32x1xf32> -> vector<32x1xf32>
    %48 = arith.addf %47, %32 : vector<32x1xf32>
    %cst_52 = arith.constant dense<0.000000e+00> : vector<32x1xf32>
    %49 = tpu.matmul %22, %46, %cst_52 {dimension_numbers = #tpu.dot_dimension_numbers<[1], [0], [0], [1], [0, 0, 1, 1], [], []>} : vector<32x32xf32>, vector<32x1xf32>, vector<32x1xf32> -> vector<32x1xf32>
    %50 = arith.addf %49, %34 : vector<32x1xf32>
    %cst_53 = arith.constant dense<0.000000e+00> : vector<32x1xf32>
    %51 = tpu.matmul %24, %46, %cst_53 {dimension_numbers = #tpu.dot_dimension_numbers<[1], [0], [0], [1], [0, 0, 1, 1], [], []>} : vector<32x32xf32>, vector<32x1xf32>, vector<32x1xf32> -> vector<32x1xf32>
    %52 = arith.addf %51, %36 : vector<32x1xf32>
    %53 = vector.extract_strided_slice %39 {offsets = [0, 0], sizes = [32, 1], strides = [1, 1]} : vector<32x8xf32> to vector<32x1xf32>
    %54 = arith.addf %53, %48 : vector<32x1xf32>
    %55 = arith.negf %54 : vector<32x1xf32>
    %56 = math.exp %55 : vector<32x1xf32>
    %cst_54 = arith.constant 1.000000e+00 : f32
    %57 = vector.broadcast %cst_54 : f32 to vector<32x1xf32>
    %58 = arith.addf %57, %56 : vector<32x1xf32>
    %59 = arith.divf %57, %58 : vector<32x1xf32>
    %60 = vector.extract_strided_slice %42 {offsets = [0, 0], sizes = [32, 1], strides = [1, 1]} : vector<32x8xf32> to vector<32x1xf32>
    %61 = arith.addf %60, %50 : vector<32x1xf32>
    %62 = arith.negf %61 : vector<32x1xf32>
    %63 = math.exp %62 : vector<32x1xf32>
    %cst_55 = arith.constant 1.000000e+00 : f32
    %64 = vector.broadcast %cst_55 : f32 to vector<32x1xf32>
    %65 = arith.addf %64, %63 : vector<32x1xf32>
    %66 = arith.divf %64, %65 : vector<32x1xf32>
    %67 = vector.extract_strided_slice %45 {offsets = [0, 0], sizes = [32, 1], strides = [1, 1]} : vector<32x8xf32> to vector<32x1xf32>
    %68 = arith.mulf %59, %52 : vector<32x1xf32>
    %69 = arith.addf %67, %68 : vector<32x1xf32>
    %70 = math.tanh %69 : vector<32x1xf32>
    %cst_56 = arith.constant 1.000000e+00 : f32
    %71 = vector.broadcast %cst_56 : f32 to vector<32x1xf32>
    %72 = arith.subf %71, %66 : vector<32x1xf32>
    %73 = arith.mulf %72, %70 : vector<32x1xf32>
    %74 = arith.mulf %66, %46 : vector<32x1xf32>
    %75 = arith.addf %73, %74 : vector<32x1xf32>
    %cst_57 = arith.constant dense<0.000000e+00> : vector<32x1xf32>
    %76 = tpu.matmul %20, %75, %cst_57 {dimension_numbers = #tpu.dot_dimension_numbers<[1], [0], [0], [1], [0, 0, 1, 1], [], []>} : vector<32x32xf32>, vector<32x1xf32>, vector<32x1xf32> -> vector<32x1xf32>
    %77 = arith.addf %76, %32 : vector<32x1xf32>
    %cst_58 = arith.constant dense<0.000000e+00> : vector<32x1xf32>
    %78 = tpu.matmul %22, %75, %cst_58 {dimension_numbers = #tpu.dot_dimension_numbers<[1], [0], [0], [1], [0, 0, 1, 1], [], []>} : vector<32x32xf32>, vector<32x1xf32>, vector<32x1xf32> -> vector<32x1xf32>
    %79 = arith.addf %78, %34 : vector<32x1xf32>
    %cst_59 = arith.constant dense<0.000000e+00> : vector<32x1xf32>
    %80 = tpu.matmul %24, %75, %cst_59 {dimension_numbers = #tpu.dot_dimension_numbers<[1], [0], [0], [1], [0, 0, 1, 1], [], []>} : vector<32x32xf32>, vector<32x1xf32>, vector<32x1xf32> -> vector<32x1xf32>
    %81 = arith.addf %80, %36 : vector<32x1xf32>
    %82 = vector.extract_strided_slice %39 {offsets = [0, 1], sizes = [32, 1], strides = [1, 1]} : vector<32x8xf32> to vector<32x1xf32>
    %83 = arith.addf %82, %77 : vector<32x1xf32>
    %84 = arith.negf %83 : vector<32x1xf32>
    %85 = math.exp %84 : vector<32x1xf32>
    %cst_60 = arith.constant 1.000000e+00 : f32
    %86 = vector.broadcast %cst_60 : f32 to vector<32x1xf32>
    %87 = arith.addf %86, %85 : vector<32x1xf32>
    %88 = arith.divf %86, %87 : vector<32x1xf32>
    %89 = vector.extract_strided_slice %42 {offsets = [0, 1], sizes = [32, 1], strides = [1, 1]} : vector<32x8xf32> to vector<32x1xf32>
    %90 = arith.addf %89, %79 : vector<32x1xf32>
    %91 = arith.negf %90 : vector<32x1xf32>
    %92 = math.exp %91 : vector<32x1xf32>
    %cst_61 = arith.constant 1.000000e+00 : f32
    %93 = vector.broadcast %cst_61 : f32 to vector<32x1xf32>
    %94 = arith.addf %93, %92 : vector<32x1xf32>
    %95 = arith.divf %93, %94 : vector<32x1xf32>
    %96 = vector.extract_strided_slice %45 {offsets = [0, 1], sizes = [32, 1], strides = [1, 1]} : vector<32x8xf32> to vector<32x1xf32>
    %97 = arith.mulf %88, %81 : vector<32x1xf32>
    %98 = arith.addf %96, %97 : vector<32x1xf32>
    %99 = math.tanh %98 : vector<32x1xf32>
    %cst_62 = arith.constant 1.000000e+00 : f32
    %100 = vector.broadcast %cst_62 : f32 to vector<32x1xf32>
    %101 = arith.subf %100, %95 : vector<32x1xf32>
    %102 = arith.mulf %101, %99 : vector<32x1xf32>
    %103 = arith.mulf %95, %75 : vector<32x1xf32>
    %104 = arith.addf %102, %103 : vector<32x1xf32>
    %cst_63 = arith.constant dense<0.000000e+00> : vector<32x1xf32>
    %105 = tpu.matmul %20, %104, %cst_63 {dimension_numbers = #tpu.dot_dimension_numbers<[1], [0], [0], [1], [0, 0, 1, 1], [], []>} : vector<32x32xf32>, vector<32x1xf32>, vector<32x1xf32> -> vector<32x1xf32>
    %106 = arith.addf %105, %32 : vector<32x1xf32>
    %cst_64 = arith.constant dense<0.000000e+00> : vector<32x1xf32>
    %107 = tpu.matmul %22, %104, %cst_64 {dimension_numbers = #tpu.dot_dimension_numbers<[1], [0], [0], [1], [0, 0, 1, 1], [], []>} : vector<32x32xf32>, vector<32x1xf32>, vector<32x1xf32> -> vector<32x1xf32>
    %108 = arith.addf %107, %34 : vector<32x1xf32>
    %cst_65 = arith.constant dense<0.000000e+00> : vector<32x1xf32>
    %109 = tpu.matmul %24, %104, %cst_65 {dimension_numbers = #tpu.dot_dimension_numbers<[1], [0], [0], [1], [0, 0, 1, 1], [], []>} : vector<32x32xf32>, vector<32x1xf32>, vector<32x1xf32> -> vector<32x1xf32>
    %110 = arith.addf %109, %36 : vector<32x1xf32>
    %111 = vector.extract_strided_slice %39 {offsets = [0, 2], sizes = [32, 1], strides = [1, 1]} : vector<32x8xf32> to vector<32x1xf32>
    %112 = arith.addf %111, %106 : vector<32x1xf32>
    %113 = arith.negf %112 : vector<32x1xf32>
    %114 = math.exp %113 : vector<32x1xf32>
    %cst_66 = arith.constant 1.000000e+00 : f32
    %115 = vector.broadcast %cst_66 : f32 to vector<32x1xf32>
    %116 = arith.addf %115, %114 : vector<32x1xf32>
    %117 = arith.divf %115, %116 : vector<32x1xf32>
    %118 = vector.extract_strided_slice %42 {offsets = [0, 2], sizes = [32, 1], strides = [1, 1]} : vector<32x8xf32> to vector<32x1xf32>
    %119 = arith.addf %118, %108 : vector<32x1xf32>
    %120 = arith.negf %119 : vector<32x1xf32>
    %121 = math.exp %120 : vector<32x1xf32>
    %cst_67 = arith.constant 1.000000e+00 : f32
    %122 = vector.broadcast %cst_67 : f32 to vector<32x1xf32>
    %123 = arith.addf %122, %121 : vector<32x1xf32>
    %124 = arith.divf %122, %123 : vector<32x1xf32>
    %125 = vector.extract_strided_slice %45 {offsets = [0, 2], sizes = [32, 1], strides = [1, 1]} : vector<32x8xf32> to vector<32x1xf32>
    %126 = arith.mulf %117, %110 : vector<32x1xf32>
    %127 = arith.addf %125, %126 : vector<32x1xf32>
    %128 = math.tanh %127 : vector<32x1xf32>
    %cst_68 = arith.constant 1.000000e+00 : f32
    %129 = vector.broadcast %cst_68 : f32 to vector<32x1xf32>
    %130 = arith.subf %129, %124 : vector<32x1xf32>
    %131 = arith.mulf %130, %128 : vector<32x1xf32>
    %132 = arith.mulf %124, %104 : vector<32x1xf32>
    %133 = arith.addf %131, %132 : vector<32x1xf32>
    %cst_69 = arith.constant dense<0.000000e+00> : vector<32x1xf32>
    %134 = tpu.matmul %20, %133, %cst_69 {dimension_numbers = #tpu.dot_dimension_numbers<[1], [0], [0], [1], [0, 0, 1, 1], [], []>} : vector<32x32xf32>, vector<32x1xf32>, vector<32x1xf32> -> vector<32x1xf32>
    %135 = arith.addf %134, %32 : vector<32x1xf32>
    %cst_70 = arith.constant dense<0.000000e+00> : vector<32x1xf32>
    %136 = tpu.matmul %22, %133, %cst_70 {dimension_numbers = #tpu.dot_dimension_numbers<[1], [0], [0], [1], [0, 0, 1, 1], [], []>} : vector<32x32xf32>, vector<32x1xf32>, vector<32x1xf32> -> vector<32x1xf32>
    %137 = arith.addf %136, %34 : vector<32x1xf32>
    %cst_71 = arith.constant dense<0.000000e+00> : vector<32x1xf32>
    %138 = tpu.matmul %24, %133, %cst_71 {dimension_numbers = #tpu.dot_dimension_numbers<[1], [0], [0], [1], [0, 0, 1, 1], [], []>} : vector<32x32xf32>, vector<32x1xf32>, vector<32x1xf32> -> vector<32x1xf32>
    %139 = arith.addf %138, %36 : vector<32x1xf32>
    %140 = vector.extract_strided_slice %39 {offsets = [0, 3], sizes = [32, 1], strides = [1, 1]} : vector<32x8xf32> to vector<32x1xf32>
    %141 = arith.addf %140, %135 : vector<32x1xf32>
    %142 = arith.negf %141 : vector<32x1xf32>
    %143 = math.exp %142 : vector<32x1xf32>
    %cst_72 = arith.constant 1.000000e+00 : f32
    %144 = vector.broadcast %cst_72 : f32 to vector<32x1xf32>
    %145 = arith.addf %144, %143 : vector<32x1xf32>
    %146 = arith.divf %144, %145 : vector<32x1xf32>
    %147 = vector.extract_strided_slice %42 {offsets = [0, 3], sizes = [32, 1], strides = [1, 1]} : vector<32x8xf32> to vector<32x1xf32>
    %148 = arith.addf %147, %137 : vector<32x1xf32>
    %149 = arith.negf %148 : vector<32x1xf32>
    %150 = math.exp %149 : vector<32x1xf32>
    %cst_73 = arith.constant 1.000000e+00 : f32
    %151 = vector.broadcast %cst_73 : f32 to vector<32x1xf32>
    %152 = arith.addf %151, %150 : vector<32x1xf32>
    %153 = arith.divf %151, %152 : vector<32x1xf32>
    %154 = vector.extract_strided_slice %45 {offsets = [0, 3], sizes = [32, 1], strides = [1, 1]} : vector<32x8xf32> to vector<32x1xf32>
    %155 = arith.mulf %146, %139 : vector<32x1xf32>
    %156 = arith.addf %154, %155 : vector<32x1xf32>
    %157 = math.tanh %156 : vector<32x1xf32>
    %cst_74 = arith.constant 1.000000e+00 : f32
    %158 = vector.broadcast %cst_74 : f32 to vector<32x1xf32>
    %159 = arith.subf %158, %153 : vector<32x1xf32>
    %160 = arith.mulf %159, %157 : vector<32x1xf32>
    %161 = arith.mulf %153, %133 : vector<32x1xf32>
    %162 = arith.addf %160, %161 : vector<32x1xf32>
    %cst_75 = arith.constant dense<0.000000e+00> : vector<32x1xf32>
    %163 = tpu.matmul %20, %162, %cst_75 {dimension_numbers = #tpu.dot_dimension_numbers<[1], [0], [0], [1], [0, 0, 1, 1], [], []>} : vector<32x32xf32>, vector<32x1xf32>, vector<32x1xf32> -> vector<32x1xf32>
    %164 = arith.addf %163, %32 : vector<32x1xf32>
    %cst_76 = arith.constant dense<0.000000e+00> : vector<32x1xf32>
    %165 = tpu.matmul %22, %162, %cst_76 {dimension_numbers = #tpu.dot_dimension_numbers<[1], [0], [0], [1], [0, 0, 1, 1], [], []>} : vector<32x32xf32>, vector<32x1xf32>, vector<32x1xf32> -> vector<32x1xf32>
    %166 = arith.addf %165, %34 : vector<32x1xf32>
    %cst_77 = arith.constant dense<0.000000e+00> : vector<32x1xf32>
    %167 = tpu.matmul %24, %162, %cst_77 {dimension_numbers = #tpu.dot_dimension_numbers<[1], [0], [0], [1], [0, 0, 1, 1], [], []>} : vector<32x32xf32>, vector<32x1xf32>, vector<32x1xf32> -> vector<32x1xf32>
    %168 = arith.addf %167, %36 : vector<32x1xf32>
    %169 = vector.extract_strided_slice %39 {offsets = [0, 4], sizes = [32, 1], strides = [1, 1]} : vector<32x8xf32> to vector<32x1xf32>
    %170 = arith.addf %169, %164 : vector<32x1xf32>
    %171 = arith.negf %170 : vector<32x1xf32>
    %172 = math.exp %171 : vector<32x1xf32>
    %cst_78 = arith.constant 1.000000e+00 : f32
    %173 = vector.broadcast %cst_78 : f32 to vector<32x1xf32>
    %174 = arith.addf %173, %172 : vector<32x1xf32>
    %175 = arith.divf %173, %174 : vector<32x1xf32>
    %176 = vector.extract_strided_slice %42 {offsets = [0, 4], sizes = [32, 1], strides = [1, 1]} : vector<32x8xf32> to vector<32x1xf32>
    %177 = arith.addf %176, %166 : vector<32x1xf32>
    %178 = arith.negf %177 : vector<32x1xf32>
    %179 = math.exp %178 : vector<32x1xf32>
    %cst_79 = arith.constant 1.000000e+00 : f32
    %180 = vector.broadcast %cst_79 : f32 to vector<32x1xf32>
    %181 = arith.addf %180, %179 : vector<32x1xf32>
    %182 = arith.divf %180, %181 : vector<32x1xf32>
    %183 = vector.extract_strided_slice %45 {offsets = [0, 4], sizes = [32, 1], strides = [1, 1]} : vector<32x8xf32> to vector<32x1xf32>
    %184 = arith.mulf %175, %168 : vector<32x1xf32>
    %185 = arith.addf %183, %184 : vector<32x1xf32>
    %186 = math.tanh %185 : vector<32x1xf32>
    %cst_80 = arith.constant 1.000000e+00 : f32
    %187 = vector.broadcast %cst_80 : f32 to vector<32x1xf32>
    %188 = arith.subf %187, %182 : vector<32x1xf32>
    %189 = arith.mulf %188, %186 : vector<32x1xf32>
    %190 = arith.mulf %182, %162 : vector<32x1xf32>
    %191 = arith.addf %189, %190 : vector<32x1xf32>
    %cst_81 = arith.constant dense<0.000000e+00> : vector<32x1xf32>
    %192 = tpu.matmul %20, %191, %cst_81 {dimension_numbers = #tpu.dot_dimension_numbers<[1], [0], [0], [1], [0, 0, 1, 1], [], []>} : vector<32x32xf32>, vector<32x1xf32>, vector<32x1xf32> -> vector<32x1xf32>
    %193 = arith.addf %192, %32 : vector<32x1xf32>
    %cst_82 = arith.constant dense<0.000000e+00> : vector<32x1xf32>
    %194 = tpu.matmul %22, %191, %cst_82 {dimension_numbers = #tpu.dot_dimension_numbers<[1], [0], [0], [1], [0, 0, 1, 1], [], []>} : vector<32x32xf32>, vector<32x1xf32>, vector<32x1xf32> -> vector<32x1xf32>
    %195 = arith.addf %194, %34 : vector<32x1xf32>
    %cst_83 = arith.constant dense<0.000000e+00> : vector<32x1xf32>
    %196 = tpu.matmul %24, %191, %cst_83 {dimension_numbers = #tpu.dot_dimension_numbers<[1], [0], [0], [1], [0, 0, 1, 1], [], []>} : vector<32x32xf32>, vector<32x1xf32>, vector<32x1xf32> -> vector<32x1xf32>
    %197 = arith.addf %196, %36 : vector<32x1xf32>
    %198 = vector.extract_strided_slice %39 {offsets = [0, 5], sizes = [32, 1], strides = [1, 1]} : vector<32x8xf32> to vector<32x1xf32>
    %199 = arith.addf %198, %193 : vector<32x1xf32>
    %200 = arith.negf %199 : vector<32x1xf32>
    %201 = math.exp %200 : vector<32x1xf32>
    %cst_84 = arith.constant 1.000000e+00 : f32
    %202 = vector.broadcast %cst_84 : f32 to vector<32x1xf32>
    %203 = arith.addf %202, %201 : vector<32x1xf32>
    %204 = arith.divf %202, %203 : vector<32x1xf32>
    %205 = vector.extract_strided_slice %42 {offsets = [0, 5], sizes = [32, 1], strides = [1, 1]} : vector<32x8xf32> to vector<32x1xf32>
    %206 = arith.addf %205, %195 : vector<32x1xf32>
    %207 = arith.negf %206 : vector<32x1xf32>
    %208 = math.exp %207 : vector<32x1xf32>
    %cst_85 = arith.constant 1.000000e+00 : f32
    %209 = vector.broadcast %cst_85 : f32 to vector<32x1xf32>
    %210 = arith.addf %209, %208 : vector<32x1xf32>
    %211 = arith.divf %209, %210 : vector<32x1xf32>
    %212 = vector.extract_strided_slice %45 {offsets = [0, 5], sizes = [32, 1], strides = [1, 1]} : vector<32x8xf32> to vector<32x1xf32>
    %213 = arith.mulf %204, %197 : vector<32x1xf32>
    %214 = arith.addf %212, %213 : vector<32x1xf32>
    %215 = math.tanh %214 : vector<32x1xf32>
    %cst_86 = arith.constant 1.000000e+00 : f32
    %216 = vector.broadcast %cst_86 : f32 to vector<32x1xf32>
    %217 = arith.subf %216, %211 : vector<32x1xf32>
    %218 = arith.mulf %217, %215 : vector<32x1xf32>
    %219 = arith.mulf %211, %191 : vector<32x1xf32>
    %220 = arith.addf %218, %219 : vector<32x1xf32>
    %cst_87 = arith.constant dense<0.000000e+00> : vector<32x1xf32>
    %221 = tpu.matmul %20, %220, %cst_87 {dimension_numbers = #tpu.dot_dimension_numbers<[1], [0], [0], [1], [0, 0, 1, 1], [], []>} : vector<32x32xf32>, vector<32x1xf32>, vector<32x1xf32> -> vector<32x1xf32>
    %222 = arith.addf %221, %32 : vector<32x1xf32>
    %cst_88 = arith.constant dense<0.000000e+00> : vector<32x1xf32>
    %223 = tpu.matmul %22, %220, %cst_88 {dimension_numbers = #tpu.dot_dimension_numbers<[1], [0], [0], [1], [0, 0, 1, 1], [], []>} : vector<32x32xf32>, vector<32x1xf32>, vector<32x1xf32> -> vector<32x1xf32>
    %224 = arith.addf %223, %34 : vector<32x1xf32>
    %cst_89 = arith.constant dense<0.000000e+00> : vector<32x1xf32>
    %225 = tpu.matmul %24, %220, %cst_89 {dimension_numbers = #tpu.dot_dimension_numbers<[1], [0], [0], [1], [0, 0, 1, 1], [], []>} : vector<32x32xf32>, vector<32x1xf32>, vector<32x1xf32> -> vector<32x1xf32>
    %226 = arith.addf %225, %36 : vector<32x1xf32>
    %227 = vector.extract_strided_slice %39 {offsets = [0, 6], sizes = [32, 1], strides = [1, 1]} : vector<32x8xf32> to vector<32x1xf32>
    %228 = arith.addf %227, %222 : vector<32x1xf32>
    %229 = arith.negf %228 : vector<32x1xf32>
    %230 = math.exp %229 : vector<32x1xf32>
    %cst_90 = arith.constant 1.000000e+00 : f32
    %231 = vector.broadcast %cst_90 : f32 to vector<32x1xf32>
    %232 = arith.addf %231, %230 : vector<32x1xf32>
    %233 = arith.divf %231, %232 : vector<32x1xf32>
    %234 = vector.extract_strided_slice %42 {offsets = [0, 6], sizes = [32, 1], strides = [1, 1]} : vector<32x8xf32> to vector<32x1xf32>
    %235 = arith.addf %234, %224 : vector<32x1xf32>
    %236 = arith.negf %235 : vector<32x1xf32>
    %237 = math.exp %236 : vector<32x1xf32>
    %cst_91 = arith.constant 1.000000e+00 : f32
    %238 = vector.broadcast %cst_91 : f32 to vector<32x1xf32>
    %239 = arith.addf %238, %237 : vector<32x1xf32>
    %240 = arith.divf %238, %239 : vector<32x1xf32>
    %241 = vector.extract_strided_slice %45 {offsets = [0, 6], sizes = [32, 1], strides = [1, 1]} : vector<32x8xf32> to vector<32x1xf32>
    %242 = arith.mulf %233, %226 : vector<32x1xf32>
    %243 = arith.addf %241, %242 : vector<32x1xf32>
    %244 = math.tanh %243 : vector<32x1xf32>
    %cst_92 = arith.constant 1.000000e+00 : f32
    %245 = vector.broadcast %cst_92 : f32 to vector<32x1xf32>
    %246 = arith.subf %245, %240 : vector<32x1xf32>
    %247 = arith.mulf %246, %244 : vector<32x1xf32>
    %248 = arith.mulf %240, %220 : vector<32x1xf32>
    %249 = arith.addf %247, %248 : vector<32x1xf32>
    %cst_93 = arith.constant dense<0.000000e+00> : vector<32x1xf32>
    %250 = tpu.matmul %20, %249, %cst_93 {dimension_numbers = #tpu.dot_dimension_numbers<[1], [0], [0], [1], [0, 0, 1, 1], [], []>} : vector<32x32xf32>, vector<32x1xf32>, vector<32x1xf32> -> vector<32x1xf32>
    %251 = arith.addf %250, %32 : vector<32x1xf32>
    %cst_94 = arith.constant dense<0.000000e+00> : vector<32x1xf32>
    %252 = tpu.matmul %22, %249, %cst_94 {dimension_numbers = #tpu.dot_dimension_numbers<[1], [0], [0], [1], [0, 0, 1, 1], [], []>} : vector<32x32xf32>, vector<32x1xf32>, vector<32x1xf32> -> vector<32x1xf32>
    %253 = arith.addf %252, %34 : vector<32x1xf32>
    %cst_95 = arith.constant dense<0.000000e+00> : vector<32x1xf32>
    %254 = tpu.matmul %24, %249, %cst_95 {dimension_numbers = #tpu.dot_dimension_numbers<[1], [0], [0], [1], [0, 0, 1, 1], [], []>} : vector<32x32xf32>, vector<32x1xf32>, vector<32x1xf32> -> vector<32x1xf32>
    %255 = arith.addf %254, %36 : vector<32x1xf32>
    %256 = vector.extract_strided_slice %39 {offsets = [0, 7], sizes = [32, 1], strides = [1, 1]} : vector<32x8xf32> to vector<32x1xf32>
    %257 = arith.addf %256, %251 : vector<32x1xf32>
    %258 = arith.negf %257 : vector<32x1xf32>
    %259 = math.exp %258 : vector<32x1xf32>
    %cst_96 = arith.constant 1.000000e+00 : f32
    %260 = vector.broadcast %cst_96 : f32 to vector<32x1xf32>
    %261 = arith.addf %260, %259 : vector<32x1xf32>
    %262 = arith.divf %260, %261 : vector<32x1xf32>
    %263 = vector.extract_strided_slice %42 {offsets = [0, 7], sizes = [32, 1], strides = [1, 1]} : vector<32x8xf32> to vector<32x1xf32>
    %264 = arith.addf %263, %253 : vector<32x1xf32>
    %265 = arith.negf %264 : vector<32x1xf32>
    %266 = math.exp %265 : vector<32x1xf32>
    %cst_97 = arith.constant 1.000000e+00 : f32
    %267 = vector.broadcast %cst_97 : f32 to vector<32x1xf32>
    %268 = arith.addf %267, %266 : vector<32x1xf32>
    %269 = arith.divf %267, %268 : vector<32x1xf32>
    %270 = vector.extract_strided_slice %45 {offsets = [0, 7], sizes = [32, 1], strides = [1, 1]} : vector<32x8xf32> to vector<32x1xf32>
    %271 = arith.mulf %262, %255 : vector<32x1xf32>
    %272 = arith.addf %270, %271 : vector<32x1xf32>
    %273 = math.tanh %272 : vector<32x1xf32>
    %cst_98 = arith.constant 1.000000e+00 : f32
    %274 = vector.broadcast %cst_98 : f32 to vector<32x1xf32>
    %275 = arith.subf %274, %269 : vector<32x1xf32>
    %276 = arith.mulf %275, %273 : vector<32x1xf32>
    %277 = arith.mulf %269, %249 : vector<32x1xf32>
    %278 = arith.addf %276, %277 : vector<32x1xf32>
    %c0_99 = arith.constant 0 : index
    %c0_100 = arith.constant 0 : index
    %c0_101 = arith.constant 0 : index
    %279 = vector.load %arg10[%c0_99, %c0_100, %c0_101] : memref<1x32x1xf32, #tpu.memory_space<vmem>>, vector<1x32x1xf32>
    %280 = vector.shape_cast %279 : vector<1x32x1xf32> to vector<32x1xf32>
    %281 = vector.shape_cast %278 : vector<32x1xf32> to vector<1x32x1xf32>
    tpu.vector_store %arg10[%c0_99, %c0_100, %c0_101], %281 {strides = array<i32>} : memref<1x32x1xf32, #tpu.memory_space<vmem>>, vector<1x32x1xf32>,
    return
  }
  func.func @transform_0(%arg0: i32) -> (i32, i32, i32) {
    %c0_i32 = arith.constant 0 : i32
    %c0_i32_0 = arith.constant 0 : i32
    %c0_i32_1 = arith.constant 0 : i32
    return %arg0, %c0_i32, %c0_i32_0 : i32, i32, i32
  }
  func.func @transform_1(%arg0: i32) -> (i32, i32) {
    %c0_i32 = arith.constant 0 : i32
    %c0_i32_0 = arith.constant 0 : i32
    %c0_i32_1 = arith.constant 0 : i32
    return %c0_i32, %c0_i32_0 : i32, i32
  }
  func.func @transform_2(%arg0: i32) -> (i32, i32) {
    %c0_i32 = arith.constant 0 : i32
    %c0_i32_0 = arith.constant 0 : i32
    %c0_i32_1 = arith.constant 0 : i32
    return %c0_i32, %c0_i32_0 : i32, i32
  }
  func.func @transform_3(%arg0: i32) -> (i32, i32) {
    %c0_i32 = arith.constant 0 : i32
    %c0_i32_0 = arith.constant 0 : i32
    %c0_i32_1 = arith.constant 0 : i32
    return %c0_i32, %c0_i32_0 : i32, i32
  }
  func.func @transform_4(%arg0: i32) -> (i32, i32) {
    %c0_i32 = arith.constant 0 : i32
    %c0_i32_0 = arith.constant 0 : i32
    %c0_i32_1 = arith.constant 0 : i32
    return %c0_i32, %c0_i32_0 : i32, i32
  }
  func.func @transform_5(%arg0: i32) -> (i32, i32, i32) {
    %c0_i32 = arith.constant 0 : i32
    %c0_i32_0 = arith.constant 0 : i32
    %c0_i32_1 = arith.constant 0 : i32
    %c0_i32_2 = arith.constant 0 : i32
    return %c0_i32, %c0_i32_0, %c0_i32_1 : i32, i32, i32
  }
  func.func @transform_6(%arg0: i32) -> (i32, i32, i32) {
    %c0_i32 = arith.constant 0 : i32
    %c0_i32_0 = arith.constant 0 : i32
    %c0_i32_1 = arith.constant 0 : i32
    %c0_i32_2 = arith.constant 0 : i32
    return %c0_i32, %c0_i32_0, %c0_i32_1 : i32, i32, i32
  }
  func.func @transform_7(%arg0: i32) -> (i32, i32, i32) {
    %c0_i32 = arith.constant 0 : i32
    %c0_i32_0 = arith.constant 0 : i32
    %c0_i32_1 = arith.constant 0 : i32
    %c0_i32_2 = arith.constant 0 : i32
    return %c0_i32, %c0_i32_0, %c0_i32_1 : i32, i32, i32
  }
  func.func @transform_8(%arg0: i32) -> (i32, i32, i32) {
    %c0_i32 = arith.constant 0 : i32
    %c0_i32_0 = arith.constant 0 : i32
    %c0_i32_1 = arith.constant 0 : i32
    %c0_i32_2 = arith.constant 0 : i32
    return %c0_i32, %c0_i32_0, %c0_i32_1 : i32, i32, i32
  }
  func.func @transform_9(%arg0: i32) -> (i32, i32, i32) {
    %c0_i32 = arith.constant 0 : i32
    %c0_i32_0 = arith.constant 0 : i32
    %c0_i32_1 = arith.constant 0 : i32
    return %arg0, %c0_i32, %c0_i32_0 : i32, i32, i32
  }
}

</mosaic_0001>

<bundles_post_ra>
// kernel: tpu_custom_call.1
= control target key start
LH: loop header
LB: loop body
LE: loop exit
PB: predicated region body
PF: predicated region fallthrough
CT: control target
= control target key end

     0   :  { %s5811_s30 = smov 0   ;;  %s7016_s0 = inlined_call_operand.vmem [shape: f32[2,4,128], index: 0, kind: input, shape index: {}]   ;;  %s7017_s1 = inlined_call_operand.vmem [shape: f32[128,128], index: 1, kind: input, shape index: {}]   ;;  %s7018_s2 = inlined_call_operand.vmem [shape: f32[128,8], index: 2, kind: input, shape index: {}]   ;;  %s7019_s3 = inlined_call_operand.vmem [shape: f32[32,4], index: 3, kind: input, shape index: {}]   ;;  %s7020_s4 = inlined_call_operand.vmem [shape: f32[32,1], index: 4, kind: input, shape index: {}]   ;;  %s7021_s5 = inlined_call_operand.vmem [shape: f32[3,32,32], index: 5, kind: input, shape index: {}]   ;;  %s7022_s6 = inlined_call_operand.vmem [shape: f32[3,32,32], index: 6, kind: input, shape index: {}]   ;;  %s7023_s7 = inlined_call_operand.vmem [shape: f32[3,32,1], index: 7, kind: input, shape index: {}]   ;;  %s7024_s8 = inlined_call_operand.vmem [shape: f32[3,32,1], index: 8, kind: input, shape index: {}]   ;;  %s7025_s9 = inlined_call_operand.vmem [shape: f32[2,32,1], index: 9, kind: output, shape index: {}]  }
   0x1 LB: > { %s4419_s10 = sadd.s32 4294967295, %s5743_s30   ;;  %p4423_p0 = scmp.ge.s32.totalorder %s5743_s30, 1  ;;  %s5743_s30 = sphi %s5811_s30, %s19_s30  }
   0x2   : > { %p286_p1 = scmp.lt.s32.totalorder %s5743_s30, 3 }
   0x4   : > { %p287_p2 = pnand %p4423_p0, %p286_p1 }
   0x5   : > { %p321_p3 = scmp.lt.s32.totalorder (!%p287_p2), %s4419_s10, 1  ;;  %s5747_s20 = smov (!%p287_p2), 1  }
   0x6   : > { %290 = sbr.rel (%p287_p2) target bundleno = 4343 (0x10f7), region = 56  ;;  %s5748_s21 = smov (!%p287_p2), 127  }
   0x7   : > { %s5750_s23 = smov (!%p287_p2), 126   ;;  %s5751_s15 = smov (!%p287_p2), 3  }
   0x8   : > { %s5752_s14 = smov (!%p287_p2), 125  }
   0xb   : > { %v331_v0 = vld [vmem:[%s7019_s3] sm:$0xff]  ;;  %vm335_vm0 = vcmask 31744   ;;  %v452_v1 = vld [vmem:[%s7017_s1 + $0x78] sm:$0xff]  ;;  %v451_v2 = vld [vmem:[%s7017_s1 + $0x70] sm:$0xff]  ;;  %s7027_s10 = smov (!%p321_p3, %s4419_s10), 1  ;;  %vm348_vm1 = vcmask 1043456  }
   0xc   : > { %4893 = vmatprep.mubr.msk.f32.mxu0 %vm335_vm0, %v331_v0  ;;  %4899 = vmatprep.subr.mxu1 %v452_v1  ;;  %v450_v3 = vld [vmem:[%s7017_s1 + $0x68] sm:$0xff]  ;;  %s4424_s19 = sshll.u32 %s7027_s10, 2  ;;  %v449_v4 = vld [vmem:[%s7017_s1 + $0x60] sm:$0xff]  ;;  %v333_v7 = vld [vmem:[%s7019_s3 + $0x10] sm:$0xff]  ;;  %v5745_v23 = vmov 0   ;;  %vm743_vm2 = vcmask 261120  }
   0xd   : > { %4900 = vmatpush3.msra.mxu1 %v452_v1  ;;  %s324_s22 = scalar_lea.vmem %s7016_s0, %s4424_s19  ;;  %v332_v6 = vld [vmem:[%s7019_s3 + $0x8] sm:$0xff]  ;;  %v448_v8 = vld [vmem:[%s7017_s1 + $0x58] sm:$0xff]  ;;  %v447_v9 = vld [vmem:[%s7017_s1 + $0x50] sm:$0xff]  ;;  %5367 = vset.pattern.permute.xlu0 %v5745_v23  ;;  %vm4359_vm3 = vcmask 7168  }
   0xe   : > { %4901 = vmatprep.subr.mxu1 %v451_v2  ;;  %v330_v5 = vld [vmem:[%s324_s22] sm:$0xf]  ;;  %v334_v10 = vld [vmem:[%s7019_s3 + $0x18] sm:$0xff]  ;;  %v446_v11 = vld [vmem:[%s7017_s1 + $0x48] sm:$0xff]  ;;  %5368 = vset.pattern.permute.xlu1 %v5745_v23  ;;  %s5749_s22 = smov 2  }
   0xf   : > { %4902 = vmatpush3.msra.mxu1 %v451_v2  ;;  %4891 = vmatprep.subr.msk.mxu0 %vm348_vm1, %v330_v5  ;;  %v445_v12 = vld [vmem:[%s7017_s1 + $0x40] sm:$0xff]  ;;  %v444_v13 = vld [vmem:[%s7017_s1 + $0x38] sm:$0xff]  ;;  %v443_v14 = vld [vmem:[%s7017_s1 + $0x30] sm:$0xff] }
  0x10   : > { %4903 = vmatprep.subr.mxu1 %v450_v3  ;;  %4892 = vmatpush3.msk.msra.mxu0 %vm348_vm1, %v330_v5  ;;  %v442_v15 = vld [vmem:[%s7017_s1 + $0x28] sm:$0xff]  ;;  %v441_v16 = vld [vmem:[%s7017_s1 + $0x20] sm:$0xff]  ;;  %v440_v17 = vld [vmem:[%s7017_s1 + $0x18] sm:$0xff] }
  0x11   : > { %4904 = vmatpush3.msra.mxu1 %v450_v3  ;;  %4894 = vmatmul.mubr.msk.f32.vlgmr.msra.gmra.mxu0 %vm335_vm0, %v332_v6  ;;  %v439_v18 = vld [vmem:[%s7017_s1 + $0x10] sm:$0xff]  ;;  %v438_v19 = vld [vmem:[%s7017_s1 + $0x8] sm:$0xff]  ;;  %v437_v20 = vld [vmem:[%s7017_s1] sm:$0xff] }
  0x12   : > { %4905 = vmatprep.subr.mxu1 %v449_v4  ;;  %4896 = vmatprep.mubr.msk.f32.mxu0 %vm335_vm0, %v333_v7  ;;  %v453_v21 = vld [vmem:[%s7020_s4] sm:$0xff]  ;;  %v455_v22 = vld [vmem:[%s7020_s4 + $0x10] sm:$0xff]  ;;  %v454_v24 = vld [vmem:[%s7020_s4 + $0x8] sm:$0xff] }
  0x13   : > { %4906 = vmatpush3.msra.mxu1 %v449_v4  ;;  %459 = vperm.xlu0 %5367, %v453_v21   ;;  %v456_v25 = vld [vmem:[%s7020_s4 + $0x18] sm:$0xff]  ;;  %v580_v27 = vld [vmem:[%s7018_s2 + $0x70] sm:$0xff]  ;;  %v579_v30 = vld [vmem:[%s7018_s2 + $0x68] sm:$0xff] }
  0x14   : > { %4907 = vmatprep.subr.mxu1 %v448_v8  ;;  %469 = vperm.xlu1 %5368, %v455_v22   ;;  %v581_v26 = vld [vmem:[%s7018_s2 + $0x78] sm:$0xff]  ;;  %v697_v29 = vld [vmem:[%s7023_s7 + $0x10] sm:$0xff]  ;;  %v696_v31 = vld [vmem:[%s7023_s7 + $0x8] sm:$0xff] }
  0x15   : > { %4908 = vmatpush3.msra.mxu1 %v448_v8  ;;  %4897 = vmatmul.mubr.msk.f32.gmra.mxu0 %vm335_vm0, %v334_v10  ;;  %v698_v28 = vld [vmem:[%s7023_s7 + $0x18] sm:$0xff]  ;;  %v695_v32 = vld [vmem:[%s7023_s7] sm:$0xff]  ;;  %v4450_v36 = vld [vmem:[%s7023_s7 + $0x30] sm:$0xff] }
  0x16   : > { %4909 = vmatprep.subr.mxu1 %v447_v9  ;;  %4937 = vmatprep.subr.mxu0 %v581_v26  ;;  %v578_v33 = vld [vmem:[%s7018_s2 + $0x60] sm:$0xff]  ;;  %v577_v34 = vld [vmem:[%s7018_s2 + $0x58] sm:$0xff]  ;;  %v576_v37 = vld [vmem:[%s7018_s2 + $0x50] sm:$0xff] }
  0x17   : > { %4910 = vmatpush3.msra.mxu1 %v447_v9  ;;  %464 = vperm.xlu0 %5367, %v454_v24   ;;  %v4451_v35 = vld [vmem:[%s7023_s7 + $0x38] sm:$0xff]  ;;  %v4449_v38 = vld [vmem:[%s7023_s7 + $0x28] sm:$0xff]  ;;  %v4448_v39 = vld [vmem:[%s7023_s7 + $0x20] sm:$0xff] }
  0x18   : > { %4911 = vmatprep.subr.mxu1 %v446_v11  ;;  %474 = vperm.xlu1 %5368, %v456_v25   ;;  %v575_v40 = vld [vmem:[%s7018_s2 + $0x48] sm:$0xff]  ;;  %v574_v41 = vld [vmem:[%s7018_s2 + $0x40] sm:$0xff]  ;;  %v4455_v42 = vld [vmem:[%s7023_s7 + $0x58] sm:$0xff] }
  0x19   : > { %4912 = vmatpush3.msra.mxu1 %v446_v11  ;;  %4938 = vmatpush3.msra.mxu0 %v581_v26  ;;  %v4454_v43 = vld [vmem:[%s7023_s7 + $0x50] sm:$0xff]  ;;  %v573_v44 = vld [vmem:[%s7018_s2 + $0x38] sm:$0xff]  ;;  %v4453_v45 = vld [vmem:[%s7023_s7 + $0x48] sm:$0xff] }
  0x1a   : > { %4913 = vmatprep.subr.mxu1 %v445_v12  ;;  %4939 = vmatprep.subr.mxu0 %v580_v27  ;;  %v4452_v46 = vld [vmem:[%s7023_s7 + $0x40] sm:$0xff]  ;;  %v572_v47 = vld [vmem:[%s7018_s2 + $0x30] sm:$0xff]  ;;  %v571_v48 = vld [vmem:[%s7018_s2 + $0x28] sm:$0xff] }
  0x1b   : > { %4914 = vmatpush3.msra.mxu1 %v445_v12  ;;  %740 = vperm.xlu0 %5367, %v698_v28   ;;  %v570_v49 = vld [vmem:[%s7018_s2 + $0x20] sm:$0xff]  ;;  %v569_v54 = vld [vmem:[%s7018_s2 + $0x18] sm:$0xff]  ;;  %v568_v55 = vld [vmem:[%s7018_s2 + $0x10] sm:$0xff]  ;;  %v5746_v28 = vmov 0.0  }
  0x1c   : > { %4915 = vmatprep.subr.mxu1 %v444_v13  ;;  %735 = vperm.xlu1 %5368, %v697_v29   ;;  %v567_v56 = vld [vmem:[%s7018_s2 + $0x8] sm:$0xff]  ;;  %v566_v57 = vld [vmem:[%s7018_s2] sm:$0xff]  ;;  %v4435_v21 = vld [vmem:[%s7021_s5 + $0x38] sm:$0xff] }
  0x1d   : > { %4916 = vmatpush3.msra.mxu1 %v444_v13  ;;  %4940 = vmatpush3.msra.mxu0 %v580_v27  ;;  %v667_v10 = vld [vmem:[%s7021_s5] sm:$0xff]  ;;  %v4438_v23 = vld [vmem:[%s7021_s5 + $0x50] sm:$0xff]  ;;  %v4437_v24 = vld [vmem:[%s7021_s5 + $0x48] sm:$0xff] }
  0x1e   : > { %4917 = vmatprep.subr.mxu1 %v443_v14  ;;  %4941 = vmatprep.subr.mxu0 %v579_v30  ;;  %v4432_v11 = vld [vmem:[%s7021_s5 + $0x20] sm:$0xff]  ;;  %v4439_v25 = vld [vmem:[%s7021_s5 + $0x58] sm:$0xff]  ;;  %v6046_v29 = vld [vmem:[%s7022_s6 + $0x8] sm:$0xff] }
  0x1f   : > { %4918 = vmatpush3.msra.mxu1 %v443_v14  ;;  %4942 = vmatpush3.msra.mxu0 %v579_v30  ;;  %v4436_v22 = vld [vmem:[%s7021_s5 + $0x40] sm:$0xff]  ;;  %v6051_v30 = vld [vmem:[%s7022_s6 + $0x28] sm:$0xff] }
  0x20   : > { %4919 = vmatprep.subr.mxu1 %v442_v15  ;;  %730 = vperm.xlu0 %5367, %v696_v31   ;;  %v6034_v26 = vld [vmem:[%s7022_s6] sm:$0xff]  ;;  %v6058_v31 = vld [vmem:[%s7022_s6 + $0x10] sm:$0xff] }
  0x21   : > { %4920 = vmatpush3.msra.mxu1 %v442_v15  ;;  %725 = vperm.xlu1 %5368, %v695_v32   ;;  %v6041_v27 = vld [vmem:[%s7022_s6 + $0x20] sm:$0xff]  ;;  %v6063_v32 = vld [vmem:[%s7022_s6 + $0x30] sm:$0xff] }
  0x22   : > { %4921 = vmatprep.subr.mxu1 %v441_v16  ;;  %4943 = vmatprep.subr.mxu0 %v578_v33 }
  0x23   : > { %4922 = vmatpush3.msra.mxu1 %v441_v16  ;;  %4944 = vmatpush3.msra.mxu0 %v578_v33  ;;  %v668_v16 = vld [vmem:[%s7021_s5 + $0x8] sm:$0xff]  ;;  %v6078_v33 = vld [vmem:[%s7022_s6 + $0x18] sm:$0xff] }
  0x24   : > { %4923 = vmatprep.subr.mxu1 %v440_v17  ;;  %4945 = vmatprep.subr.mxu0 %v577_v34 }
  0x25   : > { %4924 = vmatpush3.msra.mxu1 %v440_v17  ;;  %858 = vperm.xlu0 %5367, %v4451_v35   ;;  %v4433_v17 = vld [vmem:[%s7021_s5 + $0x28] sm:$0xff]  ;;  %v6088_v35 = vld [vmem:[%s7022_s6 + $0x40] sm:$0xff] }
  0x26   : > { %4925 = vmatprep.subr.mxu1 %v439_v18  ;;  %853 = vperm.xlu1 %5368, %v4450_v36   ;;  %v6099_v36 = vld [vmem:[%s7022_s6 + $0x48] sm:$0xff] }
  0x27   : > { %4926 = vmatpush3.msra.mxu1 %v439_v18  ;;  %4946 = vmatpush3.msra.mxu0 %v577_v34  ;;  %v669_v18 = vld [vmem:[%s7021_s5 + $0x10] sm:$0xff]  ;;  %v6083_v34 = vld [vmem:[%s7022_s6 + $0x38] sm:$0xff] }
  0x28   : > { %4927 = vmatprep.subr.mxu1 %v438_v19  ;;  %4947 = vmatprep.subr.mxu0 %v576_v37 }
  0x29   : > { %4928 = vmatpush3.msra.mxu1 %v438_v19  ;;  %4948 = vmatpush3.msra.mxu0 %v576_v37  ;;  %v4434_v19 = vld [vmem:[%s7021_s5 + $0x30] sm:$0xff] }
  0x2a   : > { %4929 = vmatprep.subr.mxu1 %v437_v20  ;;  %848 = vperm.xlu0 %5367, %v4449_v38   ;;  %v6106_v37 = vld [vmem:[%s7022_s6 + $0x50] sm:$0xff]  ;;  %v6115_v38 = vld [vmem:[%s7022_s6 + $0x58] sm:$0xff] }
  0x2b   : > { %4930 = vmatpush3.msra.mxu1 %v437_v20  ;;  %843 = vperm.xlu1 %5368, %v4448_v39   ;;  %v670_v20 = vld [vmem:[%s7021_s5 + $0x18] sm:$0xff] }
  0x2c   : > { %4949 = vmatprep.subr.mxu0 %v575_v40 }
  0x2d   : > { %4950 = vmatpush3.msra.mxu0 %v575_v40 }
  0x2e   : > { %4951 = vmatprep.subr.mxu0 %v574_v41  ;;  %975 = vperm.xlu0 %5367, %v4455_v42  }
  0x2f   : > { %970 = vperm.xlu1 %5368, %v4454_v43   ;;  %4952 = vmatpush3.msra.mxu0 %v574_v41 }
  0x30   : > { %4953 = vmatprep.subr.mxu0 %v573_v44 }
  0x31   : > { %4954 = vmatpush3.msra.mxu0 %v573_v44 }
  0x32   : > { %965 = vperm.xlu0 %5367, %v4453_v45   ;;  %4955 = vmatprep.subr.mxu0 %v572_v47 }
  0x33   : > { %960 = vperm.xlu1 %5368, %v4452_v46   ;;  %4956 = vmatpush3.msra.mxu0 %v572_v47 }
  0x34   : > { %4957 = vmatprep.subr.mxu0 %v571_v48 }
  0x35   : > { %4958 = vmatpush3.msra.mxu0 %v571_v48 }
  0x36   : > { %4959 = vmatprep.subr.mxu0 %v570_v49 }
  0x37   : > { %4960 = vmatpush3.msra.mxu0 %v570_v49 }
  0x38   : > { %4961 = vmatprep.subr.mxu0 %v569_v54 }
  0x39   : > { %4962 = vmatpush3.msra.mxu0 %v569_v54 }
  0x3a   : > { %4963 = vmatprep.subr.mxu0 %v568_v55 }
  0x3b   : > { %4964 = vmatpush3.msra.mxu0 %v568_v55  ;;  %v6132_v55 = vld [vmem:[%s7024_s8 + $0x8] sm:$0xff] }
  0x3c   : > { %4965 = vmatprep.subr.mxu0 %v567_v56 }
  0x3d   : > { %4966 = vmatpush3.msra.mxu0 %v567_v56 }
  0x3e   : > { %4967 = vmatprep.subr.mxu0 %v566_v57 }
  0x3f   : > { %4968 = vmatpush3.msra.mxu0 %v566_v57 }
  0x8e   : > { %v460_v58 = vpop.permute.xlu0 %459 }
  0x8f   : > { %v470_v59 = vpop.permute.xlu1 %469 }
  0x92   : > { %v465_v61 = vpop.permute.xlu0 %464 }
  0x93   : > { %v475_v2 = vpop.permute.xlu1 %474 }
  0x96   : > { %v741_v45 = vpop.permute.xlu0 %740 }
  0x97   : > { %v736_v46 = vpop.permute.xlu1 %735 }
  0xd1   : > { %v4895_v50 = vpop.f32.mrf.mxu0 }
  0xd3   : > { %v418_v51 = vpop.f32.mrf.mxu0 }
  0xd4   : > { %4931 = vmatprep.mubr.f32.mxu1 %v418_v51  ;;  %v731_v51 = vpop.permute.xlu0 %730 }
  0xd5   : > { %v4898_v52 = vpop.f32.mrf.mxu0  ;;  %4932 = vmatmul.mubr.f32.vlgmr.msra.gmra.mxu1 %v4895_v50 }
  0xd7   : > { %v428_v53 = vpop.f32.mrf.mxu0 }
  0xd8   : > { %4934 = vmatprep.mubr.f32.mxu1 %v428_v53 }
  0xd9   : > { %4935 = vmatmul.mubr.f32.gmra.mxu1 %v4898_v52  ;;  %v726_v52 = vpop.permute.xlu1 %725 }
  0xda   : > { %4983 = vmatprep.mubr.msk.f32.mxu1 %vm743_vm2, %v667_v10 }
 0x195   : > { %v4933_v60 = vpop.f32.mrf.mxu1 }
 0x196   : > { %v549_v62 = vadd.f32 %v4933_v60, %v465_v61 }
 0x197   : > { %v543_v63 = vpop.f32.mrf.mxu1 }
 0x198   : > { %v544_v0 = vadd.f32 %v543_v63, %v460_v58  ;;  %v563_v4 = vmax.f32 %v549_v62, 0.0  ;;  %v6137_v58 = vld [vmem:[%s7024_s8] sm:$0xff]  ;;  %v859_v63 = vpop.permute.xlu0 %858 }
 0x199   : > { %v4936_v1 = vpop.f32.mrf.mxu1 }
 0x19a   : > { %v562_v3 = vmax.f32 %v544_v0, 0.0  ;;  %v559_v5 = vadd.f32 %v4936_v1, %v475_v2 }
 0x19b   : > { %v553_v6 = vpop.f32.mrf.mxu1 }
 0x19c   : > { %v554_v7 = vadd.f32 %v553_v6, %v470_v59  ;;  %4969 = vmatprep.mubr.f32.mxu0 %v562_v3  ;;  %v565_v9 = vmax.f32 %v559_v5, 0.0  ;;  %v6149_v3 = vld [vmem:[%s7024_s8 + $0x18] sm:$0xff]  ;;  %v6154_v6 = vld [vmem:[%s7024_s8 + $0x10] sm:$0xff] }
 0x19d   : > { %4970 = vmatmul.mubr.f32.vlgmr.msra.gmra.mxu0 %v563_v4  ;;  %v854_v4 = vpop.permute.xlu1 %853 }
 0x19e   : > { %v564_v8 = vmax.f32 %v554_v7, 0.0 }
 0x1a0   : > { %4972 = vmatprep.mubr.f32.mxu0 %v564_v8  ;;  %v6159_v8 = vld [vmem:[%s7024_s8 + $0x28] sm:$0xff] }
 0x1a1   : > { %4973 = vmatmul.mubr.f32.gmra.mxu0 %v565_v9 }
 0x1a2   : > { %4997 = vmatprep.mubr.msk.f32.mxu0 %vm743_vm2, %v4432_v11 }
 0x25d   : > { %v4971_v12 = vpop.f32.mrf.mxu0 }
 0x25f   : > { %v648_v13 = vpop.f32.mrf.mxu0 }
 0x261   : > { %v4974_v14 = vpop.f32.mrf.mxu0 }
 0x262   : > { %4975 = vmatprep.subr.mxu1 %v4974_v14  ;;  %4989 = vmatprep.subr.mxu0 %v4974_v14 }
 0x263   : > { %v658_v15 = vpop.f32.mrf.mxu0  ;;  %4976 = vmatpush3.msra.mxu1 %v4974_v14  ;;  %4990 = vmatpush3.msra.mxu0 %v4974_v14 }
 0x264   : > { %4977 = vmatprep.subr.mxu1 %v658_v15  ;;  %4991 = vmatprep.subr.mxu0 %v658_v15 }
 0x265   : > { %4978 = vmatpush3.msra.mxu1 %v658_v15  ;;  %4992 = vmatpush3.msra.mxu0 %v658_v15 }
 0x266   : > { %4979 = vmatprep.subr.mxu1 %v4971_v12  ;;  %4993 = vmatprep.subr.mxu0 %v4971_v12 }
 0x267   : > { %4980 = vmatpush3.msra.mxu1 %v4971_v12  ;;  %4994 = vmatpush3.msra.mxu0 %v4971_v12 }
 0x268   : > { %4981 = vmatprep.subr.mxu1 %v648_v13  ;;  %4995 = vmatprep.subr.mxu0 %v648_v13 }
 0x269   : > { %4982 = vmatpush3.msra.mxu1 %v648_v13  ;;  %4996 = vmatpush3.msra.mxu0 %v648_v13 }
 0x26a   : > { %4984 = vmatmul.mubr.msk.f32.vlgmr.msra.gmra.mxu1 %vm743_vm2, %v668_v16  ;;  %4998 = vmatmul.mubr.msk.f32.vlgmr.msra.gmra.mxu0 %vm743_vm2, %v4433_v17  ;;  %v6175_v17 = vld [vmem:[%s7024_s8 + $0x38] sm:$0xff] }
 0x26b   : > { %5003 = vmatprep.subr.mxu0 %v4974_v14  ;;  %5335 = vmatprep.subr.mxu1 %v4974_v14 }
 0x26c   : > { %5004 = vmatpush3.msra.mxu0 %v4974_v14  ;;  %5339 = vmatpush3.msra.mxu1 %v4974_v14 }
 0x26d   : > { %5005 = vmatprep.subr.mxu0 %v658_v15  ;;  %5336 = vmatprep.subr.mxu1 %v658_v15 }
 0x26e   : > { %4986 = vmatprep.mubr.msk.f32.mxu1 %vm743_vm2, %v669_v18  ;;  %5000 = vmatprep.mubr.msk.f32.mxu0 %vm743_vm2, %v4434_v19 }
 0x26f   : > { %5006 = vmatpush3.msra.mxu0 %v658_v15  ;;  %5340 = vmatpush3.msra.mxu1 %v658_v15 }
 0x270   : > { %4987 = vmatmul.mubr.msk.f32.gmra.mxu1 %vm743_vm2, %v670_v20  ;;  %5001 = vmatmul.mubr.msk.f32.gmra.mxu0 %vm743_vm2, %v4435_v21  ;;  %v849_v21 = vpop.permute.xlu0 %848 }
 0x271   : > { %5007 = vmatprep.subr.mxu0 %v4971_v12  ;;  %5337 = vmatprep.subr.mxu1 %v4971_v12 }
 0x272   : > { %5008 = vmatpush3.msra.mxu0 %v4971_v12  ;;  %5341 = vmatpush3.msra.mxu1 %v4971_v12  ;;  %v6167_v12 = vld [vmem:[%s7024_s8 + $0x20] sm:$0xff] }
 0x273   : > { %5009 = vmatprep.subr.mxu0 %v648_v13  ;;  %5338 = vmatprep.subr.mxu1 %v648_v13 }
 0x274   : > { %5010 = vmatpush3.msra.mxu0 %v648_v13  ;;  %5342 = vmatpush3.msra.mxu1 %v648_v13 }
 0x275   : > { %5011 = vmatprep.mubr.msk.f32.mxu0 %vm743_vm2, %v4436_v22  ;;  %5014 = vmatprep.mubr.msk.f32.mxu1 %vm743_vm2, %v4438_v23 }
 0x276   : > { %5012 = vmatmul.mubr.msk.f32.vlgmr.msra.gmra.mxu0 %vm743_vm2, %v4437_v24  ;;  %5015 = vmatmul.mubr.msk.f32.vlgmr.msra.gmra.mxu1 %vm743_vm2, %v4439_v25  ;;  %v6185_v25 = vld [vmem:[%s7024_s8 + $0x30] sm:$0xff] }
 0x277   : > { %5017 = vmatprep.subr.mxu0 %v5746_v28  ;;  %5025 = vmatprep.subr.mxu1 %v5746_v28 }
 0x278   : > { %5018 = vmatpush3.msra.mxu0 %v5746_v28  ;;  %5019 = vmatprep.mubr.msk.f32.mxu0 %vm743_vm2, %v6034_v26 }
 0x279   : > { %5026 = vmatpush3.msra.mxu1 %v5746_v28  ;;  %5027 = vmatprep.mubr.msk.f32.mxu1 %vm743_vm2, %v6041_v27 }
 0x27a   : > { %5020 = vmatmul.mubr.msk.f32.vlgmr.msra.gmra.mxu0 %vm743_vm2, %v6046_v29  ;;  %5028 = vmatmul.mubr.msk.f32.vlgmr.msra.gmra.mxu1 %vm743_vm2, %v6051_v30 }
 0x27b   : > { %5022 = vmatprep.mubr.msk.f32.mxu0 %vm743_vm2, %v6058_v31  ;;  %5030 = vmatprep.mubr.msk.f32.mxu1 %vm743_vm2, %v6063_v32 }
 0x27c   : > { %5033 = vmatprep.subr.mxu0 %v5746_v28 }
 0x27d   : > { %5034 = vmatpush3.msra.mxu0 %v5746_v28  ;;  %v844_v28 = vpop.permute.xlu1 %843 }
 0x27e   : > { %5023 = vmatmul.mubr.msk.f32.gmra.mxu0 %vm743_vm2, %v6078_v33  ;;  %5031 = vmatmul.mubr.msk.f32.gmra.mxu1 %vm743_vm2, %v6083_v34 }
 0x27f   : > { %5035 = vmatprep.mubr.msk.f32.mxu0 %vm743_vm2, %v6088_v35  ;;  %5049 = vmatprep.mubr.msk.f32.mxu1 %vm743_vm2, %v6034_v26 }
 0x282   : > { %5036 = vmatmul.mubr.msk.f32.vlgmr.msra.gmra.mxu0 %vm743_vm2, %v6099_v36 }
 0x283   : > { %5038 = vmatprep.mubr.msk.f32.mxu0 %vm743_vm2, %v6106_v37 }
 0x286   : > { %5039 = vmatmul.mubr.msk.f32.gmra.mxu0 %vm743_vm2, %v6115_v38 }
 0x287   : > { %5063 = vmatprep.mubr.msk.f32.mxu0 %vm743_vm2, %v6041_v27 }
 0x32a   : > { %v4985_v39 = vpop.f32.mrf.mxu1  ;;  %v4999_v40 = vpop.f32.mrf.mxu0 }
 0x32b   : > { %v6139_v59 = vadd.f32 %v4985_v39, %v731_v51  ;;  %v6187_v39 = vadd.f32 %v4999_v40, %v849_v21  ;;  %v971_v21 = vpop.permute.xlu1 %970 }
 0x32c   : > { %v822_v41 = vpop.f32.mrf.mxu1  ;;  %v939_v42 = vpop.f32.mrf.mxu0 }
 0x32d   : > { %v6142_v0 = vadd.f32 %v822_v41, %v726_v52 }
 0x330   : > { %v4988_v43 = vpop.f32.mrf.mxu1  ;;  %v5002_v44 = vpop.f32.mrf.mxu0 }
 0x331   : > { %v6162_v11 = vadd.f32 %v4988_v43, %v741_v45  ;;  %v6190_v45 = vadd.f32 %v939_v42, %v844_v28 }
 0x332   : > { %v832_v47 = vpop.f32.mrf.mxu1  ;;  %v949_v48 = vpop.f32.mrf.mxu0 }
 0x333   : > { %v6170_v15 = vadd.f32 %v832_v47, %v736_v46  ;;  %v6192_v47 = vadd.f32 %v5002_v44, %v859_v63 }
 0x336   : > { %v6121_v49 = vpop.f32.mrf.mxu0  ;;  %v6123_v50 = vpop.f32.mrf.mxu1 }
 0x338   : > { %v6125_v53 = vpop.f32.mrf.mxu0  ;;  %v6127_v54 = vpop.f32.mrf.mxu1 }
 0x33a   : > { %v5021_v56 = vpop.f32.mrf.mxu0  ;;  %v5029_v57 = vpop.f32.mrf.mxu1 }
 0x33b   : > { %v1159_v60 = vadd.f32 %v5021_v56, %v6132_v55  ;;  %v1256_v19 = vadd.f32 %v5029_v57, %v6159_v8  ;;  %v6197_v57 = vadd.f32 %v949_v48, %v854_v4 }
 0x33c   : > { %v1153_v61 = vpop.f32.mrf.mxu0  ;;  %v1250_v62 = vpop.f32.mrf.mxu1 }
 0x33d   : > { %v1367_v1 = vadd.f32 %v1159_v60, %v6139_v59  ;;  %v1154_v2 = vadd.f32 %v1153_v61, %v6137_v58  ;;  %v1251_v22 = vadd.f32 %v6167_v12, %v1250_v62  ;;  %v1395_v51 = vadd.f32 %v1256_v19, %v6187_v39 }
 0x33e   : > { %v5024_v5 = vpop.f32.mrf.mxu0  ;;  %v5032_v10 = vpop.f32.mrf.mxu1 }
 0x33f   : > { %v4489_v7 = vmul.f32 -1.442695, %v1367_v1  ;;  %v1366_v9 = vadd.f32 %v1154_v2, %v6142_v0  ;;  %v1169_v13 = vadd.f32 %v5024_v5, %v6149_v3  ;;  %v1266_v43 = vadd.f32 %v5032_v10, %v6175_v17 }
 0x340   : > { %v1163_v14 = vpop.f32.mrf.mxu0  ;;  %v1260_v24 = vpop.f32.mrf.mxu1  ;;  %v1394_v56 = vadd.f32 %v1251_v22, %v6190_v45  ;;  %v4493_v60 = vmul.f32 -1.442695, %v1395_v51  ;;  %v6210_v22 = vld [vmem:[%s7024_s8 + $0x40] sm:$0xff] }
 0x341   : > { %5369 = vpow2.f32 %v4489_v7  ;;  %v4488_v16 = vmul.f32 -1.442695, %v1366_v9  ;;  %v1164_v18 = vadd.f32 %v1163_v14, %v6154_v6  ;;  %v1369_v20 = vadd.f32 %v1169_v13, %v6162_v11  ;;  %v6204_v13 = vld [vmem:[%s7024_s8 + $0x48] sm:$0xff] }
 0x342   : > { %v1261_v52 = vadd.f32 %v6185_v25, %v1260_v24  ;;  %v1397_v40 = vadd.f32 %v1266_v43, %v6192_v47  ;;  %v4492_v42 = vmul.f32 -1.442695, %v1394_v56  ;;  %v5037_v9 = vpop.f32.mrf.mxu0  ;;  %v6215_v24 = vld [vmem:[%s7024_s8 + $0x58] sm:$0xff] }
 0x343   : > { %5371 = vpow2.f32 %v4488_v16  ;;  %v1368_v23 = vadd.f32 %v1164_v18, %v6170_v15  ;;  %v4491_v41 = vmul.f32 -1.442695, %v1369_v20  ;;  %v976_v16 = vpop.permute.xlu0 %975  ;;  %v1353_v19 = vadd.f32 %v5037_v9, %v6204_v13 }
 0x344   : > { %v1396_v61 = vadd.f32 %v1261_v52, %v6197_v57  ;;  %v4495_v62 = vmul.f32 -1.442695, %v1397_v40  ;;  %v1347_v14 = vpop.f32.mrf.mxu0 }
 0x345   : > { %v4490_v46 = vmul.f32 -1.442695, %v1368_v23  ;;  %5373 = vpow2.f32 %v4491_v41  ;;  %v1348_v52 = vadd.f32 %v6210_v22, %v1347_v14 }
 0x346   : > { %v4494_v44 = vmul.f32 -1.442695, %v1396_v61  ;;  %v5040_v28 = vpop.f32.mrf.mxu0 }
 0x347   : > { %5375 = vpow2.f32 %v4490_v46  ;;  %v966_v40 = vpop.permute.xlu0 %965  ;;  %v1363_v61 = vadd.f32 %v5040_v28, %v6215_v24 }
 0x348   : > { %5377 = vpow2.f32 %v4493_v60 }
 0x349   : > { %5379 = vpow2.f32 %v4492_v42  ;;  %v6220_v42 = vadd.f32 %v6121_v49, %v966_v40  ;;  %v6232_v49 = vadd.f32 %v6123_v50, %v976_v16 }
 0x34a   : > { %5381 = vpow2.f32 %v4495_v62 }
 0x34e   : > { %v5370_v1 = vpop.eup %5369 }
 0x34f   : > { %v1383_v63 = vadd.f32 1.0, %v5370_v1 }
 0x350   : > { %v5372_v2 = vpop.eup %5371 }
 0x351   : > { %5383 = vrcp.f32 %v1383_v63  ;;  %v1382_v5 = vadd.f32 1.0, %v5372_v2  ;;  %v6225_v63 = vld [vmem:[%s7024_s8 + $0x50] sm:$0xff]  ;;  %v961_v2 = vpop.permute.xlu1 %960 }
 0x352   : > { %5385 = vpow2.f32 %v4494_v44  ;;  %v5374_v48 = vpop.eup %5373  ;;  %v1357_v44 = vpop.f32.mrf.mxu0 }
 0x353   : > { %5387 = vrcp.f32 %v1382_v5  ;;  %v1385_v4 = vadd.f32 1.0, %v5374_v48 }
 0x354   : > { %v5376_v7 = vpop.eup %5375 }
 0x355   : > { %5389 = vrcp.f32 %v1385_v4  ;;  %v1384_v10 = vadd.f32 1.0, %v5376_v7  ;;  %v5378_v18 = vpop.eup %5377  ;;  %v6228_v4 = vadd.f32 %v6125_v53, %v961_v2 }
 0x356   : > { %v5380_v20 = vpop.eup %5379  ;;  %v1411_v46 = vadd.f32 1.0, %v5378_v18 }
 0x357   : > { %5391 = vrcp.f32 %v1384_v10  ;;  %v5382_v23 = vpop.eup %5381  ;;  %v1410_v62 = vadd.f32 1.0, %v5380_v20  ;;  %v1358_v10 = vadd.f32 %v6225_v63, %v1357_v44 }
 0x358   : > { %v1413_v60 = vadd.f32 1.0, %v5382_v23  ;;  %5393 = vrcp.f32 %v1411_v46 }
 0x35a   : > { %5395 = vrcp.f32 %v1413_v60 }
 0x35b   : > { %5397 = vrcp.f32 %v1410_v62 }
 0x35e   : > { %v5384_v41 = vpop.eup %5383 }
 0x35f   : > { %v5386_v43 = vpop.eup %5385  ;;  %v1423_v51 = vmul.f32 %v5384_v41, %v1353_v19  ;;  %v6237_v19 = vadd.f32 %v6127_v54, %v971_v21 }
 0x360   : > { %v5388_v56 = vpop.eup %5387  ;;  %v1412_v5 = vadd.f32 1.0, %v5386_v43 }
 0x361   : > { %v1422_v1 = vmul.f32 %v5388_v56, %v1348_v52  ;;  %v1427_v7 = vadd.f32 %v1423_v51, %v6220_v42 }
 0x362   : > { %v5390_v48 = vpop.eup %5389  ;;  %5399 = vrcp.f32 %v1412_v5 }
 0x363   : > { %v1425_v9 = vmul.f32 %v5390_v48, %v1363_v61  ;;  %v1426_v18 = vadd.f32 %v1422_v1, %v6228_v4  ;;  %5401 = vtanh.f32 %v1427_v7 }
 0x364   : > { %v5392_v14 = vpop.eup %5391 }
 0x365   : > { %v1429_v53 = vadd.f32 %v1425_v9, %v6232_v49  ;;  %v1424_v20 = vmul.f32 %v5392_v14, %v1358_v10  ;;  %v5394_v16 = vpop.eup %5393 }
 0x366   : > { %v1435_v21 = vsub.f32 1.0, %v5394_v16  ;;  %v1443_v5 = vmul.f32 0.0, %v5394_v16 }
 0x367   : > { %5403 = vtanh.f32 %v1429_v53  ;;  %v1428_v50 = vadd.f32 %v1424_v20, %v6237_v19  ;;  %v5396_v23 = vpop.eup %5395 }
 0x368   : > { %5405 = vtanh.f32 %v1426_v18  ;;  %v5398_v28 = vpop.eup %5397  ;;  %v1437_v46 = vsub.f32 1.0, %v5396_v23  ;;  %v1445_v54 = vmul.f32 0.0, %v5396_v23 }
 0x369   : > { %5407 = vtanh.f32 %v1428_v50  ;;  %v1434_v61 = vsub.f32 1.0, %v5398_v28  ;;  %v1442_v9 = vmul.f32 0.0, %v5398_v28 }
 0x36f   : > { %v5400_v41 = vpop.eup %5399 }
 0x370   : > { %v5402_v43 = vpop.eup %5401  ;;  %v1436_v40 = vsub.f32 1.0, %v5400_v41  ;;  %v1444_v62 = vmul.f32 0.0, %v5400_v41 }
 0x371   : > { %v1439_v1 = vmul.f32 %v5402_v43, %v1435_v21 }
 0x373   : > { %v6249_v10 = vadd.f32 %v1443_v5, %v1439_v1 }
 0x374   : > { %v5404_v51 = vpop.eup %5403 }
 0x375   : > { %v5406_v52 = vpop.eup %5405  ;;  %v1441_v56 = vmul.f32 %v5404_v51, %v1437_v46 }
 0x376   : > { %v5408_v60 = vpop.eup %5407  ;;  %v1438_v48 = vmul.f32 %v5406_v52, %v1434_v61 }
 0x377   : > { %v6241_v44 = vadd.f32 %v1445_v54, %v1441_v56  ;;  %v1440_v2 = vmul.f32 %v5408_v60, %v1436_v40 }
 0x378   : > { %v6255_v14 = vadd.f32 %v1442_v9, %v1438_v48 }
 0x379   : > { %v6243_v7 = vadd.f32 %v1444_v62, %v1440_v2  ;;  %5041 = vmatprep.subr.mxu1 %v6241_v44  ;;  %5055 = vmatprep.subr.mxu0 %v6241_v44 }
 0x37a   : > { %5042 = vmatpush3.msra.mxu1 %v6241_v44  ;;  %5056 = vmatpush3.msra.mxu0 %v6241_v44 }
 0x37b   : > { %5043 = vmatprep.subr.mxu1 %v6243_v7  ;;  %5057 = vmatprep.subr.mxu0 %v6243_v7 }
 0x37c   : > { %5044 = vmatpush3.msra.mxu1 %v6243_v7  ;;  %5058 = vmatpush3.msra.mxu0 %v6243_v7 }
 0x37d   : > { %5045 = vmatprep.subr.mxu1 %v6249_v10  ;;  %5059 = vmatprep.subr.mxu0 %v6249_v10 }
 0x37e   : > { %5046 = vmatpush3.msra.mxu1 %v6249_v10  ;;  %5060 = vmatpush3.msra.mxu0 %v6249_v10 }
 0x37f   : > { %5047 = vmatprep.subr.mxu1 %v6255_v14  ;;  %5061 = vmatprep.subr.mxu0 %v6255_v14 }
 0x380   : > { %5048 = vmatpush3.msra.mxu1 %v6255_v14  ;;  %5062 = vmatpush3.msra.mxu0 %v6255_v14 }
 0x381   : > { %5050 = vmatmul.mubr.msk.f32.vlgmr.msra.gmra.mxu1 %vm743_vm2, %v6046_v29  ;;  %5069 = vmatprep.subr.mxu1 %v6241_v44 }
 0x382   : > { %5070 = vmatpush3.msra.mxu1 %v6241_v44  ;;  %5052 = vmatprep.mubr.msk.f32.mxu1 %vm743_vm2, %v6058_v31 }
 0x383   : > { %5071 = vmatprep.subr.mxu1 %v6243_v7  ;;  %5064 = vmatmul.mubr.msk.f32.vlgmr.msra.gmra.mxu0 %vm743_vm2, %v6051_v30 }
 0x384   : > { %5072 = vmatpush3.msra.mxu1 %v6243_v7  ;;  %5066 = vmatprep.mubr.msk.f32.mxu0 %vm743_vm2, %v6063_v32 }
 0x385   : > { %5053 = vmatmul.mubr.msk.f32.gmra.mxu1 %vm743_vm2, %v6078_v33  ;;  %5073 = vmatprep.subr.mxu1 %v6249_v10 }
 0x386   : > { %5074 = vmatpush3.msra.mxu1 %v6249_v10  ;;  %5077 = vmatprep.mubr.msk.f32.mxu1 %vm743_vm2, %v6088_v35 }
 0x387   : > { %5075 = vmatprep.subr.mxu1 %v6255_v14  ;;  %5067 = vmatmul.mubr.msk.f32.gmra.mxu0 %vm743_vm2, %v6083_v34 }
 0x388   : > { %5076 = vmatpush3.msra.mxu1 %v6255_v14  ;;  %5091 = vmatprep.mubr.msk.f32.mxu0 %vm743_vm2, %v6034_v26 }
 0x389   : > { %5078 = vmatmul.mubr.msk.f32.vlgmr.msra.gmra.mxu1 %vm743_vm2, %v6099_v36 }
 0x38a   : > { %5080 = vmatprep.mubr.msk.f32.mxu1 %vm743_vm2, %v6106_v37 }
 0x38d   : > { %5081 = vmatmul.mubr.msk.f32.gmra.mxu1 %vm743_vm2, %v6115_v38 }
 0x38e   : > { %5105 = vmatprep.mubr.msk.f32.mxu1 %vm743_vm2, %v6041_v27 }
 0x441   : > { %v5051_v18 = vpop.f32.mrf.mxu1 }
 0x442   : > { %v1522_v51 = vadd.f32 %v5051_v18, %v6132_v55 }
 0x443   : > { %v1516_v53 = vpop.f32.mrf.mxu1  ;;  %v5065_v20 = vpop.f32.mrf.mxu0 }
 0x444   : > { %v1517_v21 = vadd.f32 %v1516_v53, %v6137_v58  ;;  %v1607_v61 = vadd.f32 %v5065_v20, %v6159_v8 }
 0x445   : > { %v5054_v50 = vpop.f32.mrf.mxu1  ;;  %v1601_v16 = vpop.f32.mrf.mxu0 }
 0x446   : > { %v1532_v23 = vadd.f32 %v5054_v50, %v6149_v3  ;;  %v1602_v1 = vadd.f32 %v6167_v12, %v1601_v16 }
 0x447   : > { %v1526_v28 = vpop.f32.mrf.mxu1  ;;  %v5068_v41 = vpop.f32.mrf.mxu0 }
 0x448   : > { %v1527_v43 = vadd.f32 %v1526_v28, %v6154_v6  ;;  %1715 = vrot.lane.b32.xlu0 %v1532_v23, %s5747_s20  ;;  %v1617_v56 = vadd.f32 %v5068_v41, %v6175_v17 }
 0x449   : > { %v5079_v46 = vpop.f32.mrf.mxu1  ;;  %v1611_v52 = vpop.f32.mrf.mxu0 }
 0x44a   : > { %1713 = vrot.lane.b32.xlu1 %v1527_v43, %s5747_s20  ;;  %v1612_v40 = vadd.f32 %v6185_v25, %v1611_v52  ;;  %v1692_v48 = vadd.f32 %v5079_v46, %v6204_v13 }
 0x44b   : > { %v1686_v54 = vpop.f32.mrf.mxu1 }
 0x44c   : > { %1711 = vrot.lane.b32.xlu0 %v1522_v51, %s5747_s20  ;;  %v1687_v9 = vadd.f32 %v6210_v22, %v1686_v54 }
 0x44d   : > { %v5082_v60 = vpop.f32.mrf.mxu1 }
 0x44e   : > { %1709 = vrot.lane.b32.xlu1 %v1517_v21, %s5747_s20  ;;  %v1702_v2 = vadd.f32 %v5082_v60, %v6215_v24 }
 0x44f   : > { %v1696_v62 = vpop.f32.mrf.mxu1 }
 0x450   : > { %1759 = vrot.lane.b32.xlu0 %v1617_v56, %s5747_s20  ;;  %v1697_v5 = vadd.f32 %v6225_v63, %v1696_v62 }
 0x452   : > { %1757 = vrot.lane.b32.xlu1 %v1612_v40, %s5747_s20 }
 0x454   : > { %1755 = vrot.lane.b32.xlu0 %v1607_v61, %s5747_s20 }
 0x456   : > { %1753 = vrot.lane.b32.xlu1 %v1602_v1, %s5747_s20 }
 0x458   : > { %1803 = vrot.lane.b32.xlu0 %v1702_v2, %s5747_s20 }
 0x45a   : > { %1801 = vrot.lane.b32.xlu1 %v1697_v5, %s5747_s20 }
 0x45c   : > { %1799 = vrot.lane.b32.xlu0 %v1692_v48, %s5747_s20 }
 0x45e   : > { %1797 = vrot.lane.b32.xlu1 %v1687_v9, %s5747_s20 }
 0x460   : > { %1839 = vrot.lane.b32.xlu0 %v6241_v44, %s5747_s20 }
 0x462   : > { %1837 = vrot.lane.b32.xlu1 %v6243_v7, %s5747_s20 }
 0x464   : > { %1835 = vrot.lane.b32.xlu0 %v6249_v10, %s5747_s20 }
 0x466   : > { %1833 = vrot.lane.b32.xlu1 %v6255_v14, %s5747_s20 }
 0x4ba   : > { %v1716_v18 = vpop.permute.xlu0 %1715 }
 0x4bb   : > { %v1724_v53 = vadd.f32 %v1716_v18, %v6162_v11 }
 0x4bc   : > { %v1714_v20 = vpop.permute.xlu1 %1713 }
 0x4bd   : > { %v4511_v50 = vmul.f32 -1.442695, %v1724_v53  ;;  %v1723_v16 = vadd.f32 %v1714_v20, %v6170_v15 }
 0x4be   : > { %v1712_v23 = vpop.permute.xlu0 %1711 }
 0x4bf   : > { %5409 = vpow2.f32 %v4511_v50  ;;  %v4510_v28 = vmul.f32 -1.442695, %v1723_v16  ;;  %v1722_v44 = vadd.f32 %v1712_v23, %v6139_v59 }
 0x4c0   : > { %v1710_v41 = vpop.permute.xlu1 %1709 }
 0x4c1   : > { %5411 = vpow2.f32 %v4510_v28  ;;  %v4509_v7 = vmul.f32 -1.442695, %v1722_v44  ;;  %v1721_v10 = vadd.f32 %v1710_v41, %v6142_v0 }
 0x4c2   : > { %v1760_v43 = vpop.permute.xlu0 %1759 }
 0x4c3   : > { %5413 = vpow2.f32 %v4509_v7  ;;  %v4508_v14 = vmul.f32 -1.442695, %v1721_v10  ;;  %v1768_v46 = vadd.f32 %v1760_v43, %v6192_v47 }
 0x4c4   : > { %v1758_v51 = vpop.permute.xlu1 %1757 }
 0x4c5   : > { %5415 = vpow2.f32 %v4508_v14  ;;  %v4515_v52 = vmul.f32 -1.442695, %v1768_v46  ;;  %v1767_v54 = vadd.f32 %v1758_v51, %v6197_v57 }
 0x4c6   : > { %v1756_v21 = vpop.permute.xlu0 %1755 }
 0x4c7   : > { %v4514_v56 = vmul.f32 -1.442695, %v1767_v54  ;;  %v1766_v40 = vadd.f32 %v1756_v21, %v6187_v39  ;;  %5417 = vpow2.f32 %v4515_v52 }
 0x4c8   : > { %v1754_v60 = vpop.permute.xlu1 %1753 }
 0x4c9   : > { %v4513_v61 = vmul.f32 -1.442695, %v1766_v40  ;;  %v1765_v62 = vadd.f32 %v1754_v60, %v6190_v45  ;;  %5419 = vpow2.f32 %v4514_v56 }
 0x4ca   : > { %v1804_v41 = vpop.permute.xlu0 %1803 }
 0x4cb   : > { %v4512_v1 = vmul.f32 -1.442695, %v1765_v62  ;;  %5421 = vpow2.f32 %v4513_v61 }
 0x4cc   : > { %v5410_v2 = vpop.eup %5409  ;;  %v1802_v46 = vpop.permute.xlu1 %1801 }
 0x4cd   : > { %v1740_v5 = vadd.f32 1.0, %v5410_v2  ;;  %5423 = vpow2.f32 %v4512_v1 }
 0x4ce   : > { %v5412_v48 = vpop.eup %5411  ;;  %v1800_v60 = vpop.permute.xlu0 %1799 }
 0x4cf   : > { %5425 = vrcp.f32 %v1740_v5  ;;  %v1739_v9 = vadd.f32 1.0, %v5412_v48 }
 0x4d0   : > { %v5414_v18 = vpop.eup %5413  ;;  %v1798_v2 = vpop.permute.xlu1 %1797 }
 0x4d1   : > { %5427 = vrcp.f32 %v1739_v9  ;;  %v1738_v53 = vadd.f32 1.0, %v5414_v18 }
 0x4d2   : > { %v5416_v20 = vpop.eup %5415 }
 0x4d3   : > { %5429 = vrcp.f32 %v1738_v53  ;;  %v1737_v50 = vadd.f32 1.0, %v5416_v20  ;;  %v1840_v20 = vpop.permute.xlu0 %1839 }
 0x4d4   : > { %v5418_v16 = vpop.eup %5417 }
 0x4d5   : > { %5431 = vrcp.f32 %v1737_v50  ;;  %v1784_v44 = vadd.f32 1.0, %v5418_v16 }
 0x4d6   : > { %v5420_v23 = vpop.eup %5419 }
 0x4d7   : > { %v1783_v10 = vadd.f32 1.0, %v5420_v23  ;;  %5433 = vrcp.f32 %v1784_v44 }
 0x4d8   : > { %v5422_v28 = vpop.eup %5421 }
 0x4d9   : > { %v1782_v14 = vadd.f32 1.0, %v5422_v28  ;;  %5435 = vrcp.f32 %v1783_v10  ;;  %v1838_v28 = vpop.permute.xlu1 %1837 }
 0x4da   : > { %v5424_v7 = vpop.eup %5423 }
 0x4db   : > { %v1781_v54 = vadd.f32 1.0, %v5424_v7  ;;  %5437 = vrcp.f32 %v1782_v14 }
 0x4dc   : > { %v5426_v43 = vpop.eup %5425 }
 0x4dd   : > { %v1812_v51 = vmul.f32 %v5426_v43, %v1804_v41 }
 0x4de   : > { %v5428_v52 = vpop.eup %5427 }
 0x4df   : > { %v1816_v21 = vadd.f32 %v1812_v51, %v6232_v49  ;;  %v1811_v56 = vmul.f32 %v5428_v52, %v1802_v46 }
 0x4e0   : > { %v5430_v40 = vpop.eup %5429 }
 0x4e1   : > { %5439 = vtanh.f32 %v1816_v21  ;;  %v1815_v61 = vadd.f32 %v1811_v56, %v6237_v19  ;;  %v1810_v62 = vmul.f32 %v5430_v40, %v1800_v60  ;;  %v1836_v21 = vpop.permute.xlu0 %1835 }
 0x4e2   : > { %v5432_v1 = vpop.eup %5431  ;;  %5441 = vrcp.f32 %v1781_v54 }
 0x4e3   : > { %5443 = vtanh.f32 %v1815_v61  ;;  %v1814_v5 = vadd.f32 %v1810_v62, %v6220_v42  ;;  %v1809_v48 = vmul.f32 %v5432_v1, %v1798_v2  ;;  %v1834_v1 = vpop.permute.xlu1 %1833 }
 0x4e4   : > { %v5434_v18 = vpop.eup %5433 }
 0x4e5   : > { %5445 = vtanh.f32 %v1814_v5  ;;  %v1813_v9 = vadd.f32 %v1809_v48, %v6228_v4  ;;  %v1824_v16 = vsub.f32 1.0, %v5434_v18  ;;  %v1848_v7 = vmul.f32 %v5434_v18, %v1840_v20 }
 0x4e6   : > { %v5436_v53 = vpop.eup %5435 }
 0x4e7   : > { %5447 = vtanh.f32 %v1813_v9  ;;  %v1823_v10 = vsub.f32 1.0, %v5436_v53  ;;  %v1847_v51 = vmul.f32 %v5436_v53, %v1838_v28 }
 0x4e8   : > { %v5438_v50 = vpop.eup %5437 }
 0x4e9   : > { %v1822_v52 = vsub.f32 1.0, %v5438_v50  ;;  %v1846_v60 = vmul.f32 %v5438_v50, %v1836_v21 }
 0x4ee   : > { %v5440_v23 = vpop.eup %5439 }
 0x4ef   : > { %v5442_v44 = vpop.eup %5441  ;;  %v1828_v41 = vmul.f32 %v5440_v23, %v1824_v16 }
 0x4f0   : > { %v5444_v43 = vpop.eup %5443  ;;  %v1821_v61 = vsub.f32 1.0, %v5442_v44  ;;  %v1845_v48 = vmul.f32 %v5442_v44, %v1834_v1 }
 0x4f1   : > { %v6341_v14 = vadd.f32 %v1848_v7, %v1828_v41  ;;  %v1827_v46 = vmul.f32 %v5444_v43, %v1823_v10 }
 0x4f2   : > { %v5446_v54 = vpop.eup %5445 }
 0x4f3   : > { %v6343_v56 = vadd.f32 %v1847_v51, %v1827_v46  ;;  %v1826_v40 = vmul.f32 %v5446_v54, %v1822_v52  ;;  %1863 = vrot.lane.b32.xlu0 %v6341_v14, %s5748_s21 }
 0x4f4   : > { %v5448_v62 = vpop.eup %5447 }
 0x4f5   : > { %v6346_v2 = vadd.f32 %v1846_v60, %v1826_v40  ;;  %v1825_v5 = vmul.f32 %v5448_v62, %v1821_v61  ;;  %1861 = vrot.lane.b32.xlu1 %v6343_v56, %s5748_s21 }
 0x4f7   : > { %v6349_v9 = vadd.f32 %v1845_v48, %v1825_v5  ;;  %1859 = vrot.lane.b32.xlu0 %v6346_v2, %s5748_s21 }
 0x4f9   : > { %1857 = vrot.lane.b32.xlu1 %v6349_v9, %s5748_s21  ;;  %s5754_s21 = smov 124  }
 0x565   : > { %v1864_v18 = vpop.permute.xlu0 %1863 }
 0x566   : > { %5083 = vmatprep.subr.mxu0 %v1864_v18  ;;  %5097 = vmatprep.subr.mxu1 %v1864_v18 }
 0x567   : > { %5084 = vmatpush3.msra.mxu0 %v1864_v18  ;;  %5098 = vmatpush3.msra.mxu1 %v1864_v18  ;;  %v1862_v53 = vpop.permute.xlu1 %1861 }
 0x568   : > { %5085 = vmatprep.subr.mxu0 %v1862_v53  ;;  %5099 = vmatprep.subr.mxu1 %v1862_v53 }
 0x569   : > { %v1860_v20 = vpop.permute.xlu0 %1859  ;;  %5086 = vmatpush3.msra.mxu0 %v1862_v53  ;;  %5100 = vmatpush3.msra.mxu1 %v1862_v53 }
 0x56a   : > { %5087 = vmatprep.subr.mxu0 %v1860_v20  ;;  %5101 = vmatprep.subr.mxu1 %v1860_v20 }
 0x56b   : > { %5088 = vmatpush3.msra.mxu0 %v1860_v20  ;;  %5102 = vmatpush3.msra.mxu1 %v1860_v20  ;;  %v1858_v50 = vpop.permute.xlu1 %1857 }
 0x56c   : > { %5089 = vmatprep.subr.mxu0 %v1858_v50  ;;  %5103 = vmatprep.subr.mxu1 %v1858_v50 }
 0x56d   : > { %5090 = vmatpush3.msra.mxu0 %v1858_v50  ;;  %5104 = vmatpush3.msra.mxu1 %v1858_v50 }
 0x56e   : > { %5092 = vmatmul.mubr.msk.f32.vlgmr.msra.gmra.mxu0 %vm743_vm2, %v6046_v29  ;;  %5111 = vmatprep.subr.mxu0 %v1864_v18 }
 0x56f   : > { %5112 = vmatpush3.msra.mxu0 %v1864_v18  ;;  %5094 = vmatprep.mubr.msk.f32.mxu0 %vm743_vm2, %v6058_v31 }
 0x570   : > { %5113 = vmatprep.subr.mxu0 %v1862_v53  ;;  %5106 = vmatmul.mubr.msk.f32.vlgmr.msra.gmra.mxu1 %vm743_vm2, %v6051_v30 }
 0x571   : > { %5114 = vmatpush3.msra.mxu0 %v1862_v53  ;;  %5108 = vmatprep.mubr.msk.f32.mxu1 %vm743_vm2, %v6063_v32 }
 0x572   : > { %5095 = vmatmul.mubr.msk.f32.gmra.mxu0 %vm743_vm2, %v6078_v33  ;;  %5115 = vmatprep.subr.mxu0 %v1860_v20 }
 0x573   : > { %5116 = vmatpush3.msra.mxu0 %v1860_v20  ;;  %5119 = vmatprep.mubr.msk.f32.mxu0 %vm743_vm2, %v6088_v35 }
 0x574   : > { %5117 = vmatprep.subr.mxu0 %v1858_v50  ;;  %5109 = vmatmul.mubr.msk.f32.gmra.mxu1 %vm743_vm2, %v6083_v34 }
 0x575   : > { %5118 = vmatpush3.msra.mxu0 %v1858_v50  ;;  %5133 = vmatprep.mubr.msk.f32.mxu1 %vm743_vm2, %v6034_v26 }
 0x576   : > { %5120 = vmatmul.mubr.msk.f32.vlgmr.msra.gmra.mxu0 %vm743_vm2, %v6099_v36 }
 0x577   : > { %5122 = vmatprep.mubr.msk.f32.mxu0 %vm743_vm2, %v6106_v37 }
 0x57a   : > { %5123 = vmatmul.mubr.msk.f32.gmra.mxu0 %vm743_vm2, %v6115_v38 }
 0x57b   : > { %5147 = vmatprep.mubr.msk.f32.mxu0 %vm743_vm2, %v6041_v27 }
 0x62e   : > { %v5093_v29 = vpop.f32.mrf.mxu0 }
 0x62f   : > { %v1941_v16 = vadd.f32 %v5093_v29, %v6132_v55 }
 0x630   : > { %v1935_v30 = vpop.f32.mrf.mxu0  ;;  %v5107_v31 = vpop.f32.mrf.mxu1 }
 0x631   : > { %v1936_v27 = vadd.f32 %v1935_v30, %v6137_v58  ;;  %v2026_v41 = vadd.f32 %v5107_v31, %v6159_v8 }
 0x632   : > { %v5096_v32 = vpop.f32.mrf.mxu0  ;;  %v2020_v33 = vpop.f32.mrf.mxu1 }
 0x633   : > { %v1951_v34 = vadd.f32 %v5096_v32, %v6149_v3  ;;  %v2021_v7 = vadd.f32 %v6167_v12, %v2020_v33 }
 0x634   : > { %v1945_v26 = vpop.f32.mrf.mxu0  ;;  %v5110_v35 = vpop.f32.mrf.mxu1 }
 0x635   : > { %v1946_v36 = vadd.f32 %v1945_v26, %v6154_v6  ;;  %2134 = vrot.lane.b32.xlu0 %v1951_v34, %s5749_s22  ;;  %v2036_v28 = vadd.f32 %v5110_v35, %v6175_v17 }
 0x636   : > { %v5121_v37 = vpop.f32.mrf.mxu0  ;;  %v2030_v38 = vpop.f32.mrf.mxu1 }
 0x637   : > { %2132 = vrot.lane.b32.xlu1 %v1946_v36, %s5749_s22  ;;  %v2031_v3 = vadd.f32 %v6185_v25, %v2030_v38  ;;  %v2111_v10 = vadd.f32 %v5121_v37, %v6204_v13 }
 0x638   : > { %v2105_v23 = vpop.f32.mrf.mxu0 }
 0x639   : > { %2130 = vrot.lane.b32.xlu0 %v1941_v16, %s5749_s22  ;;  %v2106_v17 = vadd.f32 %v6210_v22, %v2105_v23 }
 0x63a   : > { %v5124_v44 = vpop.f32.mrf.mxu0 }
 0x63b   : > { %2128 = vrot.lane.b32.xlu1 %v1936_v27, %s5749_s22  ;;  %v2121_v55 = vadd.f32 %v5124_v44, %v6215_v24 }
 0x63c   : > { %v2115_v6 = vpop.f32.mrf.mxu0 }
 0x63d   : > { %2178 = vrot.lane.b32.xlu0 %v2036_v28, %s5749_s22  ;;  %v2116_v58 = vadd.f32 %v6225_v63, %v2115_v6 }
 0x63f   : > { %2176 = vrot.lane.b32.xlu1 %v2031_v3, %s5749_s22 }
 0x641   : > { %2174 = vrot.lane.b32.xlu0 %v2026_v41, %s5749_s22 }
 0x643   : > { %2172 = vrot.lane.b32.xlu1 %v2021_v7, %s5749_s22 }
 0x645   : > { %2222 = vrot.lane.b32.xlu0 %v2121_v55, %s5749_s22 }
 0x647   : > { %2220 = vrot.lane.b32.xlu1 %v2116_v58, %s5749_s22 }
 0x649   : > { %2218 = vrot.lane.b32.xlu0 %v2111_v10, %s5749_s22 }
 0x64b   : > { %2216 = vrot.lane.b32.xlu1 %v2106_v17, %s5749_s22  ;;  %s5755_s22 = smov 5  }
 0x64d   : > { %2254 = vrot.lane.b32.xlu0 %v6341_v14, %s5747_s20 }
 0x64f   : > { %2252 = vrot.lane.b32.xlu1 %v6343_v56, %s5747_s20 }
 0x651   : > { %2250 = vrot.lane.b32.xlu0 %v6346_v2, %s5747_s20 }
 0x653   : > { %2248 = vrot.lane.b32.xlu1 %v6349_v9, %s5747_s20 }
 0x6a7   : > { %v2135_v8 = vpop.permute.xlu0 %2134 }
 0x6a8   : > { %v2143_v12 = vadd.f32 %v2135_v8, %v6162_v11 }
 0x6a9   : > { %v2133_v25 = vpop.permute.xlu1 %2132 }
 0x6aa   : > { %v4531_v13 = vmul.f32 -1.442695, %v2143_v12  ;;  %v2142_v22 = vadd.f32 %v2133_v25, %v6170_v15 }
 0x6ab   : > { %v2131_v43 = vpop.permute.xlu0 %2130 }
 0x6ac   : > { %5449 = vpow2.f32 %v4531_v13  ;;  %v4530_v46 = vmul.f32 -1.442695, %v2142_v22  ;;  %v2141_v14 = vadd.f32 %v2131_v43, %v6139_v59 }
 0x6ad   : > { %v2129_v51 = vpop.permute.xlu1 %2128 }
 0x6ae   : > { %5451 = vpow2.f32 %v4530_v46  ;;  %v4529_v52 = vmul.f32 -1.442695, %v2141_v14  ;;  %v2140_v54 = vadd.f32 %v2129_v51, %v6142_v0 }
 0x6af   : > { %v2179_v21 = vpop.permute.xlu0 %2178 }
 0x6b0   : > { %5453 = vpow2.f32 %v4529_v52  ;;  %v4528_v56 = vmul.f32 -1.442695, %v2140_v54  ;;  %v2187_v40 = vadd.f32 %v2179_v21, %v6192_v47 }
 0x6b1   : > { %v2177_v60 = vpop.permute.xlu1 %2176 }
 0x6b2   : > { %5455 = vpow2.f32 %v4528_v56  ;;  %v4535_v61 = vmul.f32 -1.442695, %v2187_v40  ;;  %v2186_v62 = vadd.f32 %v2177_v60, %v6197_v57 }
 0x6b3   : > { %v2175_v1 = vpop.permute.xlu0 %2174 }
 0x6b4   : > { %v4534_v2 = vmul.f32 -1.442695, %v2186_v62  ;;  %v2185_v5 = vadd.f32 %v2175_v1, %v6187_v39  ;;  %5457 = vpow2.f32 %v4535_v61 }
 0x6b5   : > { %v2173_v48 = vpop.permute.xlu1 %2172 }
 0x6b6   : > { %v4533_v9 = vmul.f32 -1.442695, %v2185_v5  ;;  %v2184_v18 = vadd.f32 %v2173_v48, %v6190_v45  ;;  %5459 = vpow2.f32 %v4534_v2 }
 0x6b7   : > { %v2223_v16 = vpop.permute.xlu0 %2222 }
 0x6b8   : > { %v4532_v53 = vmul.f32 -1.442695, %v2184_v18  ;;  %5461 = vpow2.f32 %v4533_v9 }
 0x6b9   : > { %v5450_v20 = vpop.eup %5449  ;;  %v2221_v3 = vpop.permute.xlu1 %2220 }
 0x6ba   : > { %v2159_v50 = vadd.f32 1.0, %v5450_v20  ;;  %5463 = vpow2.f32 %v4532_v53 }
 0x6bb   : > { %v5452_v29 = vpop.eup %5451  ;;  %v2219_v10 = vpop.permute.xlu0 %2218 }
 0x6bc   : > { %5465 = vrcp.f32 %v2159_v50  ;;  %v2158_v30 = vadd.f32 1.0, %v5452_v29 }
 0x6bd   : > { %v5454_v31 = vpop.eup %5453  ;;  %v2217_v25 = vpop.permute.xlu1 %2216 }
 0x6be   : > { %5467 = vrcp.f32 %v2158_v30  ;;  %v2157_v32 = vadd.f32 1.0, %v5454_v31 }
 0x6bf   : > { %v5456_v33 = vpop.eup %5455  ;;  %v2255_v51 = vpop.permute.xlu0 %2254 }
 0x6c0   : > { %5469 = vrcp.f32 %v2157_v32  ;;  %v2156_v34 = vadd.f32 1.0, %v5456_v33 }
 0x6c1   : > { %v5458_v26 = vpop.eup %5457  ;;  %v2253_v56 = vpop.permute.xlu1 %2252 }
 0x6c2   : > { %5471 = vrcp.f32 %v2156_v34  ;;  %v2203_v37 = vadd.f32 1.0, %v5458_v26 }
 0x6c3   : > { %v5460_v35 = vpop.eup %5459  ;;  %v2251_v53 = vpop.permute.xlu0 %2250 }
 0x6c4   : > { %v2202_v23 = vadd.f32 1.0, %v5460_v35  ;;  %5473 = vrcp.f32 %v2203_v37 }
 0x6c5   : > { %v5462_v36 = vpop.eup %5461  ;;  %v2249_v32 = vpop.permute.xlu1 %2248 }
 0x6c6   : > { %v2201_v28 = vadd.f32 1.0, %v5462_v36  ;;  %5475 = vrcp.f32 %v2202_v23  ;;  %v6424_v23 = vld [vmem:[%s7022_s6 + $0x8] sm:$0xff] }
 0x6c7   : > { %v5464_v38 = vpop.eup %5463 }
 0x6c8   : > { %v2200_v6 = vadd.f32 1.0, %v5464_v38  ;;  %5477 = vrcp.f32 %v2201_v28  ;;  %v6438_v28 = vld [vmem:[%s7022_s6 + $0x28] sm:$0xff] }
 0x6c9   : > { %v5466_v27 = vpop.eup %5465 }
 0x6ca   : > { %v2231_v44 = vmul.f32 %v5466_v27, %v2223_v16  ;;  %v6431_v27 = vld [vmem:[%s7022_s6 + $0x10] sm:$0xff] }
 0x6cb   : > { %v5468_v41 = vpop.eup %5467 }
 0x6cc   : > { %v2235_v7 = vadd.f32 %v2231_v44, %v6232_v49  ;;  %v2230_v55 = vmul.f32 %v5468_v41, %v2221_v3  ;;  %v6445_v3 = vld [vmem:[%s7022_s6 + $0x30] sm:$0xff]  ;;  %v6452_v44 = vld [vmem:[%s7022_s6 + $0x18] sm:$0xff]  ;;  %v6459_v41 = vld [vmem:[%s7022_s6 + $0x40] sm:$0xff] }
 0x6cd   : > { %v5470_v58 = vpop.eup %5469 }
 0x6ce   : > { %5479 = vtanh.f32 %v2235_v7  ;;  %v2234_v17 = vadd.f32 %v2230_v55, %v6237_v19  ;;  %v2229_v8 = vmul.f32 %v5470_v58, %v2219_v10  ;;  %v6473_v7 = vld [vmem:[%s7022_s6] sm:$0xff]  ;;  %v6480_v55 = vld [vmem:[%s7022_s6 + $0x48] sm:$0xff]  ;;  %v6487_v58 = vld [vmem:[%s7022_s6 + $0x50] sm:$0xff] }
 0x6cf   : > { %v5472_v12 = vpop.eup %5471  ;;  %5481 = vrcp.f32 %v2200_v6  ;;  %v6466_v6 = vld [vmem:[%s7022_s6 + $0x38] sm:$0xff] }
 0x6d0   : > { %5483 = vtanh.f32 %v2234_v17  ;;  %v2233_v13 = vadd.f32 %v2229_v8, %v6220_v42  ;;  %v2228_v22 = vmul.f32 %v5472_v12, %v2217_v25  ;;  %v6494_v10 = vld [vmem:[%s7022_s6 + $0x58] sm:$0xff]  ;;  %v6501_v17 = vld [vmem:[%s7022_s6 + $0x20] sm:$0xff] }
 0x6d1   : > { %v5474_v46 = vpop.eup %5473 }
 0x6d2   : > { %5485 = vtanh.f32 %v2233_v13  ;;  %v2232_v43 = vadd.f32 %v2228_v22, %v6228_v4  ;;  %v2243_v54 = vsub.f32 1.0, %v5474_v46  ;;  %v2263_v61 = vmul.f32 %v5474_v46, %v2255_v51 }
 0x6d3   : > { %v5476_v14 = vpop.eup %5475 }
 0x6d4   : > { %5487 = vtanh.f32 %v2232_v43  ;;  %v2242_v62 = vsub.f32 1.0, %v5476_v14  ;;  %v2262_v48 = vmul.f32 %v5476_v14, %v2253_v56  ;;  %v6508_v43 = vld [vmem:[%s7024_s8 + $0x18] sm:$0xff]  ;;  %v6521_v56 = vld [vmem:[%s7024_s8 + $0x8] sm:$0xff] }
 0x6d5   : > { %v5478_v52 = vpop.eup %5477 }
 0x6d6   : > { %v2241_v9 = vsub.f32 1.0, %v5478_v52  ;;  %v2261_v29 = vmul.f32 %v5478_v52, %v2251_v53  ;;  %v6514_v52 = vld [vmem:[%s7024_s8 + $0x10] sm:$0xff] }
 0x6db   : > { %v5480_v21 = vpop.eup %5479 }
 0x6dc   : > { %v5482_v40 = vpop.eup %5481  ;;  %v2247_v60 = vmul.f32 %v5480_v21, %v2243_v54 }
 0x6dd   : > { %v5484_v1 = vpop.eup %5483  ;;  %v2240_v30 = vsub.f32 1.0, %v5482_v40  ;;  %v2260_v26 = vmul.f32 %v5482_v40, %v2249_v32 }
 0x6de   : > { %v6409_v2 = vadd.f32 %v2263_v61, %v2247_v60  ;;  %v2246_v5 = vmul.f32 %v5484_v1, %v2242_v62  ;;  %v6528_v62 = vld [vmem:[%s7024_s8] sm:$0xff] }
 0x6df   : > { %v5486_v18 = vpop.eup %5485 }
 0x6e0   : > { %v6411_v20 = vadd.f32 %v2262_v48, %v2246_v5  ;;  %v2245_v50 = vmul.f32 %v5486_v18, %v2241_v9  ;;  %2278 = vrot.lane.b32.xlu0 %v6409_v2, %s5750_s23  ;;  %v6535_v5 = vld [vmem:[%s7024_s8 + $0x38] sm:$0xff]  ;;  %v6542_v9 = vld [vmem:[%s7024_s8 + $0x30] sm:$0xff] }
 0x6e1   : > { %v5488_v31 = vpop.eup %5487 }
 0x6e2   : > { %v6414_v33 = vadd.f32 %v2261_v29, %v2245_v50  ;;  %v2244_v34 = vmul.f32 %v5488_v31, %v2240_v30  ;;  %2276 = vrot.lane.b32.xlu1 %v6411_v20, %s5750_s23  ;;  %v6548_v50 = vld [vmem:[%s7024_s8 + $0x28] sm:$0xff]  ;;  %v6556_v31 = vld [vmem:[%s7024_s8 + $0x20] sm:$0xff] }
 0x6e4   : > { %v6417_v35 = vadd.f32 %v2260_v26, %v2244_v34  ;;  %2274 = vrot.lane.b32.xlu0 %v6414_v33, %s5750_s23 }
 0x6e6   : > { %2272 = vrot.lane.b32.xlu1 %v6417_v35, %s5750_s23  ;;  %s5756_s23 = smov 123  }
 0x752   : > { %v2279_v36 = vpop.permute.xlu0 %2278 }
 0x753   : > { %5125 = vmatprep.subr.mxu1 %v2279_v36  ;;  %5139 = vmatprep.subr.mxu0 %v2279_v36 }
 0x754   : > { %5126 = vmatpush3.msra.mxu1 %v2279_v36  ;;  %5140 = vmatpush3.msra.mxu0 %v2279_v36  ;;  %v2277_v37 = vpop.permute.xlu1 %2276 }
 0x755   : > { %5127 = vmatprep.subr.mxu1 %v2277_v37  ;;  %5141 = vmatprep.subr.mxu0 %v2277_v37 }
 0x756   : > { %v2275_v16 = vpop.permute.xlu0 %2274  ;;  %5128 = vmatpush3.msra.mxu1 %v2277_v37  ;;  %5142 = vmatpush3.msra.mxu0 %v2277_v37 }
 0x757   : > { %5129 = vmatprep.subr.mxu1 %v2275_v16  ;;  %5143 = vmatprep.subr.mxu0 %v2275_v16 }
 0x758   : > { %5130 = vmatpush3.msra.mxu1 %v2275_v16  ;;  %5144 = vmatpush3.msra.mxu0 %v2275_v16  ;;  %v2273_v38 = vpop.permute.xlu1 %2272 }
 0x759   : > { %5131 = vmatprep.subr.mxu1 %v2273_v38  ;;  %5145 = vmatprep.subr.mxu0 %v2273_v38 }
 0x75a   : > { %5132 = vmatpush3.msra.mxu1 %v2273_v38  ;;  %5146 = vmatpush3.msra.mxu0 %v2273_v38 }
 0x75b   : > { %5134 = vmatmul.mubr.msk.f32.vlgmr.msra.gmra.mxu1 %vm743_vm2, %v6424_v23  ;;  %5153 = vmatprep.subr.mxu1 %v2279_v36 }
 0x75c   : > { %5154 = vmatpush3.msra.mxu1 %v2279_v36  ;;  %5136 = vmatprep.mubr.msk.f32.mxu1 %vm743_vm2, %v6431_v27  ;;  %v6566_v36 = vld [vmem:[%s7024_s8 + $0x48] sm:$0xff] }
 0x75d   : > { %5155 = vmatprep.subr.mxu1 %v2277_v37  ;;  %5148 = vmatmul.mubr.msk.f32.vlgmr.msra.gmra.mxu0 %vm743_vm2, %v6438_v28 }
 0x75e   : > { %5156 = vmatpush3.msra.mxu1 %v2277_v37  ;;  %5150 = vmatprep.mubr.msk.f32.mxu0 %vm743_vm2, %v6445_v3 }
 0x75f   : > { %5137 = vmatmul.mubr.msk.f32.gmra.mxu1 %vm743_vm2, %v6452_v44  ;;  %5157 = vmatprep.subr.mxu1 %v2275_v16 }
 0x760   : > { %5158 = vmatpush3.msra.mxu1 %v2275_v16  ;;  %5161 = vmatprep.mubr.msk.f32.mxu1 %vm743_vm2, %v6459_v41  ;;  %v6573_v16 = vld [vmem:[%s7024_s8 + $0x40] sm:$0xff] }
 0x761   : > { %5159 = vmatprep.subr.mxu1 %v2273_v38  ;;  %5151 = vmatmul.mubr.msk.f32.gmra.mxu0 %vm743_vm2, %v6466_v6 }
 0x762   : > { %5160 = vmatpush3.msra.mxu1 %v2273_v38  ;;  %5175 = vmatprep.mubr.msk.f32.mxu0 %vm743_vm2, %v6473_v7 }
 0x763   : > { %5162 = vmatmul.mubr.msk.f32.vlgmr.msra.gmra.mxu1 %vm743_vm2, %v6480_v55 }
 0x764   : > { %5164 = vmatprep.mubr.msk.f32.mxu1 %vm743_vm2, %v6487_v58 }
 0x767   : > { %5165 = vmatmul.mubr.msk.f32.gmra.mxu1 %vm743_vm2, %v6494_v10 }
 0x768   : > { %5189 = vmatprep.mubr.msk.f32.mxu1 %vm743_vm2, %v6501_v17 }
 0x81b   : > { %v5135_v8 = vpop.f32.mrf.mxu1 }
 0x81c   : > { %v2356_v40 = vadd.f32 %v6521_v56, %v5135_v8 }
 0x81d   : > { %v2350_v12 = vpop.f32.mrf.mxu1  ;;  %v5149_v25 = vpop.f32.mrf.mxu0 }
 0x81e   : > { %v2351_v1 = vadd.f32 %v6528_v62, %v2350_v12  ;;  %v2441_v29 = vadd.f32 %v6548_v50, %v5149_v25 }
 0x81f   : > { %v5138_v13 = vpop.f32.mrf.mxu1  ;;  %v2435_v22 = vpop.f32.mrf.mxu0 }
 0x820   : > { %v2366_v46 = vadd.f32 %v6508_v43, %v5138_v13  ;;  %v2436_v32 = vadd.f32 %v6556_v31, %v2435_v22 }
 0x821   : > { %v2360_v14 = vpop.f32.mrf.mxu1  ;;  %v5152_v51 = vpop.f32.mrf.mxu0 }
 0x822   : > { %v2361_v54 = vadd.f32 %v6514_v52, %v2360_v14  ;;  %2549 = vrot.lane.b32.xlu0 %v2366_v46, %s5751_s15  ;;  %v2451_v48 = vadd.f32 %v6535_v5, %v5152_v51 }
 0x823   : > { %v5163_v21 = vpop.f32.mrf.mxu1  ;;  %v2445_v60 = vpop.f32.mrf.mxu0 }
 0x824   : > { %2547 = vrot.lane.b32.xlu1 %v2361_v54, %s5751_s15  ;;  %v2446_v18 = vadd.f32 %v6542_v9, %v2445_v60  ;;  %v2526_v37 = vadd.f32 %v6566_v36, %v5163_v21 }
 0x825   : > { %v2520_v61 = vpop.f32.mrf.mxu1 }
 0x826   : > { %2545 = vrot.lane.b32.xlu0 %v2356_v40, %s5751_s15 }
 0x827   : > { %v5166_v53 = vpop.f32.mrf.mxu1 }
 0x828   : > { %2543 = vrot.lane.b32.xlu1 %v2351_v1, %s5751_s15  ;;  %v2536_v34 = vadd.f32 %v5166_v53, %v6215_v24  ;;  %v2521_v24 = vadd.f32 %v6573_v16, %v2520_v61 }
 0x829   : > { %v2530_v30 = vpop.f32.mrf.mxu1 }
 0x82a   : > { %2593 = vrot.lane.b32.xlu0 %v2451_v48, %s5751_s15  ;;  %v2531_v26 = vadd.f32 %v6225_v63, %v2530_v30 }
 0x82c   : > { %2591 = vrot.lane.b32.xlu1 %v2446_v18, %s5751_s15 }
 0x82e   : > { %2589 = vrot.lane.b32.xlu0 %v2441_v29, %s5751_s15 }
 0x830   : > { %2587 = vrot.lane.b32.xlu1 %v2436_v32, %s5751_s15 }
 0x832   : > { %2637 = vrot.lane.b32.xlu0 %v2536_v34, %s5751_s15 }
 0x834   : > { %2635 = vrot.lane.b32.xlu1 %v2531_v26, %s5751_s15 }
 0x836   : > { %2633 = vrot.lane.b32.xlu0 %v2526_v37, %s5751_s15 }
 0x838   : > { %2631 = vrot.lane.b32.xlu1 %v2521_v24, %s5751_s15  ;;  %s5753_s15 = smov 4  }
 0x83a   : > { %2669 = vrot.lane.b32.xlu0 %v6409_v2, %s5747_s20 }
 0x83c   : > { %2667 = vrot.lane.b32.xlu1 %v6411_v20, %s5747_s20 }
 0x83e   : > { %2665 = vrot.lane.b32.xlu0 %v6414_v33, %s5747_s20 }
 0x840   : > { %2663 = vrot.lane.b32.xlu1 %v6417_v35, %s5747_s20 }
 0x894   : > { %v2550_v63 = vpop.permute.xlu0 %2549 }
 0x895   : > { %v2558_v38 = vadd.f32 %v2550_v63, %v6162_v11 }
 0x896   : > { %v2548_v8 = vpop.permute.xlu1 %2547 }
 0x897   : > { %v4551_v12 = vmul.f32 -1.442695, %v2558_v38  ;;  %v2557_v25 = vadd.f32 %v2548_v8, %v6170_v15 }
 0x898   : > { %v2546_v13 = vpop.permute.xlu0 %2545 }
 0x899   : > { %5489 = vpow2.f32 %v4551_v12  ;;  %v4550_v22 = vmul.f32 -1.442695, %v2557_v25  ;;  %v2556_v2 = vadd.f32 %v2546_v13, %v6139_v59 }
 0x89a   : > { %v2544_v46 = vpop.permute.xlu1 %2543 }
 0x89b   : > { %5491 = vpow2.f32 %v4550_v22  ;;  %v4549_v20 = vmul.f32 -1.442695, %v2556_v2  ;;  %v2555_v33 = vadd.f32 %v2544_v46, %v6142_v0 }
 0x89c   : > { %v2594_v14 = vpop.permute.xlu0 %2593 }
 0x89d   : > { %5493 = vpow2.f32 %v4549_v20  ;;  %v4548_v35 = vmul.f32 -1.442695, %v2555_v33  ;;  %v2602_v51 = vadd.f32 %v2594_v14, %v6192_v47 }
 0x89e   : > { %v2592_v54 = vpop.permute.xlu1 %2591 }
 0x89f   : > { %5495 = vpow2.f32 %v4548_v35  ;;  %v4555_v21 = vmul.f32 -1.442695, %v2602_v51  ;;  %v2601_v40 = vadd.f32 %v2592_v54, %v6197_v57 }
 0x8a0   : > { %v2590_v60 = vpop.permute.xlu0 %2589 }
 0x8a1   : > { %v4554_v61 = vmul.f32 -1.442695, %v2601_v40  ;;  %v2600_v1 = vadd.f32 %v2590_v60, %v6187_v39  ;;  %5497 = vpow2.f32 %v4555_v21 }
 0x8a2   : > { %v2588_v48 = vpop.permute.xlu1 %2587 }
 0x8a3   : > { %v4553_v18 = vmul.f32 -1.442695, %v2600_v1  ;;  %v2599_v53 = vadd.f32 %v2588_v48, %v6190_v45  ;;  %5499 = vpow2.f32 %v4554_v61 }
 0x8a4   : > { %v2638_v22 = vpop.permute.xlu0 %2637 }
 0x8a5   : > { %v4552_v29 = vmul.f32 -1.442695, %v2599_v53  ;;  %5501 = vpow2.f32 %v4553_v18 }
 0x8a6   : > { %v5490_v30 = vpop.eup %5489  ;;  %v2636_v14 = vpop.permute.xlu1 %2635 }
 0x8a7   : > { %v2574_v32 = vadd.f32 1.0, %v5490_v30  ;;  %5503 = vpow2.f32 %v4552_v29 }
 0x8a8   : > { %v5492_v34 = vpop.eup %5491  ;;  %v2634_v61 = vpop.permute.xlu0 %2633 }
 0x8a9   : > { %5505 = vrcp.f32 %v2574_v32  ;;  %v2573_v26 = vadd.f32 1.0, %v5492_v34 }
 0x8aa   : > { %v5494_v37 = vpop.eup %5493  ;;  %v2632_v53 = vpop.permute.xlu1 %2631 }
 0x8ab   : > { %5507 = vrcp.f32 %v2573_v26  ;;  %v2572_v24 = vadd.f32 1.0, %v5494_v37 }
 0x8ac   : > { %v5496_v63 = vpop.eup %5495  ;;  %v2670_v37 = vpop.permute.xlu0 %2669 }
 0x8ad   : > { %5509 = vrcp.f32 %v2572_v24  ;;  %v2571_v38 = vadd.f32 1.0, %v5496_v63 }
 0x8ae   : > { %v5498_v8 = vpop.eup %5497 }
 0x8af   : > { %5511 = vrcp.f32 %v2571_v38  ;;  %v2618_v13 = vadd.f32 1.0, %v5498_v8  ;;  %v2668_v8 = vpop.permute.xlu1 %2667 }
 0x8b0   : > { %v5500_v12 = vpop.eup %5499 }
 0x8b1   : > { %v2617_v46 = vadd.f32 1.0, %v5500_v12  ;;  %5513 = vrcp.f32 %v2618_v13 }
 0x8b2   : > { %v5502_v25 = vpop.eup %5501 }
 0x8b3   : > { %v2616_v33 = vadd.f32 1.0, %v5502_v25  ;;  %5515 = vrcp.f32 %v2617_v46 }
 0x8b4   : > { %v5504_v2 = vpop.eup %5503 }
 0x8b5   : > { %v2615_v54 = vadd.f32 1.0, %v5504_v2  ;;  %5517 = vrcp.f32 %v2616_v33 }
 0x8b6   : > { %v5506_v20 = vpop.eup %5505 }
 0x8b7   : > { %v2646_v35 = vmul.f32 %v5506_v20, %v2638_v22 }
 0x8b8   : > { %v5508_v51 = vpop.eup %5507 }
 0x8b9   : > { %v2650_v21 = vadd.f32 %v2646_v35, %v6232_v49  ;;  %v2645_v40 = vmul.f32 %v5508_v51, %v2636_v14  ;;  %v2666_v51 = vpop.permute.xlu0 %2665 }
 0x8ba   : > { %v5510_v60 = vpop.eup %5509 }
 0x8bb   : > { %5519 = vtanh.f32 %v2650_v21  ;;  %v2649_v1 = vadd.f32 %v2645_v40, %v6237_v19  ;;  %v2644_v48 = vmul.f32 %v5510_v60, %v2634_v61 }
 0x8bc   : > { %v5512_v18 = vpop.eup %5511  ;;  %5521 = vrcp.f32 %v2615_v54 }
 0x8bd   : > { %5523 = vtanh.f32 %v2649_v1  ;;  %v2648_v29 = vadd.f32 %v2644_v48, %v6220_v42  ;;  %v2643_v30 = vmul.f32 %v5512_v18, %v2632_v53  ;;  %v2664_v1 = vpop.permute.xlu1 %2663 }
 0x8be   : > { %v5514_v34 = vpop.eup %5513 }
 0x8bf   : > { %5525 = vtanh.f32 %v2648_v29  ;;  %v2647_v32 = vadd.f32 %v2643_v30, %v6228_v4  ;;  %v2658_v63 = vsub.f32 1.0, %v5514_v34  ;;  %v2678_v13 = vmul.f32 %v5514_v34, %v2670_v37 }
 0x8c0   : > { %v5516_v26 = vpop.eup %5515 }
 0x8c1   : > { %5527 = vtanh.f32 %v2647_v32  ;;  %v2657_v22 = vsub.f32 1.0, %v5516_v26  ;;  %v2677_v33 = vmul.f32 %v5516_v26, %v2668_v8 }
 0x8c2   : > { %v5518_v24 = vpop.eup %5517 }
 0x8c3   : > { %v2656_v14 = vsub.f32 1.0, %v5518_v24  ;;  %v2676_v40 = vmul.f32 %v5518_v24, %v2666_v51 }
 0x8c8   : > { %v5520_v38 = vpop.eup %5519 }
 0x8c9   : > { %v5522_v12 = vpop.eup %5521  ;;  %v2662_v25 = vmul.f32 %v5520_v38, %v2658_v63 }
 0x8ca   : > { %v5524_v2 = vpop.eup %5523  ;;  %v2655_v60 = vsub.f32 1.0, %v5522_v12  ;;  %v2675_v53 = vmul.f32 %v5522_v12, %v2664_v1 }
 0x8cb   : > { %v6599_v46 = vadd.f32 %v2678_v13, %v2662_v25  ;;  %v2661_v20 = vmul.f32 %v5524_v2, %v2657_v22 }
 0x8cc   : > { %v5526_v35 = vpop.eup %5525 }
 0x8cd   : > { %v6601_v54 = vadd.f32 %v2677_v33, %v2661_v20  ;;  %v2660_v21 = vmul.f32 %v5526_v35, %v2656_v14  ;;  %2693 = vrot.lane.b32.xlu0 %v6599_v46, %s5752_s14 }
 0x8ce   : > { %v5528_v61 = vpop.eup %5527 }
 0x8cf   : > { %v6604_v48 = vadd.f32 %v2676_v40, %v2660_v21  ;;  %v2659_v18 = vmul.f32 %v5528_v61, %v2655_v60  ;;  %2691 = vrot.lane.b32.xlu1 %v6601_v54, %s5752_s14 }
 0x8d1   : > { %v6607_v29 = vadd.f32 %v2675_v53, %v2659_v18  ;;  %2689 = vrot.lane.b32.xlu0 %v6604_v48, %s5752_s14  ;;  %v6646_v18 = vld [vmem:[%s7024_s8 + $0x58] sm:$0xff] }
 0x8d3   : > { %2687 = vrot.lane.b32.xlu1 %v6607_v29, %s5752_s14  ;;  %s5758_s14 = smov 122  }
 0x93f   : > { %v2694_v30 = vpop.permute.xlu0 %2693 }
 0x940   : > { %5167 = vmatprep.subr.mxu0 %v2694_v30  ;;  %5181 = vmatprep.subr.mxu1 %v2694_v30 }
 0x941   : > { %5168 = vmatpush3.msra.mxu0 %v2694_v30  ;;  %5182 = vmatpush3.msra.mxu1 %v2694_v30  ;;  %v2692_v32 = vpop.permute.xlu1 %2691 }
 0x942   : > { %5169 = vmatprep.subr.mxu0 %v2692_v32  ;;  %5183 = vmatprep.subr.mxu1 %v2692_v32 }
 0x943   : > { %v2690_v34 = vpop.permute.xlu0 %2689  ;;  %5170 = vmatpush3.msra.mxu0 %v2692_v32  ;;  %5184 = vmatpush3.msra.mxu1 %v2692_v32 }
 0x944   : > { %5171 = vmatprep.subr.mxu0 %v2690_v34  ;;  %5185 = vmatprep.subr.mxu1 %v2690_v34 }
 0x945   : > { %5172 = vmatpush3.msra.mxu0 %v2690_v34  ;;  %5186 = vmatpush3.msra.mxu1 %v2690_v34  ;;  %v2688_v26 = vpop.permute.xlu1 %2687 }
 0x946   : > { %5173 = vmatprep.subr.mxu0 %v2688_v26  ;;  %5187 = vmatprep.subr.mxu1 %v2688_v26 }
 0x947   : > { %5174 = vmatpush3.msra.mxu0 %v2688_v26  ;;  %5188 = vmatpush3.msra.mxu1 %v2688_v26 }
 0x948   : > { %5176 = vmatmul.mubr.msk.f32.vlgmr.msra.gmra.mxu0 %vm743_vm2, %v6424_v23  ;;  %5195 = vmatprep.subr.mxu0 %v2694_v30 }
 0x949   : > { %5196 = vmatpush3.msra.mxu0 %v2694_v30  ;;  %5178 = vmatprep.mubr.msk.f32.mxu0 %vm743_vm2, %v6431_v27  ;;  %v6652_v30 = vld [vmem:[%s7024_s8 + $0x50] sm:$0xff] }
 0x94a   : > { %5197 = vmatprep.subr.mxu0 %v2692_v32  ;;  %5190 = vmatmul.mubr.msk.f32.vlgmr.msra.gmra.mxu1 %vm743_vm2, %v6438_v28 }
 0x94b   : > { %5198 = vmatpush3.msra.mxu0 %v2692_v32  ;;  %5192 = vmatprep.mubr.msk.f32.mxu1 %vm743_vm2, %v6445_v3 }
 0x94c   : > { %5179 = vmatmul.mubr.msk.f32.gmra.mxu0 %vm743_vm2, %v6452_v44  ;;  %5199 = vmatprep.subr.mxu0 %v2690_v34 }
 0x94d   : > { %5200 = vmatpush3.msra.mxu0 %v2690_v34  ;;  %5203 = vmatprep.mubr.msk.f32.mxu0 %vm743_vm2, %v6459_v41 }
 0x94e   : > { %5201 = vmatprep.subr.mxu0 %v2688_v26  ;;  %5193 = vmatmul.mubr.msk.f32.gmra.mxu1 %vm743_vm2, %v6466_v6 }
 0x94f   : > { %5202 = vmatpush3.msra.mxu0 %v2688_v26  ;;  %5217 = vmatprep.mubr.msk.f32.mxu1 %vm743_vm2, %v6473_v7 }
 0x950   : > { %5204 = vmatmul.mubr.msk.f32.vlgmr.msra.gmra.mxu0 %vm743_vm2, %v6480_v55 }
 0x951   : > { %5206 = vmatprep.mubr.msk.f32.mxu0 %vm743_vm2, %v6487_v58 }
 0x954   : > { %5207 = vmatmul.mubr.msk.f32.gmra.mxu0 %vm743_vm2, %v6494_v10 }
 0x955   : > { %5231 = vmatprep.mubr.msk.f32.mxu0 %vm743_vm2, %v6501_v17 }
 0xa08   : > { %v5177_v37 = vpop.f32.mrf.mxu0 }
 0xa09   : > { %v2771_v20 = vadd.f32 %v6521_v56, %v5177_v37 }
 0xa0a   : > { %v2765_v24 = vpop.f32.mrf.mxu0  ;;  %v5191_v63 = vpop.f32.mrf.mxu1 }
 0xa0b   : > { %v2766_v35 = vadd.f32 %v6528_v62, %v2765_v24  ;;  %v2856_v60 = vadd.f32 %v6548_v50, %v5191_v63 }
 0xa0c   : > { %v5180_v38 = vpop.f32.mrf.mxu0  ;;  %v2850_v8 = vpop.f32.mrf.mxu1 }
 0xa0d   : > { %v2781_v12 = vadd.f32 %v6508_v43, %v5180_v38  ;;  %v2851_v1 = vadd.f32 %v6556_v31, %v2850_v8 }
 0xa0e   : > { %v2775_v25 = vpop.f32.mrf.mxu0  ;;  %v5194_v13 = vpop.f32.mrf.mxu1 }
 0xa0f   : > { %v2776_v22 = vadd.f32 %v6514_v52, %v2775_v25  ;;  %2964 = vrot.lane.b32.xlu0 %v2781_v12, %s5753_s15  ;;  %v2866_v51 = vadd.f32 %v6535_v5, %v5194_v13 }
 0xa10   : > { %v5205_v2 = vpop.f32.mrf.mxu0  ;;  %v2860_v33 = vpop.f32.mrf.mxu1 }
 0xa11   : > { %2962 = vrot.lane.b32.xlu1 %v2776_v22, %s5753_s15  ;;  %v2861_v21 = vadd.f32 %v6542_v9, %v2860_v33  ;;  %v2941_v34 = vadd.f32 %v6566_v36, %v5205_v2 }
 0xa12   : > { %v2935_v14 = vpop.f32.mrf.mxu0 }
 0xa13   : > { %2960 = vrot.lane.b32.xlu0 %v2771_v20, %s5753_s15  ;;  %v2936_v26 = vadd.f32 %v6573_v16, %v2935_v14 }
 0xa14   : > { %v5208_v40 = vpop.f32.mrf.mxu0 }
 0xa15   : > { %2958 = vrot.lane.b32.xlu1 %v2766_v35, %s5753_s15  ;;  %v2951_v53 = vadd.f32 %v6646_v18, %v5208_v40 }
 0xa16   : > { %v2945_v61 = vpop.f32.mrf.mxu0 }
 0xa17   : > { %3008 = vrot.lane.b32.xlu0 %v2866_v51, %s5753_s15  ;;  %v2946_v32 = vadd.f32 %v6652_v30, %v2945_v61 }
 0xa19   : > { %3006 = vrot.lane.b32.xlu1 %v2861_v21, %s5753_s15 }
 0xa1b   : > { %3004 = vrot.lane.b32.xlu0 %v2856_v60, %s5753_s15 }
 0xa1d   : > { %3002 = vrot.lane.b32.xlu1 %v2851_v1, %s5753_s15 }
 0xa1f   : > { %3052 = vrot.lane.b32.xlu0 %v2951_v53, %s5753_s15 }
 0xa21   : > { %3050 = vrot.lane.b32.xlu1 %v2946_v32, %s5753_s15 }
 0xa23   : > { %3048 = vrot.lane.b32.xlu0 %v2941_v34, %s5753_s15 }
 0xa25   : > { %3046 = vrot.lane.b32.xlu1 %v2936_v26, %s5753_s15  ;;  %s5757_s15 = smov 6  }
 0xa27   : > { %3084 = vrot.lane.b32.xlu0 %v6599_v46, %s5747_s20 }
 0xa29   : > { %3082 = vrot.lane.b32.xlu1 %v6601_v54, %s5747_s20 }
 0xa2b   : > { %3080 = vrot.lane.b32.xlu0 %v6604_v48, %s5747_s20 }
 0xa2d   : > { %3078 = vrot.lane.b32.xlu1 %v6607_v29, %s5747_s20 }
 0xa81   : > { %v2965_v37 = vpop.permute.xlu0 %2964 }
 0xa82   : > { %v2973_v24 = vadd.f32 %v2965_v37, %v6162_v11 }
 0xa83   : > { %v2963_v63 = vpop.permute.xlu1 %2962 }
 0xa84   : > { %v4571_v38 = vmul.f32 -1.442695, %v2973_v24  ;;  %v2972_v8 = vadd.f32 %v2963_v63, %v6170_v15 }
 0xa85   : > { %v2961_v12 = vpop.permute.xlu0 %2960 }
 0xa86   : > { %5529 = vpow2.f32 %v4571_v38  ;;  %v4570_v25 = vmul.f32 -1.442695, %v2972_v8  ;;  %v2971_v46 = vadd.f32 %v2961_v12, %v6139_v59 }
 0xa87   : > { %v2959_v13 = vpop.permute.xlu1 %2958 }
 0xa88   : > { %5531 = vpow2.f32 %v4570_v25  ;;  %v4569_v54 = vmul.f32 -1.442695, %v2971_v46  ;;  %v2970_v48 = vadd.f32 %v2959_v13, %v6142_v0 }
 0xa89   : > { %v3009_v22 = vpop.permute.xlu0 %3008 }
 0xa8a   : > { %5533 = vpow2.f32 %v4569_v54  ;;  %v4568_v29 = vmul.f32 -1.442695, %v2970_v48  ;;  %v3017_v2 = vadd.f32 %v3009_v22, %v6192_v47 }
 0xa8b   : > { %v3007_v20 = vpop.permute.xlu1 %3006 }
 0xa8c   : > { %5535 = vpow2.f32 %v4568_v29  ;;  %v4575_v33 = vmul.f32 -1.442695, %v3017_v2  ;;  %v3016_v14 = vadd.f32 %v3007_v20, %v6197_v57 }
 0xa8d   : > { %v3005_v35 = vpop.permute.xlu0 %3004 }
 0xa8e   : > { %v4574_v51 = vmul.f32 -1.442695, %v3016_v14  ;;  %v3015_v21 = vadd.f32 %v3005_v35, %v6187_v39  ;;  %5537 = vpow2.f32 %v4575_v33 }
 0xa8f   : > { %v3003_v40 = vpop.permute.xlu1 %3002 }
 0xa90   : > { %v4573_v60 = vmul.f32 -1.442695, %v3015_v21  ;;  %v3014_v61 = vadd.f32 %v3003_v40, %v6190_v45  ;;  %5539 = vpow2.f32 %v4574_v51 }
 0xa91   : > { %v3053_v13 = vpop.permute.xlu0 %3052 }
 0xa92   : > { %v4572_v1 = vmul.f32 -1.442695, %v3014_v61  ;;  %5541 = vpow2.f32 %v4573_v60 }
 0xa93   : > { %v5530_v53 = vpop.eup %5529  ;;  %v3051_v2 = vpop.permute.xlu1 %3050 }
 0xa94   : > { %v2989_v32 = vadd.f32 1.0, %v5530_v53  ;;  %5543 = vpow2.f32 %v4572_v1 }
 0xa95   : > { %v5532_v34 = vpop.eup %5531  ;;  %v3049_v40 = vpop.permute.xlu0 %3048 }
 0xa96   : > { %5545 = vrcp.f32 %v2989_v32  ;;  %v2988_v26 = vadd.f32 1.0, %v5532_v34 }
 0xa97   : > { %v5534_v37 = vpop.eup %5533  ;;  %v3047_v53 = vpop.permute.xlu1 %3046 }
 0xa98   : > { %5547 = vrcp.f32 %v2988_v26  ;;  %v2987_v24 = vadd.f32 1.0, %v5534_v37 }
 0xa99   : > { %v5536_v63 = vpop.eup %5535 }
 0xa9a   : > { %5549 = vrcp.f32 %v2987_v24  ;;  %v2986_v38 = vadd.f32 1.0, %v5536_v63  ;;  %v3085_v63 = vpop.permute.xlu0 %3084 }
 0xa9b   : > { %v5538_v8 = vpop.eup %5537 }
 0xa9c   : > { %5551 = vrcp.f32 %v2986_v38  ;;  %v3033_v46 = vadd.f32 1.0, %v5538_v8 }
 0xa9d   : > { %v5540_v12 = vpop.eup %5539 }
 0xa9e   : > { %v3032_v48 = vadd.f32 1.0, %v5540_v12  ;;  %5553 = vrcp.f32 %v3033_v46 }
 0xa9f   : > { %v5542_v25 = vpop.eup %5541 }
 0xaa0   : > { %v3031_v29 = vadd.f32 1.0, %v5542_v25  ;;  %5555 = vrcp.f32 %v3032_v48  ;;  %v3083_v25 = vpop.permute.xlu1 %3082 }
 0xaa1   : > { %v5544_v54 = vpop.eup %5543 }
 0xaa2   : > { %v3030_v14 = vadd.f32 1.0, %v5544_v54  ;;  %5557 = vrcp.f32 %v3031_v29 }
 0xaa3   : > { %v5546_v22 = vpop.eup %5545 }
 0xaa4   : > { %v3061_v20 = vmul.f32 %v5546_v22, %v3053_v13 }
 0xaa5   : > { %v5548_v33 = vpop.eup %5547 }
 0xaa6   : > { %v3065_v35 = vadd.f32 %v3061_v20, %v6232_v49  ;;  %v3060_v51 = vmul.f32 %v5548_v33, %v3051_v2 }
 0xaa7   : > { %v5550_v21 = vpop.eup %5549 }
 0xaa8   : > { %5559 = vtanh.f32 %v3065_v35  ;;  %v3064_v60 = vadd.f32 %v3060_v51, %v6237_v19  ;;  %v3059_v61 = vmul.f32 %v5550_v21, %v3049_v40  ;;  %v3081_v35 = vpop.permute.xlu0 %3080 }
 0xaa9   : > { %v5552_v1 = vpop.eup %5551  ;;  %5561 = vrcp.f32 %v3030_v14 }
 0xaaa   : > { %5563 = vtanh.f32 %v3064_v60  ;;  %v3063_v32 = vadd.f32 %v3059_v61, %v6220_v42  ;;  %v3058_v34 = vmul.f32 %v5552_v1, %v3047_v53  ;;  %v3079_v1 = vpop.permute.xlu1 %3078 }
 0xaab   : > { %v5554_v37 = vpop.eup %5553 }
 0xaac   : > { %5565 = vtanh.f32 %v3063_v32  ;;  %v3062_v26 = vadd.f32 %v3058_v34, %v6228_v4  ;;  %v3073_v8 = vsub.f32 1.0, %v5554_v37  ;;  %v3093_v54 = vmul.f32 %v5554_v37, %v3085_v63 }
 0xaad   : > { %v5556_v24 = vpop.eup %5555 }
 0xaae   : > { %5567 = vtanh.f32 %v3062_v26  ;;  %v3072_v48 = vsub.f32 1.0, %v5556_v24  ;;  %v3092_v20 = vmul.f32 %v5556_v24, %v3083_v25 }
 0xaaf   : > { %v5558_v38 = vpop.eup %5557 }
 0xab0   : > { %v3071_v33 = vsub.f32 1.0, %v5558_v38  ;;  %v3091_v40 = vmul.f32 %v5558_v38, %v3081_v35 }
 0xab5   : > { %v5560_v12 = vpop.eup %5559 }
 0xab6   : > { %v5562_v46 = vpop.eup %5561  ;;  %v3077_v13 = vmul.f32 %v5560_v12, %v3073_v8 }
 0xab7   : > { %v5564_v22 = vpop.eup %5563  ;;  %v3070_v60 = vsub.f32 1.0, %v5562_v46  ;;  %v3090_v34 = vmul.f32 %v5562_v46, %v3079_v1 }
 0xab8   : > { %v6677_v29 = vadd.f32 %v3093_v54, %v3077_v13  ;;  %v3076_v2 = vmul.f32 %v5564_v22, %v3072_v48 }
 0xab9   : > { %v5566_v14 = vpop.eup %5565 }
 0xaba   : > { %v6679_v51 = vadd.f32 %v3092_v20, %v3076_v2  ;;  %v3075_v21 = vmul.f32 %v5566_v14, %v3071_v33  ;;  %3108 = vrot.lane.b32.xlu0 %v6677_v29, %s5754_s21 }
 0xabb   : > { %v5568_v61 = vpop.eup %5567 }
 0xabc   : > { %v6682_v53 = vadd.f32 %v3091_v40, %v3075_v21  ;;  %v3074_v32 = vmul.f32 %v5568_v61, %v3070_v60  ;;  %3106 = vrot.lane.b32.xlu1 %v6679_v51, %s5754_s21 }
 0xabe   : > { %v6685_v26 = vadd.f32 %v3090_v34, %v3074_v32  ;;  %3104 = vrot.lane.b32.xlu0 %v6682_v53, %s5754_s21 }
 0xac0   : > { %3102 = vrot.lane.b32.xlu1 %v6685_v26, %s5754_s21  ;;  %s4638_s21 = sshll.u32 %s7027_s10, 5 }
 0xac1   : > { %s329_s24 = scalar_lea.vmem %s7025_s9, %s4638_s21 }
 0xb2c   : > { %v3109_v37 = vpop.permute.xlu0 %3108 }
 0xb2d   : > { %5209 = vmatprep.subr.mxu1 %v3109_v37  ;;  %5223 = vmatprep.subr.mxu0 %v3109_v37 }
 0xb2e   : > { %5210 = vmatpush3.msra.mxu1 %v3109_v37  ;;  %5224 = vmatpush3.msra.mxu0 %v3109_v37  ;;  %v3107_v24 = vpop.permute.xlu1 %3106 }
 0xb2f   : > { %5211 = vmatprep.subr.mxu1 %v3107_v24  ;;  %5225 = vmatprep.subr.mxu0 %v3107_v24 }
 0xb30   : > { %v3105_v63 = vpop.permute.xlu0 %3104  ;;  %5212 = vmatpush3.msra.mxu1 %v3107_v24  ;;  %5226 = vmatpush3.msra.mxu0 %v3107_v24 }
 0xb31   : > { %5213 = vmatprep.subr.mxu1 %v3105_v63  ;;  %5227 = vmatprep.subr.mxu0 %v3105_v63 }
 0xb32   : > { %5214 = vmatpush3.msra.mxu1 %v3105_v63  ;;  %5228 = vmatpush3.msra.mxu0 %v3105_v63  ;;  %v3103_v38 = vpop.permute.xlu1 %3102 }
 0xb33   : > { %5215 = vmatprep.subr.mxu1 %v3103_v38  ;;  %5229 = vmatprep.subr.mxu0 %v3103_v38 }
 0xb34   : > { %5216 = vmatpush3.msra.mxu1 %v3103_v38  ;;  %5230 = vmatpush3.msra.mxu0 %v3103_v38 }
 0xb35   : > { %5218 = vmatmul.mubr.msk.f32.vlgmr.msra.gmra.mxu1 %vm743_vm2, %v6424_v23  ;;  %5237 = vmatprep.subr.mxu1 %v3109_v37 }
 0xb36   : > { %5238 = vmatpush3.msra.mxu1 %v3109_v37  ;;  %5220 = vmatprep.mubr.msk.f32.mxu1 %vm743_vm2, %v6431_v27 }
 0xb37   : > { %5239 = vmatprep.subr.mxu1 %v3107_v24  ;;  %5232 = vmatmul.mubr.msk.f32.vlgmr.msra.gmra.mxu0 %vm743_vm2, %v6438_v28 }
 0xb38   : > { %5240 = vmatpush3.msra.mxu1 %v3107_v24  ;;  %5234 = vmatprep.mubr.msk.f32.mxu0 %vm743_vm2, %v6445_v3 }
 0xb39   : > { %5221 = vmatmul.mubr.msk.f32.gmra.mxu1 %vm743_vm2, %v6452_v44  ;;  %5241 = vmatprep.subr.mxu1 %v3105_v63 }
 0xb3a   : > { %5242 = vmatpush3.msra.mxu1 %v3105_v63  ;;  %5245 = vmatprep.mubr.msk.f32.mxu1 %vm743_vm2, %v6459_v41 }
 0xb3b   : > { %5243 = vmatprep.subr.mxu1 %v3103_v38  ;;  %5235 = vmatmul.mubr.msk.f32.gmra.mxu0 %vm743_vm2, %v6466_v6 }
 0xb3c   : > { %5244 = vmatpush3.msra.mxu1 %v3103_v38  ;;  %5259 = vmatprep.mubr.msk.f32.mxu0 %vm743_vm2, %v6473_v7 }
 0xb3d   : > { %5246 = vmatmul.mubr.msk.f32.vlgmr.msra.gmra.mxu1 %vm743_vm2, %v6480_v55 }
 0xb3e   : > { %5248 = vmatprep.mubr.msk.f32.mxu1 %vm743_vm2, %v6487_v58 }
 0xb41   : > { %5249 = vmatmul.mubr.msk.f32.gmra.mxu1 %vm743_vm2, %v6494_v10 }
 0xb42   : > { %5273 = vmatprep.mubr.msk.f32.mxu1 %vm743_vm2, %v6501_v17 }
 0xbf5   : > { %v5219_v23 = vpop.f32.mrf.mxu1 }
 0xbf6   : > { %v3186_v8 = vadd.f32 %v6521_v56, %v5219_v23 }
 0xbf7   : > { %v3180_v27 = vpop.f32.mrf.mxu1  ;;  %v5233_v28 = vpop.f32.mrf.mxu0 }
 0xbf8   : > { %v3181_v17 = vadd.f32 %v6528_v62, %v3180_v27  ;;  %v3271_v13 = vadd.f32 %v6548_v50, %v5233_v28 }
 0xbf9   : > { %v5222_v3 = vpop.f32.mrf.mxu1  ;;  %v3265_v44 = vpop.f32.mrf.mxu0 }
 0xbfa   : > { %v3196_v41 = vadd.f32 %v6508_v43, %v5222_v3  ;;  %v3266_v54 = vadd.f32 %v6556_v31, %v3265_v44 }
 0xbfb   : > { %v3190_v6 = vpop.f32.mrf.mxu1  ;;  %v5236_v7 = vpop.f32.mrf.mxu0 }
 0xbfc   : > { %v3191_v55 = vadd.f32 %v6514_v52, %v3190_v6  ;;  %3379 = vrot.lane.b32.xlu0 %v3196_v41, %s5755_s22  ;;  %v3281_v25 = vadd.f32 %v6535_v5, %v5236_v7 }
 0xbfd   : > { %v5247_v58 = vpop.f32.mrf.mxu1  ;;  %v3275_v10 = vpop.f32.mrf.mxu0 }
 0xbfe   : > { %3377 = vrot.lane.b32.xlu1 %v3191_v55, %s5755_s22  ;;  %v3276_v43 = vadd.f32 %v6542_v9, %v3275_v10  ;;  %v3356_v48 = vadd.f32 %v6566_v36, %v5247_v58 }
 0xbff   : > { %v3350_v12 = vpop.f32.mrf.mxu1 }
 0xc00   : > { %3375 = vrot.lane.b32.xlu0 %v3186_v8, %s5755_s22  ;;  %v3351_v5 = vadd.f32 %v6573_v16, %v3350_v12 }
 0xc01   : > { %v5250_v46 = vpop.f32.mrf.mxu1 }
 0xc02   : > { %3373 = vrot.lane.b32.xlu1 %v3181_v17, %s5755_s22  ;;  %v3366_v56 = vadd.f32 %v6646_v18, %v5250_v46 }
 0xc03   : > { %v3360_v52 = vpop.f32.mrf.mxu1 }
 0xc04   : > { %3423 = vrot.lane.b32.xlu0 %v3281_v25, %s5755_s22  ;;  %v3361_v62 = vadd.f32 %v6652_v30, %v3360_v52 }
 0xc06   : > { %3421 = vrot.lane.b32.xlu1 %v3276_v43, %s5755_s22 }
 0xc08   : > { %3419 = vrot.lane.b32.xlu0 %v3271_v13, %s5755_s22 }
 0xc0a   : > { %3417 = vrot.lane.b32.xlu1 %v3266_v54, %s5755_s22 }
 0xc0c   : > { %3467 = vrot.lane.b32.xlu0 %v3366_v56, %s5755_s22 }
 0xc0e   : > { %3465 = vrot.lane.b32.xlu1 %v3361_v62, %s5755_s22 }
 0xc10   : > { %3463 = vrot.lane.b32.xlu0 %v3356_v48, %s5755_s22 }
 0xc12   : > { %3461 = vrot.lane.b32.xlu1 %v3351_v5, %s5755_s22 }
 0xc14   : > { %3499 = vrot.lane.b32.xlu0 %v6677_v29, %s5747_s20 }
 0xc16   : > { %3497 = vrot.lane.b32.xlu1 %v6679_v51, %s5747_s20 }
 0xc18   : > { %3495 = vrot.lane.b32.xlu0 %v6682_v53, %s5747_s20 }
 0xc1a   : > { %3493 = vrot.lane.b32.xlu1 %v6685_v26, %s5747_s20 }
 0xc6e   : > { %v3380_v9 = vpop.permute.xlu0 %3379 }
 0xc6f   : > { %v3388_v50 = vadd.f32 %v3380_v9, %v6162_v11 }
 0xc70   : > { %v3378_v31 = vpop.permute.xlu1 %3377 }
 0xc71   : > { %v4591_v36 = vmul.f32 -1.442695, %v3388_v50  ;;  %v3387_v16 = vadd.f32 %v3378_v31, %v6170_v15 }
 0xc72   : > { %v3376_v22 = vpop.permute.xlu0 %3375 }
 0xc73   : > { %5569 = vpow2.f32 %v4591_v36  ;;  %v4590_v2 = vmul.f32 -1.442695, %v3387_v16  ;;  %v3386_v29 = vadd.f32 %v3376_v22, %v6139_v59 }
 0xc74   : > { %v3374_v20 = vpop.permute.xlu1 %3373 }
 0xc75   : > { %5571 = vpow2.f32 %v4590_v2  ;;  %v4589_v33 = vmul.f32 -1.442695, %v3386_v29  ;;  %v3385_v14 = vadd.f32 %v3374_v20, %v6142_v0 }
 0xc76   : > { %v3424_v35 = vpop.permute.xlu0 %3423 }
 0xc77   : > { %5573 = vpow2.f32 %v4589_v33  ;;  %v4588_v51 = vmul.f32 -1.442695, %v3385_v14  ;;  %v3432_v21 = vadd.f32 %v3424_v35, %v6192_v47 }
 0xc78   : > { %v3422_v40 = vpop.permute.xlu1 %3421 }
 0xc79   : > { %5575 = vpow2.f32 %v4588_v51  ;;  %v4595_v60 = vmul.f32 -1.442695, %v3432_v21  ;;  %v3431_v61 = vadd.f32 %v3422_v40, %v6197_v57 }
 0xc7a   : > { %v3420_v1 = vpop.permute.xlu0 %3419 }
 0xc7b   : > { %v4594_v53 = vmul.f32 -1.442695, %v3431_v61  ;;  %v3430_v32 = vadd.f32 %v3420_v1, %v6187_v39  ;;  %5577 = vpow2.f32 %v4595_v60 }
 0xc7c   : > { %v3418_v34 = vpop.permute.xlu1 %3417 }
 0xc7d   : > { %v4593_v26 = vmul.f32 -1.442695, %v3430_v32  ;;  %v3429_v37 = vadd.f32 %v3418_v34, %v6190_v45  ;;  %5579 = vpow2.f32 %v4594_v53 }
 0xc7e   : > { %v3468_v8 = vpop.permute.xlu0 %3467 }
 0xc7f   : > { %v4592_v24 = vmul.f32 -1.442695, %v3429_v37  ;;  %5581 = vpow2.f32 %v4593_v26 }
 0xc80   : > { %v5570_v63 = vpop.eup %5569  ;;  %v3466_v43 = vpop.permute.xlu1 %3465 }
 0xc81   : > { %v3404_v38 = vadd.f32 1.0, %v5570_v63  ;;  %5583 = vpow2.f32 %v4592_v24 }
 0xc82   : > { %v5572_v23 = vpop.eup %5571  ;;  %v3464_v48 = vpop.permute.xlu0 %3463 }
 0xc83   : > { %5585 = vrcp.f32 %v3404_v38  ;;  %v3403_v27 = vadd.f32 1.0, %v5572_v23 }
 0xc84   : > { %v5574_v28 = vpop.eup %5573  ;;  %v3462_v31 = vpop.permute.xlu1 %3461 }
 0xc85   : > { %5587 = vrcp.f32 %v3403_v27  ;;  %v3402_v3 = vadd.f32 1.0, %v5574_v28 }
 0xc86   : > { %v5576_v44 = vpop.eup %5575  ;;  %v3500_v20 = vpop.permute.xlu0 %3499 }
 0xc87   : > { %5589 = vrcp.f32 %v3402_v3  ;;  %v3401_v41 = vadd.f32 1.0, %v5576_v44 }
 0xc88   : > { %v5578_v6 = vpop.eup %5577  ;;  %v3498_v51 = vpop.permute.xlu1 %3497 }
 0xc89   : > { %5591 = vrcp.f32 %v3401_v41  ;;  %v3448_v58 = vadd.f32 1.0, %v5578_v6 }
 0xc8a   : > { %v5580_v7 = vpop.eup %5579  ;;  %v3496_v24 = vpop.permute.xlu0 %3495 }
 0xc8b   : > { %v3447_v12 = vadd.f32 1.0, %v5580_v7  ;;  %5593 = vrcp.f32 %v3448_v58 }
 0xc8c   : > { %v5582_v55 = vpop.eup %5581  ;;  %v3494_v3 = vpop.permute.xlu1 %3493 }
 0xc8d   : > { %v3446_v25 = vadd.f32 1.0, %v5582_v55  ;;  %5595 = vrcp.f32 %v3447_v12  ;;  %v6760_v12 = vld [vmem:[%s7022_s6 + $0x8] sm:$0xff] }
 0xc8e   : > { %v5584_v10 = vpop.eup %5583 }
 0xc8f   : > { %v3445_v52 = vadd.f32 1.0, %v5584_v10  ;;  %5597 = vrcp.f32 %v3446_v25  ;;  %v6774_v25 = vld [vmem:[%s7022_s6 + $0x28] sm:$0xff] }
 0xc90   : > { %v5586_v17 = vpop.eup %5585 }
 0xc91   : > { %v3476_v46 = vmul.f32 %v5586_v17, %v3468_v8  ;;  %v6767_v17 = vld [vmem:[%s7022_s6 + $0x10] sm:$0xff] }
 0xc92   : > { %v5588_v13 = vpop.eup %5587 }
 0xc93   : > { %v3480_v54 = vadd.f32 %v3476_v46, %v6232_v49  ;;  %v3475_v56 = vmul.f32 %v5588_v13, %v3466_v43  ;;  %v6781_v43 = vld [vmem:[%s7022_s6 + $0x30] sm:$0xff]  ;;  %v6788_v46 = vld [vmem:[%s7022_s6 + $0x18] sm:$0xff]  ;;  %v6795_v13 = vld [vmem:[%s7022_s6 + $0x40] sm:$0xff] }
 0xc94   : > { %v5590_v62 = vpop.eup %5589 }
 0xc95   : > { %5599 = vtanh.f32 %v3480_v54  ;;  %v3479_v5 = vadd.f32 %v3475_v56, %v6237_v19  ;;  %v3474_v9 = vmul.f32 %v5590_v62, %v3464_v48  ;;  %v5720_v54 = vld [vmem:[%s7022_s6] sm:$0xff]  ;;  %v6813_v56 = vld [vmem:[%s7022_s6 + $0x48] sm:$0xff]  ;;  %v6820_v62 = vld [vmem:[%s7022_s6 + $0x50] sm:$0xff] }
 0xc96   : > { %v5592_v50 = vpop.eup %5591  ;;  %5601 = vrcp.f32 %v3445_v52  ;;  %v6802_v52 = vld [vmem:[%s7022_s6 + $0x38] sm:$0xff] }
 0xc97   : > { %5603 = vtanh.f32 %v3479_v5  ;;  %v3478_v36 = vadd.f32 %v3474_v9, %v6220_v42  ;;  %v3473_v16 = vmul.f32 %v5592_v50, %v3462_v31  ;;  %v6827_v48 = vld [vmem:[%s7022_s6 + $0x58] sm:$0xff]  ;;  %v5724_v5 = vld [vmem:[%s7022_s6 + $0x20] sm:$0xff] }
 0xc98   : > { %v5594_v2 = vpop.eup %5593 }
 0xc99   : > { %5605 = vtanh.f32 %v3478_v36  ;;  %v3477_v22 = vadd.f32 %v3473_v16, %v6228_v4  ;;  %v3488_v14 = vsub.f32 1.0, %v5594_v2  ;;  %v3508_v60 = vmul.f32 %v5594_v2, %v3500_v20 }
 0xc9a   : > { %v5596_v29 = vpop.eup %5595 }
 0xc9b   : > { %5607 = vtanh.f32 %v3477_v22  ;;  %v3487_v61 = vsub.f32 1.0, %v5596_v29  ;;  %v3507_v34 = vmul.f32 %v5596_v29, %v3498_v51  ;;  %v6838_v22 = vld [vmem:[%s7024_s8 + $0x18] sm:$0xff]  ;;  %v6851_v51 = vld [vmem:[%s7024_s8 + $0x8] sm:$0xff] }
 0xc9c   : > { %v5598_v33 = vpop.eup %5597 }
 0xc9d   : > { %v3486_v26 = vsub.f32 1.0, %v5598_v33  ;;  %v3506_v23 = vmul.f32 %v5598_v33, %v3496_v24  ;;  %v6844_v33 = vld [vmem:[%s7024_s8 + $0x10] sm:$0xff] }
 0xca2   : > { %v5600_v35 = vpop.eup %5599 }
 0xca3   : > { %v5602_v21 = vpop.eup %5601  ;;  %v3492_v40 = vmul.f32 %v5600_v35, %v3488_v14 }
 0xca4   : > { %v5604_v1 = vpop.eup %5603  ;;  %v3485_v27 = vsub.f32 1.0, %v5602_v21  ;;  %v3505_v6 = vmul.f32 %v5602_v21, %v3494_v3 }
 0xca5   : > { %v6745_v53 = vadd.f32 %v3508_v60, %v3492_v40  ;;  %v3491_v32 = vmul.f32 %v5604_v1, %v3487_v61  ;;  %v6858_v61 = vld [vmem:[%s7024_s8] sm:$0xff] }
 0xca6   : > { %v5606_v37 = vpop.eup %5605 }
 0xca7   : > { %v6747_v63 = vadd.f32 %v3507_v34, %v3491_v32  ;;  %v3490_v38 = vmul.f32 %v5606_v37, %v3486_v26  ;;  %3523 = vrot.lane.b32.xlu0 %v6745_v53, %s5756_s23  ;;  %v6865_v32 = vld [vmem:[%s7024_s8 + $0x38] sm:$0xff]  ;;  %v6872_v26 = vld [vmem:[%s7024_s8 + $0x30] sm:$0xff] }
 0xca8   : > { %v5608_v28 = vpop.eup %5607 }
 0xca9   : > { %v6750_v44 = vadd.f32 %v3506_v23, %v3490_v38  ;;  %v3489_v41 = vmul.f32 %v5608_v28, %v3485_v27  ;;  %3521 = vrot.lane.b32.xlu1 %v6747_v63, %s5756_s23  ;;  %v6878_v38 = vld [vmem:[%s7024_s8 + $0x28] sm:$0xff]  ;;  %v6886_v28 = vld [vmem:[%s7024_s8 + $0x20] sm:$0xff] }
 0xcab   : > { %v6753_v7 = vadd.f32 %v3505_v6, %v3489_v41  ;;  %3519 = vrot.lane.b32.xlu0 %v6750_v44, %s5756_s23 }
 0xcad   : > { %3517 = vrot.lane.b32.xlu1 %v6753_v7, %s5756_s23 }
 0xd19   : > { %v3524_v55 = vpop.permute.xlu0 %3523 }
 0xd1a   : > { %5251 = vmatprep.subr.mxu0 %v3524_v55  ;;  %5265 = vmatprep.subr.mxu1 %v3524_v55 }
 0xd1b   : > { %5252 = vmatpush3.msra.mxu0 %v3524_v55  ;;  %5266 = vmatpush3.msra.mxu1 %v3524_v55  ;;  %v3522_v58 = vpop.permute.xlu1 %3521 }
 0xd1c   : > { %5253 = vmatprep.subr.mxu0 %v3522_v58  ;;  %5267 = vmatprep.subr.mxu1 %v3522_v58 }
 0xd1d   : > { %v3520_v8 = vpop.permute.xlu0 %3519  ;;  %5254 = vmatpush3.msra.mxu0 %v3522_v58  ;;  %5268 = vmatpush3.msra.mxu1 %v3522_v58 }
 0xd1e   : > { %5255 = vmatprep.subr.mxu0 %v3520_v8  ;;  %5269 = vmatprep.subr.mxu1 %v3520_v8 }
 0xd1f   : > { %5256 = vmatpush3.msra.mxu0 %v3520_v8  ;;  %5270 = vmatpush3.msra.mxu1 %v3520_v8  ;;  %v3518_v10 = vpop.permute.xlu1 %3517 }
 0xd20   : > { %5257 = vmatprep.subr.mxu0 %v3518_v10  ;;  %5271 = vmatprep.subr.mxu1 %v3518_v10 }
 0xd21   : > { %5258 = vmatpush3.msra.mxu0 %v3518_v10  ;;  %5272 = vmatpush3.msra.mxu1 %v3518_v10 }
 0xd22   : > { %5260 = vmatmul.mubr.msk.f32.vlgmr.msra.gmra.mxu0 %vm743_vm2, %v6760_v12  ;;  %5279 = vmatprep.subr.mxu0 %v3524_v55 }
 0xd23   : > { %5280 = vmatpush3.msra.mxu0 %v3524_v55  ;;  %5262 = vmatprep.mubr.msk.f32.mxu0 %vm743_vm2, %v6767_v17  ;;  %v6896_v55 = vld [vmem:[%s7024_s8 + $0x48] sm:$0xff] }
 0xd24   : > { %5281 = vmatprep.subr.mxu0 %v3522_v58  ;;  %5274 = vmatmul.mubr.msk.f32.vlgmr.msra.gmra.mxu1 %vm743_vm2, %v6774_v25 }
 0xd25   : > { %5282 = vmatpush3.msra.mxu0 %v3522_v58  ;;  %5276 = vmatprep.mubr.msk.f32.mxu1 %vm743_vm2, %v6781_v43 }
 0xd26   : > { %5263 = vmatmul.mubr.msk.f32.gmra.mxu0 %vm743_vm2, %v6788_v46  ;;  %5283 = vmatprep.subr.mxu0 %v3520_v8 }
 0xd27   : > { %5284 = vmatpush3.msra.mxu0 %v3520_v8  ;;  %5287 = vmatprep.mubr.msk.f32.mxu0 %vm743_vm2, %v6795_v13  ;;  %v6903_v8 = vld [vmem:[%s7024_s8 + $0x40] sm:$0xff] }
 0xd28   : > { %5285 = vmatprep.subr.mxu0 %v3518_v10  ;;  %5277 = vmatmul.mubr.msk.f32.gmra.mxu1 %vm743_vm2, %v6802_v52 }
 0xd29   : > { %5286 = vmatpush3.msra.mxu0 %v3518_v10  ;;  %5301 = vmatprep.mubr.msk.f32.mxu1 %vm743_vm2, %v5720_v54 }
 0xd2a   : > { %5288 = vmatmul.mubr.msk.f32.vlgmr.msra.gmra.mxu0 %vm743_vm2, %v6813_v56 }
 0xd2b   : > { %5290 = vmatprep.mubr.msk.f32.mxu0 %vm743_vm2, %v6820_v62 }
 0xd2e   : > { %5291 = vmatmul.mubr.msk.f32.gmra.mxu0 %vm743_vm2, %v6827_v48 }
 0xd2f   : > { %5315 = vmatprep.mubr.msk.f32.mxu0 %vm743_vm2, %v5724_v5 }
 0xde2   : > { %v5261_v9 = vpop.f32.mrf.mxu0 }
 0xde3   : > { %v3601_v21 = vadd.f32 %v6851_v51, %v5261_v9 }
 0xde4   : > { %v3595_v50 = vpop.f32.mrf.mxu0  ;;  %v5275_v31 = vpop.f32.mrf.mxu1 }
 0xde5   : > { %v3596_v1 = vadd.f32 %v6858_v61, %v3595_v50  ;;  %v3686_v23 = vadd.f32 %v6878_v38, %v5275_v31 }
 0xde6   : > { %v5264_v36 = vpop.f32.mrf.mxu0  ;;  %v3680_v16 = vpop.f32.mrf.mxu1 }
 0xde7   : > { %v3611_v2 = vadd.f32 %v6838_v22, %v5264_v36  ;;  %v3681_v3 = vadd.f32 %v6886_v28, %v3680_v16 }
 0xde8   : > { %v3605_v29 = vpop.f32.mrf.mxu0  ;;  %v5278_v20 = vpop.f32.mrf.mxu1 }
 0xde9   : > { %v3606_v14 = vadd.f32 %v6844_v33, %v3605_v29  ;;  %3794 = vrot.lane.b32.xlu0 %v3611_v2, %s5757_s15  ;;  %v3696_v34 = vadd.f32 %v6865_v32, %v5278_v20 }
 0xdea   : > { %v5289_v35 = vpop.f32.mrf.mxu0  ;;  %v3690_v40 = vpop.f32.mrf.mxu1 }
 0xdeb   : > { %3792 = vrot.lane.b32.xlu1 %v3606_v14, %s5757_s15  ;;  %v3691_v37 = vadd.f32 %v6872_v26, %v3690_v40  ;;  %v3771_v58 = vadd.f32 %v6896_v55, %v5289_v35 }
 0xdec   : > { %v3765_v60 = vpop.f32.mrf.mxu0 }
 0xded   : > { %3790 = vrot.lane.b32.xlu0 %v3601_v21, %s5757_s15 }
 0xdee   : > { %v5292_v24 = vpop.f32.mrf.mxu0 }
 0xdef   : > { %3788 = vrot.lane.b32.xlu1 %v3596_v1, %s5757_s15  ;;  %v3781_v41 = vadd.f32 %v6646_v18, %v5292_v24  ;;  %v3766_v18 = vadd.f32 %v6903_v8, %v3765_v60 }
 0xdf0   : > { %v3775_v27 = vpop.f32.mrf.mxu0 }
 0xdf1   : > { %3838 = vrot.lane.b32.xlu0 %v3696_v34, %s5757_s15  ;;  %v3776_v6 = vadd.f32 %v6652_v30, %v3775_v27 }
 0xdf3   : > { %3836 = vrot.lane.b32.xlu1 %v3691_v37, %s5757_s15 }
 0xdf5   : > { %3834 = vrot.lane.b32.xlu0 %v3686_v23, %s5757_s15 }
 0xdf7   : > { %3832 = vrot.lane.b32.xlu1 %v3681_v3, %s5757_s15 }
 0xdf9   : > { %3882 = vrot.lane.b32.xlu0 %v3781_v41, %s5757_s15 }
 0xdfb   : > { %3880 = vrot.lane.b32.xlu1 %v3776_v6, %s5757_s15 }
 0xdfd   : > { %3878 = vrot.lane.b32.xlu0 %v3771_v58, %s5757_s15 }
 0xdff   : > { %3876 = vrot.lane.b32.xlu1 %v3766_v18, %s5757_s15  ;;  %s5759_s15 = smov 7  }
 0xe01   : > { %3914 = vrot.lane.b32.xlu0 %v6745_v53, %s5747_s20 }
 0xe03   : > { %3912 = vrot.lane.b32.xlu1 %v6747_v63, %s5747_s20 }
 0xe05   : > { %3910 = vrot.lane.b32.xlu0 %v6750_v44, %s5747_s20 }
 0xe07   : > { %3908 = vrot.lane.b32.xlu1 %v6753_v7, %s5747_s20 }
 0xe5b   : > { %v3795_v30 = vpop.permute.xlu0 %3794 }
 0xe5c   : > { %v3803_v10 = vadd.f32 %v3795_v30, %v6162_v11 }
 0xe5d   : > { %v3793_v54 = vpop.permute.xlu1 %3792 }
 0xe5e   : > { %v4611_v5 = vmul.f32 -1.442695, %v3803_v10  ;;  %v3802_v9 = vadd.f32 %v3793_v54, %v6170_v15 }
 0xe5f   : > { %v3791_v50 = vpop.permute.xlu0 %3790 }
 0xe60   : > { %5609 = vpow2.f32 %v4611_v5  ;;  %v4610_v31 = vmul.f32 -1.442695, %v3802_v9  ;;  %v3801_v53 = vadd.f32 %v3791_v50, %v6139_v59 }
 0xe61   : > { %v3789_v36 = vpop.permute.xlu1 %3788 }
 0xe62   : > { %5611 = vpow2.f32 %v4610_v31  ;;  %v4609_v63 = vmul.f32 -1.442695, %v3801_v53  ;;  %v3800_v44 = vadd.f32 %v3789_v36, %v6142_v0 }
 0xe63   : > { %v3839_v16 = vpop.permute.xlu0 %3838 }
 0xe64   : > { %5613 = vpow2.f32 %v4609_v63  ;;  %v4608_v7 = vmul.f32 -1.442695, %v3800_v44  ;;  %v3847_v2 = vadd.f32 %v3839_v16, %v6192_v47 }
 0xe65   : > { %v3837_v29 = vpop.permute.xlu1 %3836 }
 0xe66   : > { %5615 = vpow2.f32 %v4608_v7  ;;  %v4615_v20 = vmul.f32 -1.442695, %v3847_v2  ;;  %v3846_v14 = vadd.f32 %v3837_v29, %v6197_v57 }
 0xe67   : > { %v3835_v35 = vpop.permute.xlu0 %3834 }
 0xe68   : > { %v4614_v21 = vmul.f32 -1.442695, %v3846_v14  ;;  %v3845_v40 = vadd.f32 %v3835_v35, %v6187_v39  ;;  %5617 = vpow2.f32 %v4615_v20 }
 0xe69   : > { %v3833_v60 = vpop.permute.xlu1 %3832 }
 0xe6a   : > { %v4613_v1 = vmul.f32 -1.442695, %v3845_v40  ;;  %v3844_v34 = vadd.f32 %v3833_v60, %v6190_v45  ;;  %5619 = vpow2.f32 %v4614_v21 }
 0xe6b   : > { %v3883_v9 = vpop.permute.xlu0 %3882 }
 0xe6c   : > { %v4612_v37 = vmul.f32 -1.442695, %v3844_v34  ;;  %5621 = vpow2.f32 %v4613_v1 }
 0xe6d   : > { %v5610_v24 = vpop.eup %5609  ;;  %v3881_v63 = vpop.permute.xlu1 %3880 }
 0xe6e   : > { %v3819_v23 = vadd.f32 1.0, %v5610_v24  ;;  %5623 = vpow2.f32 %v4612_v37 }
 0xe6f   : > { %v5612_v27 = vpop.eup %5611  ;;  %v3879_v14 = vpop.permute.xlu0 %3878 }
 0xe70   : > { %5625 = vrcp.f32 %v3819_v23  ;;  %v3818_v3 = vadd.f32 1.0, %v5612_v27 }
 0xe71   : > { %v5614_v41 = vpop.eup %5613  ;;  %v3877_v60 = vpop.permute.xlu1 %3876 }
 0xe72   : > { %5627 = vrcp.f32 %v3818_v3  ;;  %v3817_v6 = vadd.f32 1.0, %v5614_v41 }
 0xe73   : > { %v5616_v58 = vpop.eup %5615  ;;  %v3915_v27 = vpop.permute.xlu0 %3914 }
 0xe74   : > { %5629 = vrcp.f32 %v3817_v6  ;;  %v3816_v18 = vadd.f32 1.0, %v5616_v58 }
 0xe75   : > { %v5618_v30 = vpop.eup %5617  ;;  %v3913_v58 = vpop.permute.xlu1 %3912 }
 0xe76   : > { %5631 = vrcp.f32 %v3816_v18  ;;  %v3863_v5 = vadd.f32 1.0, %v5618_v30 }
 0xe77   : > { %v5620_v10 = vpop.eup %5619 }
 0xe78   : > { %v3862_v31 = vadd.f32 1.0, %v5620_v10  ;;  %5633 = vrcp.f32 %v3863_v5 }
 0xe79   : > { %v5622_v54 = vpop.eup %5621 }
 0xe7a   : > { %v3861_v36 = vadd.f32 1.0, %v5622_v54  ;;  %5635 = vrcp.f32 %v3862_v31 }
 0xe7b   : > { %v5624_v50 = vpop.eup %5623 }
 0xe7c   : > { %v3860_v7 = vadd.f32 1.0, %v5624_v50  ;;  %5637 = vrcp.f32 %v3861_v36 }
 0xe7d   : > { %v5626_v53 = vpop.eup %5625 }
 0xe7e   : > { %v3891_v44 = vmul.f32 %v5626_v53, %v3883_v9 }
 0xe7f   : > { %v5628_v16 = vpop.eup %5627 }
 0xe80   : > { %v3895_v2 = vadd.f32 %v3891_v44, %v6232_v49  ;;  %v3890_v29 = vmul.f32 %v5628_v16, %v3881_v63  ;;  %v3911_v63 = vpop.permute.xlu0 %3910 }
 0xe81   : > { %v5630_v20 = vpop.eup %5629 }
 0xe82   : > { %5639 = vtanh.f32 %v3895_v2  ;;  %v3894_v35 = vadd.f32 %v3890_v29, %v6237_v19  ;;  %v3889_v21 = vmul.f32 %v5630_v20, %v3879_v14  ;;  %v3909_v20 = vpop.permute.xlu1 %3908 }
 0xe83   : > { %v5632_v40 = vpop.eup %5631  ;;  %5641 = vrcp.f32 %v3860_v7 }
 0xe84   : > { %5643 = vtanh.f32 %v3894_v35  ;;  %v3893_v1 = vadd.f32 %v3889_v21, %v6220_v42  ;;  %v3888_v34 = vmul.f32 %v5632_v40, %v3877_v60 }
 0xe85   : > { %v5634_v24 = vpop.eup %5633 }
 0xe86   : > { %5645 = vtanh.f32 %v3893_v1  ;;  %v3892_v37 = vadd.f32 %v3888_v34, %v6228_v4  ;;  %v3903_v41 = vsub.f32 1.0, %v5634_v24  ;;  %v3923_v10 = vmul.f32 %v5634_v24, %v3915_v27 }
 0xe87   : > { %v5636_v23 = vpop.eup %5635 }
 0xe88   : > { %5647 = vtanh.f32 %v3892_v37  ;;  %v3902_v54 = vsub.f32 1.0, %v5636_v23  ;;  %v3922_v31 = vmul.f32 %v5636_v23, %v3913_v58 }
 0xe89   : > { %v5638_v3 = vpop.eup %5637 }
 0xe8a   : > { %v3901_v53 = vsub.f32 1.0, %v5638_v3  ;;  %v3921_v7 = vmul.f32 %v5638_v3, %v3911_v63 }
 0xe8f   : > { %v5640_v6 = vpop.eup %5639 }
 0xe90   : > { %v5642_v18 = vpop.eup %5641  ;;  %v3907_v30 = vmul.f32 %v5640_v6, %v3903_v41 }
 0xe91   : > { %v5644_v5 = vpop.eup %5643  ;;  %v3900_v2 = vsub.f32 1.0, %v5642_v18  ;;  %v3920_v21 = vmul.f32 %v5642_v18, %v3909_v20 }
 0xe92   : > { %v6929_v9 = vadd.f32 %v3923_v10, %v3907_v30  ;;  %v3906_v50 = vmul.f32 %v5644_v5, %v3902_v54 }
 0xe93   : > { %v5646_v36 = vpop.eup %5645 }
 0xe94   : > { %v6931_v44 = vadd.f32 %v3922_v31, %v3906_v50  ;;  %v3905_v16 = vmul.f32 %v5646_v36, %v3901_v53  ;;  %3938 = vrot.lane.b32.xlu0 %v6929_v9, %s5758_s14 }
 0xe95   : > { %v5648_v29 = vpop.eup %5647 }
 0xe96   : > { %v6934_v14 = vadd.f32 %v3921_v7, %v3905_v16  ;;  %v3904_v35 = vmul.f32 %v5648_v29, %v3900_v2  ;;  %3936 = vrot.lane.b32.xlu1 %v6931_v44, %s5758_s14 }
 0xe98   : > { %v6937_v40 = vadd.f32 %v3920_v21, %v3904_v35  ;;  %3934 = vrot.lane.b32.xlu0 %v6934_v14, %s5758_s14 }
 0xe9a   : > { %3932 = vrot.lane.b32.xlu1 %v6937_v40, %s5758_s14 }
 0xf06   : > { %v3939_v60 = vpop.permute.xlu0 %3938 }
 0xf07   : > { %5293 = vmatprep.subr.mxu1 %v3939_v60  ;;  %5307 = vmatprep.subr.mxu0 %v3939_v60 }
 0xf08   : > { %5294 = vmatpush3.msra.mxu1 %v3939_v60  ;;  %5308 = vmatpush3.msra.mxu0 %v3939_v60  ;;  %v3937_v1 = vpop.permute.xlu1 %3936 }
 0xf09   : > { %5295 = vmatprep.subr.mxu1 %v3937_v1  ;;  %5309 = vmatprep.subr.mxu0 %v3937_v1 }
 0xf0a   : > { %v3935_v34 = vpop.permute.xlu0 %3934  ;;  %5296 = vmatpush3.msra.mxu1 %v3937_v1  ;;  %5310 = vmatpush3.msra.mxu0 %v3937_v1 }
 0xf0b   : > { %5297 = vmatprep.subr.mxu1 %v3935_v34  ;;  %5311 = vmatprep.subr.mxu0 %v3935_v34 }
 0xf0c   : > { %5298 = vmatpush3.msra.mxu1 %v3935_v34  ;;  %5312 = vmatpush3.msra.mxu0 %v3935_v34  ;;  %v3933_v37 = vpop.permute.xlu1 %3932 }
 0xf0d   : > { %5299 = vmatprep.subr.mxu1 %v3933_v37  ;;  %5313 = vmatprep.subr.mxu0 %v3933_v37 }
 0xf0e   : > { %5300 = vmatpush3.msra.mxu1 %v3933_v37  ;;  %5314 = vmatpush3.msra.mxu0 %v3933_v37 }
 0xf0f   : > { %5302 = vmatmul.mubr.msk.f32.vlgmr.msra.gmra.mxu1 %vm743_vm2, %v6760_v12  ;;  %5321 = vmatprep.subr.mxu1 %v3939_v60 }
 0xf10   : > { %5322 = vmatpush3.msra.mxu1 %v3939_v60  ;;  %5304 = vmatprep.mubr.msk.f32.mxu1 %vm743_vm2, %v6767_v17 }
 0xf11   : > { %5323 = vmatprep.subr.mxu1 %v3937_v1  ;;  %5316 = vmatmul.mubr.msk.f32.vlgmr.msra.gmra.mxu0 %vm743_vm2, %v6774_v25 }
 0xf12   : > { %5324 = vmatpush3.msra.mxu1 %v3937_v1  ;;  %5318 = vmatprep.mubr.msk.f32.mxu0 %vm743_vm2, %v6781_v43 }
 0xf13   : > { %5305 = vmatmul.mubr.msk.f32.gmra.mxu1 %vm743_vm2, %v6788_v46  ;;  %5325 = vmatprep.subr.mxu1 %v3935_v34 }
 0xf14   : > { %5326 = vmatpush3.msra.mxu1 %v3935_v34  ;;  %5329 = vmatprep.mubr.msk.f32.mxu1 %vm743_vm2, %v6795_v13 }
 0xf15   : > { %5327 = vmatprep.subr.mxu1 %v3933_v37  ;;  %5319 = vmatmul.mubr.msk.f32.gmra.mxu0 %vm743_vm2, %v6802_v52 }
 0xf16   : > { %5328 = vmatpush3.msra.mxu1 %v3933_v37 }
 0xf17   : > { %5330 = vmatmul.mubr.msk.f32.vlgmr.msra.gmra.mxu1 %vm743_vm2, %v6813_v56 }
 0xf18   : > { %5332 = vmatprep.mubr.msk.f32.mxu1 %vm743_vm2, %v6820_v62 }
 0xf1b   : > { %5333 = vmatmul.mubr.msk.f32.gmra.mxu1 %vm743_vm2, %v6827_v48 }
 0xfcf   : > { %v5303_v12 = vpop.f32.mrf.mxu1 }
 0xfd0   : > { %v4016_v17 = vadd.f32 %v6851_v51, %v5303_v12 }
 0xfd1   : > { %v4010_v25 = vpop.f32.mrf.mxu1  ;;  %v5317_v43 = vpop.f32.mrf.mxu0 }
 0xfd2   : > { %v4011_v46 = vadd.f32 %v6858_v61, %v4010_v25  ;;  %4205 = vrot.lane.b32.xlu1 %v4016_v17, %s5759_s15  ;;  %v4101_v51 = vadd.f32 %v6878_v38, %v5317_v43 }
 0xfd3   : > { %v5306_v13 = vpop.f32.mrf.mxu1  ;;  %v4095_v52 = vpop.f32.mrf.mxu0 }
 0xfd4   : > { %v4026_v56 = vadd.f32 %v6838_v22, %v5306_v13  ;;  %4203 = vrot.lane.b32.xlu0 %v4011_v46, %s5759_s15  ;;  %v4096_v61 = vadd.f32 %v6886_v28, %v4095_v52 }
 0xfd5   : > { %v4020_v62 = vpop.f32.mrf.mxu1  ;;  %v5320_v24 = vpop.f32.mrf.mxu0 }
 0xfd6   : > { %v4021_v48 = vadd.f32 %v6844_v33, %v4020_v62  ;;  %4209 = vrot.lane.b32.xlu1 %v4026_v56, %s5759_s15  ;;  %v4111_v22 = vadd.f32 %v6865_v32, %v5320_v24  ;;  %v5735_v32 = vld [vmem:[%s7024_s8 + $0x58] sm:$0xff] }
 0xfd7   : > { %v5331_v23 = vpop.f32.mrf.mxu1  ;;  %v4105_v27 = vpop.f32.mrf.mxu0 }
 0xfd8   : > { %4207 = vrot.lane.b32.xlu0 %v4021_v48, %s5759_s15  ;;  %v4106_v41 = vadd.f32 %v6872_v26, %v4105_v27  ;;  %v4186_v38 = vadd.f32 %v6896_v55, %v5331_v23  ;;  %v5736_v26 = vld [vmem:[%s7024_s8 + $0x50] sm:$0xff] }
 0xfd9   : > { %v4180_v3 = vpop.f32.mrf.mxu1 }
 0xfda   : > { %4249 = vrot.lane.b32.xlu1 %v4101_v51, %s5759_s15  ;;  %v4181_v6 = vadd.f32 %v6903_v8, %v4180_v3 }
 0xfdb   : > { %v5334_v33 = vpop.f32.mrf.mxu1 }
 0xfdc   : > { %4247 = vrot.lane.b32.xlu0 %v4096_v61, %s5759_s15  ;;  %v4196_v58 = vadd.f32 %v5735_v32, %v5334_v33 }
 0xfdd   : > { %v4190_v28 = vpop.f32.mrf.mxu1 }
 0xfde   : > { %4253 = vrot.lane.b32.xlu1 %v4111_v22, %s5759_s15  ;;  %v4191_v18 = vadd.f32 %v5736_v26, %v4190_v28 }
 0xfe0   : > { %4251 = vrot.lane.b32.xlu0 %v4106_v41, %s5759_s15 }
 0xfe2   : > { %4293 = vrot.lane.b32.xlu1 %v4186_v38, %s5759_s15 }
 0xfe4   : > { %4291 = vrot.lane.b32.xlu0 %v4181_v6, %s5759_s15 }
 0xfe6   : > { %4297 = vrot.lane.b32.xlu1 %v4196_v58, %s5759_s15 }
 0xfe8   : > { %4295 = vrot.lane.b32.xlu0 %v4191_v18, %s5759_s15 }
 0xfea   : > { %4325 = vrot.lane.b32.xlu1 %v6934_v14, %s5747_s20 }
 0xfec   : > { %4323 = vrot.lane.b32.xlu0 %v6937_v40, %s5747_s20 }
 0xfee   : > { %4329 = vrot.lane.b32.xlu1 %v6929_v9, %s5747_s20 }
 0xff0   : > { %4327 = vrot.lane.b32.xlu0 %v6931_v44, %s5747_s20  ;;  %s5760_s20 = smov 121  }
0x1044   : > { %v4206_v55 = vpop.permute.xlu1 %4205 }
0x1045   : > { %v4216_v8 = vadd.f32 %v4206_v55, %v6139_v59 }
0x1046   : > { %v4204_v30 = vpop.permute.xlu0 %4203 }
0x1047   : > { %v4629_v10 = vmul.f32 -1.442695, %v4216_v8  ;;  %v4215_v54 = vadd.f32 %v4204_v30, %v6142_v0 }
0x1048   : > { %v4210_v5 = vpop.permute.xlu1 %4209 }
0x1049   : > { %5649 = vpow2.f32 %v4629_v10  ;;  %v4628_v50 = vmul.f32 -1.442695, %v4215_v54  ;;  %v4218_v31 = vadd.f32 %v4210_v5, %v6162_v11 }
0x104a   : > { %v4208_v53 = vpop.permute.xlu0 %4207 }
0x104b   : > { %5651 = vpow2.f32 %v4628_v50  ;;  %v4631_v36 = vmul.f32 -1.442695, %v4218_v31  ;;  %v4217_v9 = vadd.f32 %v4208_v53, %v6170_v15 }
0x104c   : > { %v4250_v63 = vpop.permute.xlu1 %4249 }
0x104d   : > { %5653 = vpow2.f32 %v4631_v36  ;;  %v4630_v44 = vmul.f32 -1.442695, %v4217_v9  ;;  %v4260_v16 = vadd.f32 %v4250_v63, %v6187_v39 }
0x104e   : > { %v4248_v59 = vpop.permute.xlu0 %4247 }
0x104f   : > { %5655 = vpow2.f32 %v4630_v44  ;;  %v4633_v7 = vmul.f32 -1.442695, %v4260_v16  ;;  %v4259_v0 = vadd.f32 %v4248_v59, %v6190_v45 }
0x1050   : > { %v4254_v2 = vpop.permute.xlu1 %4253 }
0x1051   : > { %v4632_v29 = vmul.f32 -1.442695, %v4259_v0  ;;  %v4262_v20 = vadd.f32 %v4254_v2, %v6192_v47  ;;  %5657 = vpow2.f32 %v4633_v7 }
0x1052   : > { %v4252_v11 = vpop.permute.xlu0 %4251 }
0x1053   : > { %v4635_v14 = vmul.f32 -1.442695, %v4262_v20  ;;  %v4261_v35 = vadd.f32 %v4252_v11, %v6197_v57  ;;  %5659 = vpow2.f32 %v4632_v29 }
0x1054   : > { %v4294_v25 = vpop.permute.xlu1 %4293 }
0x1055   : > { %v4634_v15 = vmul.f32 -1.442695, %v4261_v35  ;;  %5661 = vpow2.f32 %v4635_v14 }
0x1056   : > { %v5650_v21 = vpop.eup %5649  ;;  %v4292_v56 = vpop.permute.xlu0 %4291 }
0x1057   : > { %v4232_v40 = vadd.f32 1.0, %v5650_v21  ;;  %5663 = vpow2.f32 %v4634_v15 }
0x1058   : > { %v5652_v39 = vpop.eup %5651  ;;  %v4298_v27 = vpop.permute.xlu1 %4297 }
0x1059   : > { %5665 = vrcp.f32 %v4232_v40  ;;  %v4231_v60 = vadd.f32 1.0, %v5652_v39 }
0x105a   : > { %v5654_v1 = vpop.eup %5653  ;;  %v4296_v33 = vpop.permute.xlu0 %4295 }
0x105b   : > { %5667 = vrcp.f32 %v4231_v60  ;;  %v4234_v45 = vadd.f32 1.0, %v5654_v1 }
0x105c   : > { %v5656_v34 = vpop.eup %5655  ;;  %v4326_v58 = vpop.permute.xlu1 %4325 }
0x105d   : > { %5669 = vrcp.f32 %v4234_v45  ;;  %v4233_v47 = vadd.f32 1.0, %v5656_v34 }
0x105e   : > { %v5658_v37 = vpop.eup %5657  ;;  %v4324_v8 = vpop.permute.xlu0 %4323 }
0x105f   : > { %5671 = vrcp.f32 %v4233_v47  ;;  %v4276_v57 = vadd.f32 1.0, %v5658_v37 }
0x1060   : > { %v5660_v12 = vpop.eup %5659  ;;  %v4330_v9 = vpop.permute.xlu1 %4329 }
0x1061   : > { %v4275_v46 = vadd.f32 1.0, %v5660_v12  ;;  %5673 = vrcp.f32 %v4276_v57 }
0x1062   : > { %v5662_v17 = vpop.eup %5661  ;;  %v4328_v7 = vpop.permute.xlu0 %4327 }
0x1063   : > { %v4278_v52 = vadd.f32 1.0, %v5662_v17  ;;  %5675 = vrcp.f32 %v4275_v46 }
0x1064   : > { %v5664_v43 = vpop.eup %5663 }
0x1065   : > { %v4277_v48 = vadd.f32 1.0, %v5664_v43  ;;  %5677 = vrcp.f32 %v4278_v52 }
0x1066   : > { %v5666_v13 = vpop.eup %5665 }
0x1067   : > { %v4304_v62 = vmul.f32 %v5666_v13, %v4294_v25 }
0x1068   : > { %v5668_v24 = vpop.eup %5667 }
0x1069   : > { %v4308_v51 = vadd.f32 %v4304_v62, %v6220_v42  ;;  %v4303_v23 = vmul.f32 %v5668_v24, %v4292_v56 }
0x106a   : > { %v5670_v61 = vpop.eup %5669 }
0x106b   : > { %5679 = vtanh.f32 %v4308_v51  ;;  %v4307_v3 = vadd.f32 %v4303_v23, %v6228_v4  ;;  %v4306_v22 = vmul.f32 %v5670_v61, %v4298_v27 }
0x106c   : > { %v5672_v41 = vpop.eup %5671  ;;  %5681 = vrcp.f32 %v4277_v48 }
0x106d   : > { %5683 = vtanh.f32 %v4307_v3  ;;  %v4310_v38 = vadd.f32 %v4306_v22, %v6232_v49  ;;  %v4305_v6 = vmul.f32 %v5672_v41, %v4296_v33 }
0x106e   : > { %v5674_v42 = vpop.eup %5673 }
0x106f   : > { %5685 = vtanh.f32 %v4310_v38  ;;  %v4309_v28 = vadd.f32 %v4305_v6, %v6237_v19  ;;  %v4316_v18 = vsub.f32 1.0, %v5674_v42  ;;  %v4336_v10 = vmul.f32 %v5674_v42, %v4326_v58 }
0x1070   : > { %v5676_v32 = vpop.eup %5675 }
0x1071   : > { %5687 = vtanh.f32 %v4309_v28  ;;  %v4315_v54 = vsub.f32 1.0, %v5676_v32  ;;  %v4335_v49 = vmul.f32 %v5676_v32, %v4324_v8 }
0x1072   : > { %v5678_v26 = vpop.eup %5677 }
0x1073   : > { %v4318_v53 = vsub.f32 1.0, %v5678_v26  ;;  %v4338_v44 = vmul.f32 %v5678_v26, %v4330_v9 }
0x1078   : > { %v5680_v55 = vpop.eup %5679 }
0x1079   : > { %v5682_v4 = vpop.eup %5681  ;;  %v4320_v30 = vmul.f32 %v5680_v55, %v4316_v18 }
0x107a   : > { %v5684_v5 = vpop.eup %5683  ;;  %v4317_v16 = vsub.f32 1.0, %v5682_v4  ;;  %v4337_v29 = vmul.f32 %v5682_v4, %v4328_v7 }
0x107b   : > { %v4340_v50 = vadd.f32 %v4336_v10, %v4320_v30  ;;  %v4319_v31 = vmul.f32 %v5684_v5, %v4315_v54 }
0x107c   : > { %v5686_v36 = vpop.eup %5685 }
0x107d   : > { %v4339_v19 = vadd.f32 %v4335_v49, %v4319_v31  ;;  %v4322_v63 = vmul.f32 %v5686_v36, %v4318_v53  ;;  %4349 = vrot.lane.b32.xlu1 %v4340_v50, %s5760_s20 }
0x107e   : > { %v5688_v59 = vpop.eup %5687 }
0x107f   : > { %v4342_v0 = vadd.f32 %v4338_v44, %v4322_v63  ;;  %v4321_v2 = vmul.f32 %v5688_v59, %v4317_v16  ;;  %4347 = vrot.lane.b32.xlu0 %v4339_v19, %s5760_s20 }
0x1081   : > { %v4341_v20 = vadd.f32 %v4337_v29, %v4321_v2  ;;  %4353 = vrot.lane.b32.xlu1 %v4342_v0, %s5760_s20 }
0x1083   : > { %4351 = vrot.lane.b32.xlu0 %v4341_v20, %s5760_s20 }
0x10ef   : > { %v4350_v11 = vpop.permute.xlu1 %4349 }
0x10f0   : > { %4361 = vst.msk [vmem:[%s329_s24 + $0x8] sm:$0xff] %vm4359_vm3, %v4350_v11 }
0x10f1   : > { %v4348_v14 = vpop.permute.xlu0 %4347 }
0x10f2   : > { %4360 = vst.msk [vmem:[%s329_s24] sm:$0xff] %vm4359_vm3, %v4348_v14 }
0x10f3   : > { %v4354_v35 = vpop.permute.xlu1 %4353 }
0x10f4   : > { %4363 = vst.msk [vmem:[%s329_s24 + $0x18] sm:$0xff] %vm4359_vm3, %v4354_v35 }
0x10f5   : > { %v4352_v15 = vpop.permute.xlu0 %4351 }
0x10f6   : > { %4362 = vst.msk [vmem:[%s329_s24 + $0x10] sm:$0xff] %vm4359_vm3, %v4352_v15 }
0x10f7 PF: > { %s19_s30 = sadd.s32 1, %s5743_s30  }
0x10f8   : > { %p16_p4 = scmp.ge.s32.totalorder %s19_s30, 4  }
0x10fa   :  { %18 = sbr.rel (!%p16_p4) target bundleno = 1 (0x1), region = 94 }

</bundles_post_ra>
